<compile_context>
chip_gen: v5e
topology: v5e:2x2
jax: 0.10.0
libtpu: 0.0.40
codegen_flags: <defaults>
</compile_context>

<pallas_src>
import functools

import jax
import jax.numpy as jnp
import numpy as np
from jax.experimental import pallas as pl
from jax.experimental.pallas import tpu as pltpu

EPS = 1e-5
SLOPE = 0.01  # nn.LeakyReLU default


def _residual_block_kernel(Cp, KKCp, Kpad, Lpad, Lext, Wp, K, P, M0, n_valid,
                           precision,
                           x_ref, mask_ref,
                           w1_ref, b1_ref, g1_ref, bt1_ref,
                           w2_ref, b2_ref, g2_ref, bt2_ref,
                           out_ref, y_ref, stk_ref):
    """Fused residual block, single program, everything VMEM resident.

    x_ref   : (Cp, Lext) f32  halo-padded input; channels in sublanes, flat
                              padded spatial in lanes, M0-lane aligned margins.
    mask_ref: (1, Lpad)  f32  1.0 at real (unpadded) pixels, 0.0 elsewhere.
    w*_ref  : (Cp, Kpad)      lane-dense stacked conv weights (tap-major cols).
    b*/g*/bt*: (Cp, 1)        conv bias / BN gamma / BN beta.
    out_ref : (Cp, Lpad)      x + block(x) on the flat padded grid.
    y_ref   : (Cp, Lext)      scratch: halo-padded stage-1 activation.
    stk_ref : (Kpad, Lpad)    scratch: K*K shifted views stacked on sublanes.
    """
    mask = mask_ref[...]                       # (1, Lpad)
    inv_n = 1.0 / n_valid

    # Zero the unused contraction rows of the stacking slab once (scratch is
    # uninitialized; matching weight columns are zero but NaN*0 != 0).
    if Kpad > KKCp:
        stk_ref[KKCp:Kpad, :] = jnp.zeros((Kpad - KKCp, Lpad), jnp.float32)

    def conv_bn_lrelu(src_ref, w_ref, b_ref, g_ref, bt_ref):
        # ---- pack the K*K shifted tap views into the contraction dim ----
        for ki in range(K):
            for kj in range(K):
                t = ki * K + kj
                o = M0 + (ki - P) * Wp + (kj - P)      # static lane offset
                stk_ref[t * Cp:(t + 1) * Cp, :] = src_ref[:, o:o + Lpad]

        # ---- conv: one full-width MXU contraction (Cp,Kpad)@(Kpad,Lpad) ----
        acc = jnp.dot(w_ref[...], stk_ref[...],
                      preferred_element_type=jnp.float32, precision=precision)
        acc = acc + b_ref[...]                 # (Cp,1) broadcast over lanes

        # ---- BN (training mode): single-pass masked batch stats ----
        # (Optional per review: these two lane reductions could be offloaded to
        #  the MXU as [acc; acc*acc] @ mask^T; kept on XLU for exact-f32 stats
        #  and robust lowering at this size.)
        masked = acc * mask
        s1 = jnp.sum(masked, axis=1, keepdims=True)        # (Cp, 1)
        s2 = jnp.sum(masked * acc, axis=1, keepdims=True)  # (Cp, 1)
        mean = s1 * inv_n
        var = jnp.maximum(s2 * inv_n - mean * mean, 0.0)   # biased, clamped
        scale = g_ref[...] * jax.lax.rsqrt(var + EPS)      # EUP rsqrt
        shift = bt_ref[...] - mean * scale
        y = acc * scale + shift                            # fused BN affine
        return jnp.where(y > 0, y, SLOPE * y)              # LeakyReLU(0.01)

    # ---- stage 1: conv1 -> bn1 -> lrelu, stored halo-padded into scratch ----
    y1 = conv_bn_lrelu(x_ref, w1_ref, b1_ref, g1_ref, bt1_ref)
    # All three stores are lane-aligned (M0, Lpad multiples of 128); the mask
    # multiply re-zeroes each image's halo (stage-2 'same' padding) and the
    # L..Lpad tail.
    y_ref[:, 0:M0] = jnp.zeros((Cp, M0), jnp.float32)
    y_ref[:, M0 + Lpad:Lext] = jnp.zeros((Cp, Lext - M0 - Lpad), jnp.float32)
    y_ref[:, M0:M0 + Lpad] = y1 * mask

    # ---- stage 2: conv2 -> bn2 -> lrelu -> + residual ----
    y2 = conv_bn_lrelu(y_ref, w2_ref, b2_ref, g2_ref, bt2_ref)
    out_ref[...] = x_ref[:, M0:M0 + Lpad] + y2


def residual_block(x, params, kernel_size,
                   precision=jax.lax.Precision.DEFAULT):
    """x: (N, C, H, W) f32.  params: (w1, b1, g1, bt1, w2, b2, g2, bt2)."""
    N, C, H, W = x.shape
    K = kernel_size
    P = K // 2
    Hp, Wp = H + 2 * P, W + 2 * P
    L = N * Hp * Wp                          # flat padded spatial (lane axis)
    Lpad = ((L + 127) // 128) * 128          # lane-aligned flat length
    M = P * Wp + P                           # max |flat shift| of a conv tap
    M0 = ((M + 127) // 128) * 128            # lane-aligned margin
    Lext = M0 + Lpad + M0
    Cp = ((C + 7) // 8) * 8                  # channels -> full sublane group
    KKCp = K * K * Cp
    Kpad = ((KKCp + 127) // 128) * 128       # packed contraction dim
    n_valid = float(N * H * W)
    f32 = jnp.float32

    w1, b1, g1, bt1, w2, b2, g2, bt2 = params

    # ---- layout plumbing (glue only; all math happens in the kernel) ----
    # TODO(synk): at production sizes fold the NCHW->CNHW transpose into the
    # producer layout or pass x via memory_space=pl.ANY and build the halo
    # in-kernel, to avoid these extra HBM passes.
    def prep_x(t):                           # (N,C,H,W) -> (Cp, Lext)
        tc = jnp.transpose(t.astype(f32), (1, 0, 2, 3))              # C,N,H,W
        tc = jnp.pad(tc, ((0, Cp - C), (0, 0), (P, P), (P, P)))      # one pad
        tf = tc.reshape(Cp, L)                                       # bitcast
        return jnp.pad(tf, ((0, 0), (M0, M0 + Lpad - L)))

    def prep_w(w):                           # OIHW -> (Cp, Kpad) lane-dense
        wt = jnp.transpose(w.astype(f32), (0, 2, 3, 1))              # O,kh,kw,I
        wt = wt.reshape(C, K * K, C)
        wt = jnp.pad(wt, ((0, Cp - C), (0, 0), (0, Cp - C)))
        wt = wt.reshape(Cp, KKCp)
        return jnp.pad(wt, ((0, 0), (0, Kpad - KKCp)))

    def prep_c(v):                           # (C,) -> (Cp, 1)
        return jnp.pad(v.astype(f32), (0, Cp - C)).reshape(Cp, 1)

    mask2d = jnp.zeros((Hp, Wp), f32).at[P:P + H, P:P + W].set(1.0)
    mask = jnp.tile(mask2d.reshape(-1), (N,))
    mask = jnp.pad(mask, (0, Lpad - L)).reshape(1, Lpad)

    kern = functools.partial(_residual_block_kernel,
                             Cp, KKCp, Kpad, Lpad, Lext, Wp, K, P, M0, n_valid,
                             precision)
    vmem = pl.BlockSpec(memory_space=pltpu.MemorySpace.VMEM)

    # TODO(synk): at production sizes, add a grid over the lane axis (two-pass
    # BN: accumulate s1/s2 per tile, then normalize), mark independent axes
    # "parallel" for v7x's 2 TensorCores, size the tile against 64 MiB VMEM on
    # v7x (128 MiB on v5e/v6e) with an explicit
    # pltpu.CompilerParams(vmem_limit_bytes=...), and consider a bf16 y scratch.
    # At this toy size one VMEM-resident program (~0.5 MiB) is the right regime.
    out_flat = pl.pallas_call(
        kern,
        out_shape=jax.ShapeDtypeStruct((Cp, Lpad), f32),
        in_specs=[vmem] * 10,
        out_specs=vmem,
        scratch_shapes=[pltpu.VMEM((Cp, Lext), f32),
                        pltpu.VMEM((Kpad, Lpad), f32)],
    )(prep_x(x), mask,
      prep_w(w1), prep_c(b1), prep_c(g1), prep_c(bt1),
      prep_w(w2), prep_c(b2), prep_c(g2), prep_c(bt2))

    # Undo layout: drop channel/lane padding, un-flatten, crop the halo.
    out = out_flat[:C, :L].reshape(C, N, Hp, Wp)[:, :, P:P + H, P:P + W]
    return jnp.transpose(out, (1, 0, 2, 3)).astype(x.dtype)


# ------------------------------ pure-JAX reference ------------------------------
def residual_block_ref(x, params, kernel_size):
    w1, b1, g1, bt1, w2, b2, g2, bt2 = params

    def conv(y, w, b):
        out = jax.lax.conv_general_dilated(
            y, w, window_strides=(1, 1), padding='SAME',
            dimension_numbers=('NCHW', 'OIHW', 'NCHW'),
            precision=jax.lax.Precision.HIGHEST)
        return out + b[None, :, None, None]

    def bn(y, g, bt):
        m = jnp.mean(y, axis=(0, 2, 3), keepdims=True)
        v = jnp.mean((y - m) ** 2, axis=(0, 2, 3), keepdims=True)
        return (y - m) / jnp.sqrt(v + EPS) * g[None, :, None, None] \
            + bt[None, :, None, None]

    def lrelu(y):
        return jnp.where(y > 0, y, SLOPE * y)

    y = lrelu(bn(conv(x, w1, b1), g1, bt1))
    y = lrelu(bn(conv(y, w2, b2), g2, bt2))
    return x + y


if __name__ == "__main__":
    N, C, H, W, K = 2, 4, 16, 16, 3

    key = jax.random.PRNGKey(0)
    ks = jax.random.split(key, 9)
    x = jax.random.normal(ks[0], (N, C, H, W), jnp.float32)

    # Deterministic parameter init (shapes follow nn.Conv2d / nn.BatchNorm2d).
    w1 = 0.1 * jax.random.normal(ks[1], (C, C, K, K), jnp.float32)   # OIHW
    b1 = 0.1 * jax.random.normal(ks[2], (C,), jnp.float32)
    g1 = 1.0 + 0.1 * jax.random.normal(ks[3], (C,), jnp.float32)     # bn1 weight
    bt1 = 0.1 * jax.random.normal(ks[4], (C,), jnp.float32)          # bn1 bias
    w2 = 0.1 * jax.random.normal(ks[5], (C, C, K, K), jnp.float32)
    b2 = 0.1 * jax.random.normal(ks[6], (C,), jnp.float32)
    g2 = 1.0 + 0.1 * jax.random.normal(ks[7], (C,), jnp.float32)
    bt2 = 0.1 * jax.random.normal(ks[8], (C,), jnp.float32)
    params = (w1, b1, g1, bt1, w2, b2, g2, bt2)

    try:
        # Parity path: fp32-accurate MXU contraction, tight tolerance.
        out = jax.block_until_ready(
            residual_block(x, params, K, precision=jax.lax.Precision.HIGHEST))
        atol = rtol = 1e-4
    except Exception:
        # Fast path / fallback: single-pass bf16 MXU contraction (the review's
        # recommended production setting); BN stats & affine remain f32.
        out = jax.block_until_ready(residual_block(x, params, K))
        atol = rtol = 3e-2

    ref = jax.block_until_ready(residual_block_ref(x, params, K))
    np.testing.assert_allclose(np.asarray(out), np.asarray(ref),
                               atol=atol, rtol=rtol)
    print("KERNEL_OK")
</pallas_src>

<mosaic_0001>
module attributes {stable_mosaic.version = 11 : i64} {
  func.func @_residual_block_kernel(%arg0: memref<8x1024xf32, #tpu.memory_space<vmem>>, %arg1: memref<1x768xf32, #tpu.memory_space<vmem>>, %arg2: memref<8x128xf32, #tpu.memory_space<vmem>>, %arg3: memref<8x1xf32, #tpu.memory_space<vmem>>, %arg4: memref<8x1xf32, #tpu.memory_space<vmem>>, %arg5: memref<8x1xf32, #tpu.memory_space<vmem>>, %arg6: memref<8x128xf32, #tpu.memory_space<vmem>>, %arg7: memref<8x1xf32, #tpu.memory_space<vmem>>, %arg8: memref<8x1xf32, #tpu.memory_space<vmem>>, %arg9: memref<8x1xf32, #tpu.memory_space<vmem>>, %arg10: memref<8x768xf32, #tpu.memory_space<vmem>>, %arg11: memref<8x1024xf32, #tpu.memory_space<vmem>>, %arg12: memref<128x768xf32, #tpu.memory_space<vmem>>) attributes {dimension_semantics = [], scalar_prefetch = 0 : i64, scratch_operands = 2 : i64, tpu.core_type = #tpu.core_type<tc>} {
    %c0 = arith.constant 0 : index
    %c0_0 = arith.constant 0 : index
    %0 = vector.load %arg1[%c0, %c0_0] : memref<1x768xf32, #tpu.memory_space<vmem>>, vector<1x768xf32>
    %cst = arith.constant 0.000000e+00 : f32
    %1 = vector.broadcast %cst : f32 to vector<56x768xf32>
    %c72 = arith.constant 72 : index
    %c0_1 = arith.constant 0 : index
    %2 = vector.load %arg12[%c72, %c0_1] : memref<128x768xf32, #tpu.memory_space<vmem>>, vector<56x768xf32>
    tpu.vector_store %arg12[%c72, %c0_1], %1 {strides = array<i32>} : memref<128x768xf32, #tpu.memory_space<vmem>>, vector<56x768xf32>,
    %c0_2 = arith.constant 0 : index
    %c109 = arith.constant 109 : index
    %3 = vector.load %arg0[%c0_2, %c109] : memref<8x1024xf32, #tpu.memory_space<vmem>>, vector<8x768xf32>
    %c0_3 = arith.constant 0 : index
    %c0_4 = arith.constant 0 : index
    %4 = vector.load %arg12[%c0_3, %c0_4] : memref<128x768xf32, #tpu.memory_space<vmem>>, vector<8x768xf32>
    tpu.vector_store %arg12[%c0_3, %c0_4], %3 {strides = array<i32>} : memref<128x768xf32, #tpu.memory_space<vmem>>, vector<8x768xf32>,
    %c0_5 = arith.constant 0 : index
    %c110 = arith.constant 110 : index
    %5 = vector.load %arg0[%c0_5, %c110] : memref<8x1024xf32, #tpu.memory_space<vmem>>, vector<8x768xf32>
    %c8 = arith.constant 8 : index
    %c0_6 = arith.constant 0 : index
    %6 = vector.load %arg12[%c8, %c0_6] : memref<128x768xf32, #tpu.memory_space<vmem>>, vector<8x768xf32>
    tpu.vector_store %arg12[%c8, %c0_6], %5 {strides = array<i32>} : memref<128x768xf32, #tpu.memory_space<vmem>>, vector<8x768xf32>,
    %c0_7 = arith.constant 0 : index
    %c111 = arith.constant 111 : index
    %7 = vector.load %arg0[%c0_7, %c111] : memref<8x1024xf32, #tpu.memory_space<vmem>>, vector<8x768xf32>
    %c16 = arith.constant 16 : index
    %c0_8 = arith.constant 0 : index
    %8 = vector.load %arg12[%c16, %c0_8] : memref<128x768xf32, #tpu.memory_space<vmem>>, vector<8x768xf32>
    tpu.vector_store %arg12[%c16, %c0_8], %7 {strides = array<i32>} : memref<128x768xf32, #tpu.memory_space<vmem>>, vector<8x768xf32>,
    %c0_9 = arith.constant 0 : index
    %c127 = arith.constant 127 : index
    %9 = vector.load %arg0[%c0_9, %c127] : memref<8x1024xf32, #tpu.memory_space<vmem>>, vector<8x768xf32>
    %c24 = arith.constant 24 : index
    %c0_10 = arith.constant 0 : index
    %10 = vector.load %arg12[%c24, %c0_10] : memref<128x768xf32, #tpu.memory_space<vmem>>, vector<8x768xf32>
    tpu.vector_store %arg12[%c24, %c0_10], %9 {strides = array<i32>} : memref<128x768xf32, #tpu.memory_space<vmem>>, vector<8x768xf32>,
    %c0_11 = arith.constant 0 : index
    %c128 = arith.constant 128 : index
    %11 = vector.load %arg0[%c0_11, %c128] : memref<8x1024xf32, #tpu.memory_space<vmem>>, vector<8x768xf32>
    %c32 = arith.constant 32 : index
    %c0_12 = arith.constant 0 : index
    %12 = vector.load %arg12[%c32, %c0_12] : memref<128x768xf32, #tpu.memory_space<vmem>>, vector<8x768xf32>
    tpu.vector_store %arg12[%c32, %c0_12], %11 {strides = array<i32>} : memref<128x768xf32, #tpu.memory_space<vmem>>, vector<8x768xf32>,
    %c0_13 = arith.constant 0 : index
    %c129 = arith.constant 129 : index
    %13 = vector.load %arg0[%c0_13, %c129] : memref<8x1024xf32, #tpu.memory_space<vmem>>, vector<8x768xf32>
    %c40 = arith.constant 40 : index
    %c0_14 = arith.constant 0 : index
    %14 = vector.load %arg12[%c40, %c0_14] : memref<128x768xf32, #tpu.memory_space<vmem>>, vector<8x768xf32>
    tpu.vector_store %arg12[%c40, %c0_14], %13 {strides = array<i32>} : memref<128x768xf32, #tpu.memory_space<vmem>>, vector<8x768xf32>,
    %c0_15 = arith.constant 0 : index
    %c145 = arith.constant 145 : index
    %15 = vector.load %arg0[%c0_15, %c145] : memref<8x1024xf32, #tpu.memory_space<vmem>>, vector<8x768xf32>
    %c48 = arith.constant 48 : index
    %c0_16 = arith.constant 0 : index
    %16 = vector.load %arg12[%c48, %c0_16] : memref<128x768xf32, #tpu.memory_space<vmem>>, vector<8x768xf32>
    tpu.vector_store %arg12[%c48, %c0_16], %15 {strides = array<i32>} : memref<128x768xf32, #tpu.memory_space<vmem>>, vector<8x768xf32>,
    %c0_17 = arith.constant 0 : index
    %c146 = arith.constant 146 : index
    %17 = vector.load %arg0[%c0_17, %c146] : memref<8x1024xf32, #tpu.memory_space<vmem>>, vector<8x768xf32>
    %c56 = arith.constant 56 : index
    %c0_18 = arith.constant 0 : index
    %18 = vector.load %arg12[%c56, %c0_18] : memref<128x768xf32, #tpu.memory_space<vmem>>, vector<8x768xf32>
    tpu.vector_store %arg12[%c56, %c0_18], %17 {strides = array<i32>} : memref<128x768xf32, #tpu.memory_space<vmem>>, vector<8x768xf32>,
    %c0_19 = arith.constant 0 : index
    %c147 = arith.constant 147 : index
    %19 = vector.load %arg0[%c0_19, %c147] : memref<8x1024xf32, #tpu.memory_space<vmem>>, vector<8x768xf32>
    %c64 = arith.constant 64 : index
    %c0_20 = arith.constant 0 : index
    %20 = vector.load %arg12[%c64, %c0_20] : memref<128x768xf32, #tpu.memory_space<vmem>>, vector<8x768xf32>
    tpu.vector_store %arg12[%c64, %c0_20], %19 {strides = array<i32>} : memref<128x768xf32, #tpu.memory_space<vmem>>, vector<8x768xf32>,
    %c0_21 = arith.constant 0 : index
    %c0_22 = arith.constant 0 : index
    %21 = vector.load %arg2[%c0_21, %c0_22] : memref<8x128xf32, #tpu.memory_space<vmem>>, vector<8x128xf32>
    %c0_23 = arith.constant 0 : index
    %c0_24 = arith.constant 0 : index
    %22 = vector.load %arg12[%c0_23, %c0_24] : memref<128x768xf32, #tpu.memory_space<vmem>>, vector<128x768xf32>
    %cst_25 = arith.constant dense<0.000000e+00> : vector<8x768xf32>
    %23 = tpu.matmul %21, %22, %cst_25 {dimension_numbers = #tpu.dot_dimension_numbers<[1], [0], [0], [1], [0, 0, 1, 1], [], []>, precision = #tpu.contract_precision<fp32>} : vector<8x128xf32>, vector<128x768xf32>, vector<8x768xf32> -> vector<8x768xf32>
    %c0_26 = arith.constant 0 : index
    %c0_27 = arith.constant 0 : index
    %24 = vector.load %arg3[%c0_26, %c0_27] : memref<8x1xf32, #tpu.memory_space<vmem>>, vector<8x1xf32>
    %25 = vector.broadcast %24 : vector<8x1xf32> to vector<8x768xf32>
    %26 = arith.addf %23, %25 : vector<8x768xf32>
    %27 = vector.broadcast %0 : vector<1x768xf32> to vector<8x768xf32>
    %28 = arith.mulf %26, %27 : vector<8x768xf32>
    %cst_28 = arith.constant dense<0.000000e+00> : vector<8xf32>
    %29 = vector.multi_reduction <add>, %28, %cst_28 [1] : vector<8x768xf32> to vector<8xf32>
    %30 = vector.shape_cast %29 : vector<8xf32> to vector<8x1xf32>
    %31 = arith.mulf %28, %26 : vector<8x768xf32>
    %cst_29 = arith.constant dense<0.000000e+00> : vector<8xf32>
    %32 = vector.multi_reduction <add>, %31, %cst_29 [1] : vector<8x768xf32> to vector<8xf32>
    %33 = vector.shape_cast %32 : vector<8xf32> to vector<8x1xf32>
    %cst_30 = arith.constant 0.001953125 : f32
    %34 = vector.broadcast %cst_30 : f32 to vector<8x1xf32>
    %35 = arith.mulf %30, %34 : vector<8x1xf32>
    %cst_31 = arith.constant 0.001953125 : f32
    %36 = vector.broadcast %cst_31 : f32 to vector<8x1xf32>
    %37 = arith.mulf %33, %36 : vector<8x1xf32>
    %38 = arith.mulf %35, %35 : vector<8x1xf32>
    %39 = arith.subf %37, %38 : vector<8x1xf32>
    %cst_32 = arith.constant 0.000000e+00 : f32
    %40 = vector.broadcast %cst_32 : f32 to vector<8x1xf32>
    %41 = arith.maximumf %39, %40 : vector<8x1xf32>
    %c0_33 = arith.constant 0 : index
    %c0_34 = arith.constant 0 : index
    %42 = vector.load %arg4[%c0_33, %c0_34] : memref<8x1xf32, #tpu.memory_space<vmem>>, vector<8x1xf32>
    %cst_35 = arith.constant 9.99999974E-6 : f32
    %43 = vector.broadcast %cst_35 : f32 to vector<8x1xf32>
    %44 = arith.addf %41, %43 : vector<8x1xf32>
    %45 = math.rsqrt %44 : vector<8x1xf32>
    %46 = arith.mulf %42, %45 : vector<8x1xf32>
    %c0_36 = arith.constant 0 : index
    %c0_37 = arith.constant 0 : index
    %47 = vector.load %arg5[%c0_36, %c0_37] : memref<8x1xf32, #tpu.memory_space<vmem>>, vector<8x1xf32>
    %48 = arith.mulf %35, %46 : vector<8x1xf32>
    %49 = arith.subf %47, %48 : vector<8x1xf32>
    %50 = vector.broadcast %46 : vector<8x1xf32> to vector<8x768xf32>
    %51 = arith.mulf %26, %50 : vector<8x768xf32>
    %52 = vector.broadcast %49 : vector<8x1xf32> to vector<8x768xf32>
    %53 = arith.addf %51, %52 : vector<8x768xf32>
    %cst_38 = arith.constant 0.000000e+00 : f32
    %54 = vector.broadcast %cst_38 : f32 to vector<8x768xf32>
    %55 = arith.cmpf ogt, %53, %54 : vector<8x768xf32>
    %cst_39 = arith.constant 0.00999999977 : f32
    %56 = vector.broadcast %cst_39 : f32 to vector<8x768xf32>
    %57 = arith.mulf %56, %53 : vector<8x768xf32>
    %58 = arith.select %55, %53, %57 : vector<8x768xi1>, vector<8x768xf32>
    %cst_40 = arith.constant 0.000000e+00 : f32
    %59 = vector.broadcast %cst_40 : f32 to vector<8x128xf32>
    %c0_41 = arith.constant 0 : index
    %c0_42 = arith.constant 0 : index
    %60 = vector.load %arg11[%c0_41, %c0_42] : memref<8x1024xf32, #tpu.memory_space<vmem>>, vector<8x128xf32>
    tpu.vector_store %arg11[%c0_41, %c0_42], %59 {strides = array<i32>} : memref<8x1024xf32, #tpu.memory_space<vmem>>, vector<8x128xf32>,
    %cst_43 = arith.constant 0.000000e+00 : f32
    %61 = vector.broadcast %cst_43 : f32 to vector<8x128xf32>
    %c0_44 = arith.constant 0 : index
    %c896 = arith.constant 896 : index
    %62 = vector.load %arg11[%c0_44, %c896] : memref<8x1024xf32, #tpu.memory_space<vmem>>, vector<8x128xf32>
    tpu.vector_store %arg11[%c0_44, %c896], %61 {strides = array<i32>} : memref<8x1024xf32, #tpu.memory_space<vmem>>, vector<8x128xf32>,
    %63 = vector.broadcast %0 : vector<1x768xf32> to vector<8x768xf32>
    %64 = arith.mulf %58, %63 : vector<8x768xf32>
    %c0_45 = arith.constant 0 : index
    %c128_46 = arith.constant 128 : index
    %65 = vector.load %arg11[%c0_45, %c128_46] : memref<8x1024xf32, #tpu.memory_space<vmem>>, vector<8x768xf32>
    tpu.vector_store %arg11[%c0_45, %c128_46], %64 {strides = array<i32>} : memref<8x1024xf32, #tpu.memory_space<vmem>>, vector<8x768xf32>,
    %c0_47 = arith.constant 0 : index
    %c109_48 = arith.constant 109 : index
    %66 = vector.load %arg11[%c0_47, %c109_48] : memref<8x1024xf32, #tpu.memory_space<vmem>>, vector<8x768xf32>
    %c0_49 = arith.constant 0 : index
    %c0_50 = arith.constant 0 : index
    %67 = vector.load %arg12[%c0_49, %c0_50] : memref<128x768xf32, #tpu.memory_space<vmem>>, vector<8x768xf32>
    tpu.vector_store %arg12[%c0_49, %c0_50], %66 {strides = array<i32>} : memref<128x768xf32, #tpu.memory_space<vmem>>, vector<8x768xf32>,
    %c0_51 = arith.constant 0 : index
    %c110_52 = arith.constant 110 : index
    %68 = vector.load %arg11[%c0_51, %c110_52] : memref<8x1024xf32, #tpu.memory_space<vmem>>, vector<8x768xf32>
    %c8_53 = arith.constant 8 : index
    %c0_54 = arith.constant 0 : index
    %69 = vector.load %arg12[%c8_53, %c0_54] : memref<128x768xf32, #tpu.memory_space<vmem>>, vector<8x768xf32>
    tpu.vector_store %arg12[%c8_53, %c0_54], %68 {strides = array<i32>} : memref<128x768xf32, #tpu.memory_space<vmem>>, vector<8x768xf32>,
    %c0_55 = arith.constant 0 : index
    %c111_56 = arith.constant 111 : index
    %70 = vector.load %arg11[%c0_55, %c111_56] : memref<8x1024xf32, #tpu.memory_space<vmem>>, vector<8x768xf32>
    %c16_57 = arith.constant 16 : index
    %c0_58 = arith.constant 0 : index
    %71 = vector.load %arg12[%c16_57, %c0_58] : memref<128x768xf32, #tpu.memory_space<vmem>>, vector<8x768xf32>
    tpu.vector_store %arg12[%c16_57, %c0_58], %70 {strides = array<i32>} : memref<128x768xf32, #tpu.memory_space<vmem>>, vector<8x768xf32>,
    %c0_59 = arith.constant 0 : index
    %c127_60 = arith.constant 127 : index
    %72 = vector.load %arg11[%c0_59, %c127_60] : memref<8x1024xf32, #tpu.memory_space<vmem>>, vector<8x768xf32>
    %c24_61 = arith.constant 24 : index
    %c0_62 = arith.constant 0 : index
    %73 = vector.load %arg12[%c24_61, %c0_62] : memref<128x768xf32, #tpu.memory_space<vmem>>, vector<8x768xf32>
    tpu.vector_store %arg12[%c24_61, %c0_62], %72 {strides = array<i32>} : memref<128x768xf32, #tpu.memory_space<vmem>>, vector<8x768xf32>,
    %c0_63 = arith.constant 0 : index
    %c128_64 = arith.constant 128 : index
    %74 = vector.load %arg11[%c0_63, %c128_64] : memref<8x1024xf32, #tpu.memory_space<vmem>>, vector<8x768xf32>
    %c32_65 = arith.constant 32 : index
    %c0_66 = arith.constant 0 : index
    %75 = vector.load %arg12[%c32_65, %c0_66] : memref<128x768xf32, #tpu.memory_space<vmem>>, vector<8x768xf32>
    tpu.vector_store %arg12[%c32_65, %c0_66], %74 {strides = array<i32>} : memref<128x768xf32, #tpu.memory_space<vmem>>, vector<8x768xf32>,
    %c0_67 = arith.constant 0 : index
    %c129_68 = arith.constant 129 : index
    %76 = vector.load %arg11[%c0_67, %c129_68] : memref<8x1024xf32, #tpu.memory_space<vmem>>, vector<8x768xf32>
    %c40_69 = arith.constant 40 : index
    %c0_70 = arith.constant 0 : index
    %77 = vector.load %arg12[%c40_69, %c0_70] : memref<128x768xf32, #tpu.memory_space<vmem>>, vector<8x768xf32>
    tpu.vector_store %arg12[%c40_69, %c0_70], %76 {strides = array<i32>} : memref<128x768xf32, #tpu.memory_space<vmem>>, vector<8x768xf32>,
    %c0_71 = arith.constant 0 : index
    %c145_72 = arith.constant 145 : index
    %78 = vector.load %arg11[%c0_71, %c145_72] : memref<8x1024xf32, #tpu.memory_space<vmem>>, vector<8x768xf32>
    %c48_73 = arith.constant 48 : index
    %c0_74 = arith.constant 0 : index
    %79 = vector.load %arg12[%c48_73, %c0_74] : memref<128x768xf32, #tpu.memory_space<vmem>>, vector<8x768xf32>
    tpu.vector_store %arg12[%c48_73, %c0_74], %78 {strides = array<i32>} : memref<128x768xf32, #tpu.memory_space<vmem>>, vector<8x768xf32>,
    %c0_75 = arith.constant 0 : index
    %c146_76 = arith.constant 146 : index
    %80 = vector.load %arg11[%c0_75, %c146_76] : memref<8x1024xf32, #tpu.memory_space<vmem>>, vector<8x768xf32>
    %c56_77 = arith.constant 56 : index
    %c0_78 = arith.constant 0 : index
    %81 = vector.load %arg12[%c56_77, %c0_78] : memref<128x768xf32, #tpu.memory_space<vmem>>, vector<8x768xf32>
    tpu.vector_store %arg12[%c56_77, %c0_78], %80 {strides = array<i32>} : memref<128x768xf32, #tpu.memory_space<vmem>>, vector<8x768xf32>,
    %c0_79 = arith.constant 0 : index
    %c147_80 = arith.constant 147 : index
    %82 = vector.load %arg11[%c0_79, %c147_80] : memref<8x1024xf32, #tpu.memory_space<vmem>>, vector<8x768xf32>
    %c64_81 = arith.constant 64 : index
    %c0_82 = arith.constant 0 : index
    %83 = vector.load %arg12[%c64_81, %c0_82] : memref<128x768xf32, #tpu.memory_space<vmem>>, vector<8x768xf32>
    tpu.vector_store %arg12[%c64_81, %c0_82], %82 {strides = array<i32>} : memref<128x768xf32, #tpu.memory_space<vmem>>, vector<8x768xf32>,
    %c0_83 = arith.constant 0 : index
    %c0_84 = arith.constant 0 : index
    %84 = vector.load %arg6[%c0_83, %c0_84] : memref<8x128xf32, #tpu.memory_space<vmem>>, vector<8x128xf32>
    %c0_85 = arith.constant 0 : index
    %c0_86 = arith.constant 0 : index
    %85 = vector.load %arg12[%c0_85, %c0_86] : memref<128x768xf32, #tpu.memory_space<vmem>>, vector<128x768xf32>
    %cst_87 = arith.constant dense<0.000000e+00> : vector<8x768xf32>
    %86 = tpu.matmul %84, %85, %cst_87 {dimension_numbers = #tpu.dot_dimension_numbers<[1], [0], [0], [1], [0, 0, 1, 1], [], []>, precision = #tpu.contract_precision<fp32>} : vector<8x128xf32>, vector<128x768xf32>, vector<8x768xf32> -> vector<8x768xf32>
    %c0_88 = arith.constant 0 : index
    %c0_89 = arith.constant 0 : index
    %87 = vector.load %arg7[%c0_88, %c0_89] : memref<8x1xf32, #tpu.memory_space<vmem>>, vector<8x1xf32>
    %88 = vector.broadcast %87 : vector<8x1xf32> to vector<8x768xf32>
    %89 = arith.addf %86, %88 : vector<8x768xf32>
    %90 = vector.broadcast %0 : vector<1x768xf32> to vector<8x768xf32>
    %91 = arith.mulf %89, %90 : vector<8x768xf32>
    %cst_90 = arith.constant dense<0.000000e+00> : vector<8xf32>
    %92 = vector.multi_reduction <add>, %91, %cst_90 [1] : vector<8x768xf32> to vector<8xf32>
    %93 = vector.shape_cast %92 : vector<8xf32> to vector<8x1xf32>
    %94 = arith.mulf %91, %89 : vector<8x768xf32>
    %cst_91 = arith.constant dense<0.000000e+00> : vector<8xf32>
    %95 = vector.multi_reduction <add>, %94, %cst_91 [1] : vector<8x768xf32> to vector<8xf32>
    %96 = vector.shape_cast %95 : vector<8xf32> to vector<8x1xf32>
    %cst_92 = arith.constant 0.001953125 : f32
    %97 = vector.broadcast %cst_92 : f32 to vector<8x1xf32>
    %98 = arith.mulf %93, %97 : vector<8x1xf32>
    %cst_93 = arith.constant 0.001953125 : f32
    %99 = vector.broadcast %cst_93 : f32 to vector<8x1xf32>
    %100 = arith.mulf %96, %99 : vector<8x1xf32>
    %101 = arith.mulf %98, %98 : vector<8x1xf32>
    %102 = arith.subf %100, %101 : vector<8x1xf32>
    %cst_94 = arith.constant 0.000000e+00 : f32
    %103 = vector.broadcast %cst_94 : f32 to vector<8x1xf32>
    %104 = arith.maximumf %102, %103 : vector<8x1xf32>
    %c0_95 = arith.constant 0 : index
    %c0_96 = arith.constant 0 : index
    %105 = vector.load %arg8[%c0_95, %c0_96] : memref<8x1xf32, #tpu.memory_space<vmem>>, vector<8x1xf32>
    %cst_97 = arith.constant 9.99999974E-6 : f32
    %106 = vector.broadcast %cst_97 : f32 to vector<8x1xf32>
    %107 = arith.addf %104, %106 : vector<8x1xf32>
    %108 = math.rsqrt %107 : vector<8x1xf32>
    %109 = arith.mulf %105, %108 : vector<8x1xf32>
    %c0_98 = arith.constant 0 : index
    %c0_99 = arith.constant 0 : index
    %110 = vector.load %arg9[%c0_98, %c0_99] : memref<8x1xf32, #tpu.memory_space<vmem>>, vector<8x1xf32>
    %111 = arith.mulf %98, %109 : vector<8x1xf32>
    %112 = arith.subf %110, %111 : vector<8x1xf32>
    %113 = vector.broadcast %109 : vector<8x1xf32> to vector<8x768xf32>
    %114 = arith.mulf %89, %113 : vector<8x768xf32>
    %115 = vector.broadcast %112 : vector<8x1xf32> to vector<8x768xf32>
    %116 = arith.addf %114, %115 : vector<8x768xf32>
    %cst_100 = arith.constant 0.000000e+00 : f32
    %117 = vector.broadcast %cst_100 : f32 to vector<8x768xf32>
    %118 = arith.cmpf ogt, %116, %117 : vector<8x768xf32>
    %cst_101 = arith.constant 0.00999999977 : f32
    %119 = vector.broadcast %cst_101 : f32 to vector<8x768xf32>
    %120 = arith.mulf %119, %116 : vector<8x768xf32>
    %121 = arith.select %118, %116, %120 : vector<8x768xi1>, vector<8x768xf32>
    %c0_102 = arith.constant 0 : index
    %c128_103 = arith.constant 128 : index
    %122 = vector.load %arg0[%c0_102, %c128_103] : memref<8x1024xf32, #tpu.memory_space<vmem>>, vector<8x768xf32>
    %123 = arith.addf %122, %121 : vector<8x768xf32>
    %c0_104 = arith.constant 0 : index
    %c0_105 = arith.constant 0 : index
    %124 = vector.load %arg10[%c0_104, %c0_105] : memref<8x768xf32, #tpu.memory_space<vmem>>, vector<8x768xf32>
    tpu.vector_store %arg10[%c0_104, %c0_105], %123 {strides = array<i32>} : memref<8x768xf32, #tpu.memory_space<vmem>>, vector<8x768xf32>,
    return
  }
}

module attributes {stable_mosaic.version = 11 : i64} {
  func.func @_residual_block_kernel(%arg0: memref<8x1024xf32, #tpu.memory_space<vmem>>, %arg1: memref<1x768xf32, #tpu.memory_space<vmem>>, %arg2: memref<8x128xf32, #tpu.memory_space<vmem>>, %arg3: memref<8x1xf32, #tpu.memory_space<vmem>>, %arg4: memref<8x1xf32, #tpu.memory_space<vmem>>, %arg5: memref<8x1xf32, #tpu.memory_space<vmem>>, %arg6: memref<8x128xf32, #tpu.memory_space<vmem>>, %arg7: memref<8x1xf32, #tpu.memory_space<vmem>>, %arg8: memref<8x1xf32, #tpu.memory_space<vmem>>, %arg9: memref<8x1xf32, #tpu.memory_space<vmem>>, %arg10: memref<8x768xf32, #tpu.memory_space<vmem>>, %arg11: memref<8x1024xf32, #tpu.memory_space<vmem>>, %arg12: memref<128x768xf32, #tpu.memory_space<vmem>>) attributes {dimension_semantics = [], scalar_prefetch = 0 : i64, scratch_operands = 2 : i64, tpu.core_type = #tpu.core_type<tc>} {
    %c0 = arith.constant 0 : index
    %c0_0 = arith.constant 0 : index
    %0 = vector.load %arg1[%c0, %c0_0] : memref<1x768xf32, #tpu.memory_space<vmem>>, vector<1x768xf32>
    %cst = arith.constant 0.000000e+00 : f32
    %1 = vector.broadcast %cst : f32 to vector<56x768xf32>
    %c72 = arith.constant 72 : index
    %c0_1 = arith.constant 0 : index
    %2 = vector.load %arg12[%c72, %c0_1] : memref<128x768xf32, #tpu.memory_space<vmem>>, vector<56x768xf32>
    tpu.vector_store %arg12[%c72, %c0_1], %1 {strides = array<i32>} : memref<128x768xf32, #tpu.memory_space<vmem>>, vector<56x768xf32>,
    %c0_2 = arith.constant 0 : index
    %c109 = arith.constant 109 : index
    %3 = vector.load %arg0[%c0_2, %c109] : memref<8x1024xf32, #tpu.memory_space<vmem>>, vector<8x768xf32>
    %c0_3 = arith.constant 0 : index
    %c0_4 = arith.constant 0 : index
    %4 = vector.load %arg12[%c0_3, %c0_4] : memref<128x768xf32, #tpu.memory_space<vmem>>, vector<8x768xf32>
    tpu.vector_store %arg12[%c0_3, %c0_4], %3 {strides = array<i32>} : memref<128x768xf32, #tpu.memory_space<vmem>>, vector<8x768xf32>,
    %c0_5 = arith.constant 0 : index
    %c110 = arith.constant 110 : index
    %5 = vector.load %arg0[%c0_5, %c110] : memref<8x1024xf32, #tpu.memory_space<vmem>>, vector<8x768xf32>
    %c8 = arith.constant 8 : index
    %c0_6 = arith.constant 0 : index
    %6 = vector.load %arg12[%c8, %c0_6] : memref<128x768xf32, #tpu.memory_space<vmem>>, vector<8x768xf32>
    tpu.vector_store %arg12[%c8, %c0_6], %5 {strides = array<i32>} : memref<128x768xf32, #tpu.memory_space<vmem>>, vector<8x768xf32>,
    %c0_7 = arith.constant 0 : index
    %c111 = arith.constant 111 : index
    %7 = vector.load %arg0[%c0_7, %c111] : memref<8x1024xf32, #tpu.memory_space<vmem>>, vector<8x768xf32>
    %c16 = arith.constant 16 : index
    %c0_8 = arith.constant 0 : index
    %8 = vector.load %arg12[%c16, %c0_8] : memref<128x768xf32, #tpu.memory_space<vmem>>, vector<8x768xf32>
    tpu.vector_store %arg12[%c16, %c0_8], %7 {strides = array<i32>} : memref<128x768xf32, #tpu.memory_space<vmem>>, vector<8x768xf32>,
    %c0_9 = arith.constant 0 : index
    %c127 = arith.constant 127 : index
    %9 = vector.load %arg0[%c0_9, %c127] : memref<8x1024xf32, #tpu.memory_space<vmem>>, vector<8x768xf32>
    %c24 = arith.constant 24 : index
    %c0_10 = arith.constant 0 : index
    %10 = vector.load %arg12[%c24, %c0_10] : memref<128x768xf32, #tpu.memory_space<vmem>>, vector<8x768xf32>
    tpu.vector_store %arg12[%c24, %c0_10], %9 {strides = array<i32>} : memref<128x768xf32, #tpu.memory_space<vmem>>, vector<8x768xf32>,
    %c0_11 = arith.constant 0 : index
    %c128 = arith.constant 128 : index
    %11 = vector.load %arg0[%c0_11, %c128] : memref<8x1024xf32, #tpu.memory_space<vmem>>, vector<8x768xf32>
    %c32 = arith.constant 32 : index
    %c0_12 = arith.constant 0 : index
    %12 = vector.load %arg12[%c32, %c0_12] : memref<128x768xf32, #tpu.memory_space<vmem>>, vector<8x768xf32>
    tpu.vector_store %arg12[%c32, %c0_12], %11 {strides = array<i32>} : memref<128x768xf32, #tpu.memory_space<vmem>>, vector<8x768xf32>,
    %c0_13 = arith.constant 0 : index
    %c129 = arith.constant 129 : index
    %13 = vector.load %arg0[%c0_13, %c129] : memref<8x1024xf32, #tpu.memory_space<vmem>>, vector<8x768xf32>
    %c40 = arith.constant 40 : index
    %c0_14 = arith.constant 0 : index
    %14 = vector.load %arg12[%c40, %c0_14] : memref<128x768xf32, #tpu.memory_space<vmem>>, vector<8x768xf32>
    tpu.vector_store %arg12[%c40, %c0_14], %13 {strides = array<i32>} : memref<128x768xf32, #tpu.memory_space<vmem>>, vector<8x768xf32>,
    %c0_15 = arith.constant 0 : index
    %c145 = arith.constant 145 : index
    %15 = vector.load %arg0[%c0_15, %c145] : memref<8x1024xf32, #tpu.memory_space<vmem>>, vector<8x768xf32>
    %c48 = arith.constant 48 : index
    %c0_16 = arith.constant 0 : index
    %16 = vector.load %arg12[%c48, %c0_16] : memref<128x768xf32, #tpu.memory_space<vmem>>, vector<8x768xf32>
    tpu.vector_store %arg12[%c48, %c0_16], %15 {strides = array<i32>} : memref<128x768xf32, #tpu.memory_space<vmem>>, vector<8x768xf32>,
    %c0_17 = arith.constant 0 : index
    %c146 = arith.constant 146 : index
    %17 = vector.load %arg0[%c0_17, %c146] : memref<8x1024xf32, #tpu.memory_space<vmem>>, vector<8x768xf32>
    %c56 = arith.constant 56 : index
    %c0_18 = arith.constant 0 : index
    %18 = vector.load %arg12[%c56, %c0_18] : memref<128x768xf32, #tpu.memory_space<vmem>>, vector<8x768xf32>
    tpu.vector_store %arg12[%c56, %c0_18], %17 {strides = array<i32>} : memref<128x768xf32, #tpu.memory_space<vmem>>, vector<8x768xf32>,
    %c0_19 = arith.constant 0 : index
    %c147 = arith.constant 147 : index
    %19 = vector.load %arg0[%c0_19, %c147] : memref<8x1024xf32, #tpu.memory_space<vmem>>, vector<8x768xf32>
    %c64 = arith.constant 64 : index
    %c0_20 = arith.constant 0 : index
    %20 = vector.load %arg12[%c64, %c0_20] : memref<128x768xf32, #tpu.memory_space<vmem>>, vector<8x768xf32>
    tpu.vector_store %arg12[%c64, %c0_20], %19 {strides = array<i32>} : memref<128x768xf32, #tpu.memory_space<vmem>>, vector<8x768xf32>,
    %c0_21 = arith.constant 0 : index
    %c0_22 = arith.constant 0 : index
    %21 = vector.load %arg2[%c0_21, %c0_22] : memref<8x128xf32, #tpu.memory_space<vmem>>, vector<8x128xf32>
    %c0_23 = arith.constant 0 : index
    %c0_24 = arith.constant 0 : index
    %22 = vector.load %arg12[%c0_23, %c0_24] : memref<128x768xf32, #tpu.memory_space<vmem>>, vector<128x768xf32>
    %cst_25 = arith.constant dense<0.000000e+00> : vector<8x768xf32>
    %23 = tpu.matmul %21, %22, %cst_25 {dimension_numbers = #tpu.dot_dimension_numbers<[1], [0], [0], [1], [0, 0, 1, 1], [], []>} : vector<8x128xf32>, vector<128x768xf32>, vector<8x768xf32> -> vector<8x768xf32>
    %c0_26 = arith.constant 0 : index
    %c0_27 = arith.constant 0 : index
    %24 = vector.load %arg3[%c0_26, %c0_27] : memref<8x1xf32, #tpu.memory_space<vmem>>, vector<8x1xf32>
    %25 = vector.broadcast %24 : vector<8x1xf32> to vector<8x768xf32>
    %26 = arith.addf %23, %25 : vector<8x768xf32>
    %27 = vector.broadcast %0 : vector<1x768xf32> to vector<8x768xf32>
    %28 = arith.mulf %26, %27 : vector<8x768xf32>
    %cst_28 = arith.constant dense<0.000000e+00> : vector<8xf32>
    %29 = vector.multi_reduction <add>, %28, %cst_28 [1] : vector<8x768xf32> to vector<8xf32>
    %30 = vector.shape_cast %29 : vector<8xf32> to vector<8x1xf32>
    %31 = arith.mulf %28, %26 : vector<8x768xf32>
    %cst_29 = arith.constant dense<0.000000e+00> : vector<8xf32>
    %32 = vector.multi_reduction <add>, %31, %cst_29 [1] : vector<8x768xf32> to vector<8xf32>
    %33 = vector.shape_cast %32 : vector<8xf32> to vector<8x1xf32>
    %cst_30 = arith.constant 0.001953125 : f32
    %34 = vector.broadcast %cst_30 : f32 to vector<8x1xf32>
    %35 = arith.mulf %30, %34 : vector<8x1xf32>
    %cst_31 = arith.constant 0.001953125 : f32
    %36 = vector.broadcast %cst_31 : f32 to vector<8x1xf32>
    %37 = arith.mulf %33, %36 : vector<8x1xf32>
    %38 = arith.mulf %35, %35 : vector<8x1xf32>
    %39 = arith.subf %37, %38 : vector<8x1xf32>
    %cst_32 = arith.constant 0.000000e+00 : f32
    %40 = vector.broadcast %cst_32 : f32 to vector<8x1xf32>
    %41 = arith.maximumf %39, %40 : vector<8x1xf32>
    %c0_33 = arith.constant 0 : index
    %c0_34 = arith.constant 0 : index
    %42 = vector.load %arg4[%c0_33, %c0_34] : memref<8x1xf32, #tpu.memory_space<vmem>>, vector<8x1xf32>
    %cst_35 = arith.constant 9.99999974E-6 : f32
    %43 = vector.broadcast %cst_35 : f32 to vector<8x1xf32>
    %44 = arith.addf %41, %43 : vector<8x1xf32>
    %45 = math.rsqrt %44 : vector<8x1xf32>
    %46 = arith.mulf %42, %45 : vector<8x1xf32>
    %c0_36 = arith.constant 0 : index
    %c0_37 = arith.constant 0 : index
    %47 = vector.load %arg5[%c0_36, %c0_37] : memref<8x1xf32, #tpu.memory_space<vmem>>, vector<8x1xf32>
    %48 = arith.mulf %35, %46 : vector<8x1xf32>
    %49 = arith.subf %47, %48 : vector<8x1xf32>
    %50 = vector.broadcast %46 : vector<8x1xf32> to vector<8x768xf32>
    %51 = arith.mulf %26, %50 : vector<8x768xf32>
    %52 = vector.broadcast %49 : vector<8x1xf32> to vector<8x768xf32>
    %53 = arith.addf %51, %52 : vector<8x768xf32>
    %cst_38 = arith.constant 0.000000e+00 : f32
    %54 = vector.broadcast %cst_38 : f32 to vector<8x768xf32>
    %55 = arith.cmpf ogt, %53, %54 : vector<8x768xf32>
    %cst_39 = arith.constant 0.00999999977 : f32
    %56 = vector.broadcast %cst_39 : f32 to vector<8x768xf32>
    %57 = arith.mulf %56, %53 : vector<8x768xf32>
    %58 = arith.select %55, %53, %57 : vector<8x768xi1>, vector<8x768xf32>
    %cst_40 = arith.constant 0.000000e+00 : f32
    %59 = vector.broadcast %cst_40 : f32 to vector<8x128xf32>
    %c0_41 = arith.constant 0 : index
    %c0_42 = arith.constant 0 : index
    %60 = vector.load %arg11[%c0_41, %c0_42] : memref<8x1024xf32, #tpu.memory_space<vmem>>, vector<8x128xf32>
    tpu.vector_store %arg11[%c0_41, %c0_42], %59 {strides = array<i32>} : memref<8x1024xf32, #tpu.memory_space<vmem>>, vector<8x128xf32>,
    %cst_43 = arith.constant 0.000000e+00 : f32
    %61 = vector.broadcast %cst_43 : f32 to vector<8x128xf32>
    %c0_44 = arith.constant 0 : index
    %c896 = arith.constant 896 : index
    %62 = vector.load %arg11[%c0_44, %c896] : memref<8x1024xf32, #tpu.memory_space<vmem>>, vector<8x128xf32>
    tpu.vector_store %arg11[%c0_44, %c896], %61 {strides = array<i32>} : memref<8x1024xf32, #tpu.memory_space<vmem>>, vector<8x128xf32>,
    %63 = vector.broadcast %0 : vector<1x768xf32> to vector<8x768xf32>
    %64 = arith.mulf %58, %63 : vector<8x768xf32>
    %c0_45 = arith.constant 0 : index
    %c128_46 = arith.constant 128 : index
    %65 = vector.load %arg11[%c0_45, %c128_46] : memref<8x1024xf32, #tpu.memory_space<vmem>>, vector<8x768xf32>
    tpu.vector_store %arg11[%c0_45, %c128_46], %64 {strides = array<i32>} : memref<8x1024xf32, #tpu.memory_space<vmem>>, vector<8x768xf32>,
    %c0_47 = arith.constant 0 : index
    %c109_48 = arith.constant 109 : index
    %66 = vector.load %arg11[%c0_47, %c109_48] : memref<8x1024xf32, #tpu.memory_space<vmem>>, vector<8x768xf32>
    %c0_49 = arith.constant 0 : index
    %c0_50 = arith.constant 0 : index
    %67 = vector.load %arg12[%c0_49, %c0_50] : memref<128x768xf32, #tpu.memory_space<vmem>>, vector<8x768xf32>
    tpu.vector_store %arg12[%c0_49, %c0_50], %66 {strides = array<i32>} : memref<128x768xf32, #tpu.memory_space<vmem>>, vector<8x768xf32>,
    %c0_51 = arith.constant 0 : index
    %c110_52 = arith.constant 110 : index
    %68 = vector.load %arg11[%c0_51, %c110_52] : memref<8x1024xf32, #tpu.memory_space<vmem>>, vector<8x768xf32>
    %c8_53 = arith.constant 8 : index
    %c0_54 = arith.constant 0 : index
    %69 = vector.load %arg12[%c8_53, %c0_54] : memref<128x768xf32, #tpu.memory_space<vmem>>, vector<8x768xf32>
    tpu.vector_store %arg12[%c8_53, %c0_54], %68 {strides = array<i32>} : memref<128x768xf32, #tpu.memory_space<vmem>>, vector<8x768xf32>,
    %c0_55 = arith.constant 0 : index
    %c111_56 = arith.constant 111 : index
    %70 = vector.load %arg11[%c0_55, %c111_56] : memref<8x1024xf32, #tpu.memory_space<vmem>>, vector<8x768xf32>
    %c16_57 = arith.constant 16 : index
    %c0_58 = arith.constant 0 : index
    %71 = vector.load %arg12[%c16_57, %c0_58] : memref<128x768xf32, #tpu.memory_space<vmem>>, vector<8x768xf32>
    tpu.vector_store %arg12[%c16_57, %c0_58], %70 {strides = array<i32>} : memref<128x768xf32, #tpu.memory_space<vmem>>, vector<8x768xf32>,
    %c0_59 = arith.constant 0 : index
    %c127_60 = arith.constant 127 : index
    %72 = vector.load %arg11[%c0_59, %c127_60] : memref<8x1024xf32, #tpu.memory_space<vmem>>, vector<8x768xf32>
    %c24_61 = arith.constant 24 : index
    %c0_62 = arith.constant 0 : index
    %73 = vector.load %arg12[%c24_61, %c0_62] : memref<128x768xf32, #tpu.memory_space<vmem>>, vector<8x768xf32>
    tpu.vector_store %arg12[%c24_61, %c0_62], %72 {strides = array<i32>} : memref<128x768xf32, #tpu.memory_space<vmem>>, vector<8x768xf32>,
    %c0_63 = arith.constant 0 : index
    %c128_64 = arith.constant 128 : index
    %74 = vector.load %arg11[%c0_63, %c128_64] : memref<8x1024xf32, #tpu.memory_space<vmem>>, vector<8x768xf32>
    %c32_65 = arith.constant 32 : index
    %c0_66 = arith.constant 0 : index
    %75 = vector.load %arg12[%c32_65, %c0_66] : memref<128x768xf32, #tpu.memory_space<vmem>>, vector<8x768xf32>
    tpu.vector_store %arg12[%c32_65, %c0_66], %74 {strides = array<i32>} : memref<128x768xf32, #tpu.memory_space<vmem>>, vector<8x768xf32>,
    %c0_67 = arith.constant 0 : index
    %c129_68 = arith.constant 129 : index
    %76 = vector.load %arg11[%c0_67, %c129_68] : memref<8x1024xf32, #tpu.memory_space<vmem>>, vector<8x768xf32>
    %c40_69 = arith.constant 40 : index
    %c0_70 = arith.constant 0 : index
    %77 = vector.load %arg12[%c40_69, %c0_70] : memref<128x768xf32, #tpu.memory_space<vmem>>, vector<8x768xf32>
    tpu.vector_store %arg12[%c40_69, %c0_70], %76 {strides = array<i32>} : memref<128x768xf32, #tpu.memory_space<vmem>>, vector<8x768xf32>,
    %c0_71 = arith.constant 0 : index
    %c145_72 = arith.constant 145 : index
    %78 = vector.load %arg11[%c0_71, %c145_72] : memref<8x1024xf32, #tpu.memory_space<vmem>>, vector<8x768xf32>
    %c48_73 = arith.constant 48 : index
    %c0_74 = arith.constant 0 : index
    %79 = vector.load %arg12[%c48_73, %c0_74] : memref<128x768xf32, #tpu.memory_space<vmem>>, vector<8x768xf32>
    tpu.vector_store %arg12[%c48_73, %c0_74], %78 {strides = array<i32>} : memref<128x768xf32, #tpu.memory_space<vmem>>, vector<8x768xf32>,
    %c0_75 = arith.constant 0 : index
    %c146_76 = arith.constant 146 : index
    %80 = vector.load %arg11[%c0_75, %c146_76] : memref<8x1024xf32, #tpu.memory_space<vmem>>, vector<8x768xf32>
    %c56_77 = arith.constant 56 : index
    %c0_78 = arith.constant 0 : index
    %81 = vector.load %arg12[%c56_77, %c0_78] : memref<128x768xf32, #tpu.memory_space<vmem>>, vector<8x768xf32>
    tpu.vector_store %arg12[%c56_77, %c0_78], %80 {strides = array<i32>} : memref<128x768xf32, #tpu.memory_space<vmem>>, vector<8x768xf32>,
    %c0_79 = arith.constant 0 : index
    %c147_80 = arith.constant 147 : index
    %82 = vector.load %arg11[%c0_79, %c147_80] : memref<8x1024xf32, #tpu.memory_space<vmem>>, vector<8x768xf32>
    %c64_81 = arith.constant 64 : index
    %c0_82 = arith.constant 0 : index
    %83 = vector.load %arg12[%c64_81, %c0_82] : memref<128x768xf32, #tpu.memory_space<vmem>>, vector<8x768xf32>
    tpu.vector_store %arg12[%c64_81, %c0_82], %82 {strides = array<i32>} : memref<128x768xf32, #tpu.memory_space<vmem>>, vector<8x768xf32>,
    %c0_83 = arith.constant 0 : index
    %c0_84 = arith.constant 0 : index
    %84 = vector.load %arg6[%c0_83, %c0_84] : memref<8x128xf32, #tpu.memory_space<vmem>>, vector<8x128xf32>
    %c0_85 = arith.constant 0 : index
    %c0_86 = arith.constant 0 : index
    %85 = vector.load %arg12[%c0_85, %c0_86] : memref<128x768xf32, #tpu.memory_space<vmem>>, vector<128x768xf32>
    %cst_87 = arith.constant dense<0.000000e+00> : vector<8x768xf32>
    %86 = tpu.matmul %84, %85, %cst_87 {dimension_numbers = #tpu.dot_dimension_numbers<[1], [0], [0], [1], [0, 0, 1, 1], [], []>} : vector<8x128xf32>, vector<128x768xf32>, vector<8x768xf32> -> vector<8x768xf32>
    %c0_88 = arith.constant 0 : index
    %c0_89 = arith.constant 0 : index
    %87 = vector.load %arg7[%c0_88, %c0_89] : memref<8x1xf32, #tpu.memory_space<vmem>>, vector<8x1xf32>
    %88 = vector.broadcast %87 : vector<8x1xf32> to vector<8x768xf32>
    %89 = arith.addf %86, %88 : vector<8x768xf32>
    %90 = vector.broadcast %0 : vector<1x768xf32> to vector<8x768xf32>
    %91 = arith.mulf %89, %90 : vector<8x768xf32>
    %cst_90 = arith.constant dense<0.000000e+00> : vector<8xf32>
    %92 = vector.multi_reduction <add>, %91, %cst_90 [1] : vector<8x768xf32> to vector<8xf32>
    %93 = vector.shape_cast %92 : vector<8xf32> to vector<8x1xf32>
    %94 = arith.mulf %91, %89 : vector<8x768xf32>
    %cst_91 = arith.constant dense<0.000000e+00> : vector<8xf32>
    %95 = vector.multi_reduction <add>, %94, %cst_91 [1] : vector<8x768xf32> to vector<8xf32>
    %96 = vector.shape_cast %95 : vector<8xf32> to vector<8x1xf32>
    %cst_92 = arith.constant 0.001953125 : f32
    %97 = vector.broadcast %cst_92 : f32 to vector<8x1xf32>
    %98 = arith.mulf %93, %97 : vector<8x1xf32>
    %cst_93 = arith.constant 0.001953125 : f32
    %99 = vector.broadcast %cst_93 : f32 to vector<8x1xf32>
    %100 = arith.mulf %96, %99 : vector<8x1xf32>
    %101 = arith.mulf %98, %98 : vector<8x1xf32>
    %102 = arith.subf %100, %101 : vector<8x1xf32>
    %cst_94 = arith.constant 0.000000e+00 : f32
    %103 = vector.broadcast %cst_94 : f32 to vector<8x1xf32>
    %104 = arith.maximumf %102, %103 : vector<8x1xf32>
    %c0_95 = arith.constant 0 : index
    %c0_96 = arith.constant 0 : index
    %105 = vector.load %arg8[%c0_95, %c0_96] : memref<8x1xf32, #tpu.memory_space<vmem>>, vector<8x1xf32>
    %cst_97 = arith.constant 9.99999974E-6 : f32
    %106 = vector.broadcast %cst_97 : f32 to vector<8x1xf32>
    %107 = arith.addf %104, %106 : vector<8x1xf32>
    %108 = math.rsqrt %107 : vector<8x1xf32>
    %109 = arith.mulf %105, %108 : vector<8x1xf32>
    %c0_98 = arith.constant 0 : index
    %c0_99 = arith.constant 0 : index
    %110 = vector.load %arg9[%c0_98, %c0_99] : memref<8x1xf32, #tpu.memory_space<vmem>>, vector<8x1xf32>
    %111 = arith.mulf %98, %109 : vector<8x1xf32>
    %112 = arith.subf %110, %111 : vector<8x1xf32>
    %113 = vector.broadcast %109 : vector<8x1xf32> to vector<8x768xf32>
    %114 = arith.mulf %89, %113 : vector<8x768xf32>
    %115 = vector.broadcast %112 : vector<8x1xf32> to vector<8x768xf32>
    %116 = arith.addf %114, %115 : vector<8x768xf32>
    %cst_100 = arith.constant 0.000000e+00 : f32
    %117 = vector.broadcast %cst_100 : f32 to vector<8x768xf32>
    %118 = arith.cmpf ogt, %116, %117 : vector<8x768xf32>
    %cst_101 = arith.constant 0.00999999977 : f32
    %119 = vector.broadcast %cst_101 : f32 to vector<8x768xf32>
    %120 = arith.mulf %119, %116 : vector<8x768xf32>
    %121 = arith.select %118, %116, %120 : vector<8x768xi1>, vector<8x768xf32>
    %c0_102 = arith.constant 0 : index
    %c128_103 = arith.constant 128 : index
    %122 = vector.load %arg0[%c0_102, %c128_103] : memref<8x1024xf32, #tpu.memory_space<vmem>>, vector<8x768xf32>
    %123 = arith.addf %122, %121 : vector<8x768xf32>
    %c0_104 = arith.constant 0 : index
    %c0_105 = arith.constant 0 : index
    %124 = vector.load %arg10[%c0_104, %c0_105] : memref<8x768xf32, #tpu.memory_space<vmem>>, vector<8x768xf32>
    tpu.vector_store %arg10[%c0_104, %c0_105], %123 {strides = array<i32>} : memref<8x768xf32, #tpu.memory_space<vmem>>, vector<8x768xf32>,
    return
  }
}

</mosaic_0001>

<bundles_post_ra>
// kernel: tpu_custom_call.1
= control target key start
LH: loop header
LB: loop body
LE: loop exit
PB: predicated region body
PF: predicated region fallthrough
CT: control target
= control target key end

     0   :  { %15 = vsyncpa [#allocation5], 0  ;;  %s8009_s0 = inlined_call_operand.hbm [shape: f32[8,1024], index: 0, kind: input, shape index: {}]   ;;  %s8010_s1 = inlined_call_operand.vmem [shape: f32[1,768], index: 1, kind: input, shape index: {}]   ;;  %s8011_s2 = inlined_call_operand.vmem [shape: f32[8,128], index: 2, kind: input, shape index: {}]   ;;  %s8012_s3 = inlined_call_operand.vmem [shape: f32[8,1], index: 3, kind: input, shape index: {}]   ;;  %s8013_s4 = inlined_call_operand.vmem [shape: f32[8,1], index: 4, kind: input, shape index: {}]   ;;  %s8014_s5 = inlined_call_operand.vmem [shape: f32[8,1], index: 5, kind: input, shape index: {}]   ;;  %s8015_s6 = inlined_call_operand.vmem [shape: f32[8,128], index: 6, kind: input, shape index: {}]   ;;  %s8016_s7 = inlined_call_operand.vmem [shape: f32[8,1], index: 7, kind: input, shape index: {}]   ;;  %s8017_s8 = inlined_call_operand.vmem [shape: f32[8,1], index: 8, kind: input, shape index: {}]   ;;  %s8018_s9 = inlined_call_operand.vmem [shape: f32[8,1], index: 9, kind: input, shape index: {}]   ;;  %s8019_s10 = inlined_call_operand.hbm [shape: f32[8,768], index: 10, kind: output, shape index: {}]  }
   0x1   :  { %16 = vsyncpa [#allocation6], 0  ;;  %s22_s15 = sshll.u32 %s8009_s0, 4  ;;  %s5465_s16 = smov [#allocation4]   ;;  %s23_s15 = int_to_ptr.hbm [resolvable:$true] %s22_s15 }
   0x2   :  { %s24_s17 = sshll.u32 %s5465_s16, 4  ;;  %s25_s17 = int_to_ptr.vmem [resolvable:$true] %s24_s17 }
   0x3   :  { %27 = dma.hbm_to_vmem [thread:$0]  %s23_s15, 1024, %s25_s17, [#allocation5]  }
   0x4   :  { %5461 = dma.done.wait [#allocation5], 1024  }
   0x5   :  { %5462 = vsyncadd [#allocation5], 4294966272  ;;  %v5535_v0 = vld [vmem:[#allocation4 + $0x8] sm:$0xff]  ;;  %s5466_s18 = smov 109   ;;  %s5467_s19 = smov 110   ;;  %v5543_v1 = vld [vmem:[#allocation4 + $0x10] sm:$0xff] }
   0x6   :  { %448 = vrot.lane.b32.xlu0 %v5535_v0, %s5466_s18  ;;  %401 = vrot.lane.b32.xlu1 %v5535_v0, %s5467_s19  ;;  %s5468_s20 = smov 111   ;;  %v5551_v2 = vld [vmem:[#allocation4 + $0x18] sm:$0xff]  ;;  %s5469_s0 = smov 127   ;;  %v234_v3 = vld [vmem:[#allocation4] sm:$0xff]  ;;  %v5588_v5 = vld [vmem:[#allocation4 + $0x28] sm:$0xff]  ;;  %vm368_vm0 = vcmask 908288  }
   0x7   :  { %354 = vrot.lane.b32.xlu2 %v5535_v0, %s5468_s20  ;;  %s5470_s21 = smov 1   ;;  %s5471_s22 = smov 17   ;;  %v343_v4 = vld [vmem:[#allocation4 + $0x20] sm:$0xff]  ;;  %v5610_v7 = vld [vmem:[#allocation4 + $0x30] sm:$0xff]  ;;  %v393_v9 = vld [vmem:[#allocation4 + $0x38] sm:$0xff]  ;;  %vm462_vm1 = vcmask 891904  }
   0x8   :  { %s5472_s23 = smov 18   ;;  %s5473_s24 = smov 19   ;;  %vm415_vm2 = vcmask 900096   ;;  %v5653_v23 = vand.u32 4294901760, %v5535_v0  ;;  %vm321_vm3 = vcmask 1039360   ;;  %vm262_vm4 = vcmask 7168  }
   0x9   :  { %vm215_vm5 = vcmask 138240   ;;  %v481_v60 = vld [vmem:[%s8011_s2] sm:$0xff]  ;;  %vm168_vm6 = vcmask 146432   ;;  %vm121_vm7 = vcmask 154624  }
   0xa   :  { %v5670_v29 = vsub.f32 %v5535_v0, %v5653_v23 }
   0xc   :  { %v693_v38 = vand.u32 4294901760, %v5670_v29 }
   0xe   :  { %450 = vrot.lane.b32.xlu0 %v5543_v1, %s5466_s18  ;;  %403 = vrot.lane.b32.xlu1 %v5543_v1, %s5467_s19  ;;  %v694_v44 = vsub.f32 %v5670_v29, %v693_v38 }
   0xf   :  { %356 = vrot.lane.b32.xlu2 %v5543_v1, %s5468_s20 }
  0x10   :  { %v695_v51 = vand.u32 4294901760, %v694_v44 }
  0x16   :  { %309 = vrot.lane.b32.xlu1 %v5543_v1, %s5469_s0  ;;  %307 = vrot.lane.b32.xlu0 %v5535_v0, %s5469_s0 }
  0x17   :  { %452 = vrot.lane.b32.xlu2 %v5551_v2, %s5466_s18 }
  0x1e   :  { %250 = vrot.lane.b32.xlu1 %v5535_v0, %s5470_s21  ;;  %248 = vrot.lane.b32.xlu0 %v234_v3, %s5470_s21 }
  0x1f   :  { %405 = vrot.lane.b32.xlu2 %v5551_v2, %s5467_s19 }
  0x26   :  { %203 = vrot.lane.b32.xlu1 %v5535_v0, %s5471_s22  ;;  %201 = vrot.lane.b32.xlu0 %v234_v3, %s5471_s22 }
  0x27   :  { %358 = vrot.lane.b32.xlu2 %v5551_v2, %s5468_s20 }
  0x2e   :  { %156 = vrot.lane.b32.xlu1 %v5535_v0, %s5472_s23  ;;  %154 = vrot.lane.b32.xlu0 %v234_v3, %s5472_s23 }
  0x2f   :  { %311 = vrot.lane.b32.xlu2 %v5551_v2, %s5469_s0 }
  0x36   :  { %109 = vrot.lane.b32.xlu1 %v5535_v0, %s5473_s24  ;;  %107 = vrot.lane.b32.xlu0 %v234_v3, %s5473_s24 }
  0x37   :  { %252 = vrot.lane.b32.xlu2 %v5543_v1, %s5470_s21 }
  0x3e   :  { %158 = vrot.lane.b32.xlu1 %v5543_v1, %s5472_s23  ;;  %205 = vrot.lane.b32.xlu0 %v5543_v1, %s5471_s22 }
  0x3f   :  { %111 = vrot.lane.b32.xlu2 %v5543_v1, %s5473_s24 }
  0x46   :  { %407 = vrot.lane.b32.xlu1 %v343_v4, %s5467_s19  ;;  %454 = vrot.lane.b32.xlu0 %v343_v4, %s5466_s18 }
  0x47   :  { %360 = vrot.lane.b32.xlu2 %v343_v4, %s5468_s20 }
  0x4e   :  { %456 = vrot.lane.b32.xlu1 %v5588_v5, %s5466_s18  ;;  %313 = vrot.lane.b32.xlu0 %v343_v4, %s5469_s0 }
  0x4f   :  { %409 = vrot.lane.b32.xlu2 %v5588_v5, %s5467_s19 }
  0x56   :  { %362 = vrot.lane.b32.xlu1 %v5588_v5, %s5468_s20  ;;  %254 = vrot.lane.b32.xlu0 %v5551_v2, %s5470_s21 }
  0x57   :  { %207 = vrot.lane.b32.xlu2 %v5551_v2, %s5471_s22 }
  0x5e   :  { %160 = vrot.lane.b32.xlu1 %v5551_v2, %s5472_s23  ;;  %315 = vrot.lane.b32.xlu0 %v5588_v5, %s5469_s0 }
  0x5f   :  { %113 = vrot.lane.b32.xlu2 %v5551_v2, %s5473_s24 }
  0x61   :  { %v355_v6 = vpop.permute.xlu2 %354 }
  0x66   :  { %209 = vrot.lane.b32.xlu1 %v343_v4, %s5471_s22  ;;  %256 = vrot.lane.b32.xlu0 %v343_v4, %s5470_s21 }
  0x67   :  { %162 = vrot.lane.b32.xlu2 %v343_v4, %s5472_s23 }
  0x69   :  { %v5612_v8 = vpop.permute.xlu2 %356 }
  0x6a   :  { %v369_v13 = vsel %vm368_vm0, %v355_v6, %v5612_v8 }
  0x6b   :  { %v5628_v14 = vand.u32 4294901760, %v369_v13 }
  0x6d   :  { %v5646_v20 = vsub.f32 %v369_v13, %v5628_v14 }
  0x6e   :  { %458 = vrot.lane.b32.xlu1 %v5610_v7, %s5466_s18  ;;  %115 = vrot.lane.b32.xlu0 %v343_v4, %s5473_s24  ;;  %v5761_v4 = vand.u32 4294901760, %v481_v60 }
  0x6f   :  { %411 = vrot.lane.b32.xlu2 %v5610_v7, %s5467_s19  ;;  %v681_v28 = vand.u32 4294901760, %v5646_v20 }
  0x71   :  { %v5623_v10 = vpop.permute.xlu2 %452  ;;  %v682_v37 = vsub.f32 %v5646_v20, %v681_v28 }
  0x73   :  { %v683_v42 = vand.u32 4294901760, %v682_v37 }
  0x76   :  { %317 = vrot.lane.b32.xlu1 %v5610_v7, %s5469_s0  ;;  %364 = vrot.lane.b32.xlu0 %v5610_v7, %s5468_s20 }
  0x77   :  { %460 = vrot.lane.b32.xlu2 %v393_v9, %s5466_s18 }
  0x78   :  { %v449_v11 = vpop.permute.xlu0 %448  ;;  %v402_v12 = vpop.permute.xlu1 %401 }
  0x79   :  { %v5639_v17 = vpop.permute.xlu2 %405 }
  0x7e   :  { %413 = vrot.lane.b32.xlu1 %v393_v9, %s5467_s19  ;;  %258 = vrot.lane.b32.xlu0 %v5588_v5, %s5470_s21 }
  0x7f   :  { %211 = vrot.lane.b32.xlu2 %v5588_v5, %s5471_s22 }
  0x80   :  { %v5635_v15 = vpop.permute.xlu0 %450  ;;  %v5637_v16 = vpop.permute.xlu1 %403 }
  0x81   :  { %v463_v18 = vsel %vm462_vm1, %v449_v11, %v5635_v15  ;;  %v416_v19 = vsel %vm415_vm2, %v402_v12, %v5637_v16  ;;  %v5696_v39 = vpop.permute.xlu2 %358  ;;  %v464_v55 = vsel %vm462_vm1, %v5635_v15, %v5623_v10  ;;  %v417_v0 = vsel %vm415_vm2, %v5637_v16, %v5639_v17 }
  0x82   :  { %v5648_v21 = vand.u32 4294901760, %v463_v18  ;;  %v5650_v22 = vand.u32 4294901760, %v416_v19  ;;  %v5752_v63 = vand.u32 4294901760, %v464_v55  ;;  %v5767_v6 = vand.u32 4294901760, %v417_v0 }
  0x84   :  { %v5656_v24 = vsub.f32 %v463_v18, %v5648_v21  ;;  %v5659_v25 = vsub.f32 %v416_v19, %v5650_v22  ;;  %599 = vmatpush.msra.mxu0 %v5648_v21  ;;  %795 = vmatpush.msra.mxu3 %v5648_v21  ;;  %v5775_v11 = vsub.f32 %v464_v55, %v5752_v63 }
  0x85   :  { %v5787_v18 = vsub.f32 %v481_v60, %v5761_v4 }
  0x86   :  { %601 = vmatpush.msra.mxu0 %v5650_v22  ;;  %749 = vmatpush.msra.mxu2 %v5656_v24  ;;  %v669_v26 = vand.u32 4294901760, %v5656_v24  ;;  %v675_v27 = vand.u32 4294901760, %v5659_v25  ;;  %v8020_v37 = vand.u32 4294901760, %v5775_v11 }
  0x87   :  { %797 = vmatpush.msra.mxu3 %v5650_v22  ;;  %164 = vrot.lane.b32.xlu1 %v5588_v5, %s5472_s23  ;;  %v5812_v44 = vand.u32 4294901760, %v5787_v18 }
  0x88   :  { %366 = vrot.lane.b32.xlu0 %v393_v9, %s5468_s20  ;;  %603 = vmatpush.msra.mxu0 %v5628_v14  ;;  %v5677_v30 = vpop.permute.xlu1 %309  ;;  %v308_v31 = vpop.permute.xlu0 %307  ;;  %v670_v32 = vsub.f32 %v5656_v24, %v669_v26  ;;  %v676_v33 = vsub.f32 %v5659_v25, %v675_v27 }
  0x89   :  { %752 = vmatpush.msra.mxu2 %v5659_v25  ;;  %799 = vmatpush.msra.mxu3 %v5628_v14  ;;  %v322_v34 = vsel %vm321_vm3, %v308_v31, %v5677_v30  ;;  %v5728_v53 = vpop.permute.xlu2 %311  ;;  %v5794_v31 = vand.u32 4294901760, %v5543_v1 }
  0x8a   :  { %v5689_v35 = vand.u32 4294901760, %v322_v34  ;;  %v671_v36 = vand.u32 4294901760, %v670_v32  ;;  %319 = vrot.lane.b32.xlu2 %v393_v9, %s5469_s0  ;;  %v677_v41 = vand.u32 4294901760, %v676_v33  ;;  %v5797_v32 = vsub.f32 %v417_v0, %v5767_v6 }
  0x8b   :  { %755 = vmatpush.msra.mxu2 %v5646_v20 }
  0x8c   :  { %v5700_v40 = vsub.f32 %v322_v34, %v5689_v35  ;;  %605 = vmatpush.msra.mxu0 %v5689_v35  ;;  %672 = vmatpush.msra.mxu1 %v671_v36 }
  0x8d   :  { %801 = vmatpush.msra.mxu3 %v5689_v35 }
  0x8e   :  { %678 = vmatpush.msra.mxu1 %v677_v41  ;;  %758 = vmatpush.msra.mxu2 %v5700_v40  ;;  %v687_v43 = vand.u32 4294901760, %v5700_v40 }
  0x8f   :  { %260 = vrot.lane.b32.xlu1 %v5610_v7, %s5470_s21  ;;  %607 = vmatpush.msra.mxu0 %v5653_v23 }
  0x90   :  { %117 = vrot.lane.b32.xlu0 %v5588_v5, %s5473_s24  ;;  %684 = vmatpush.msra.mxu1 %v683_v42  ;;  %v251_v45 = vpop.permute.xlu1 %250  ;;  %v249_v46 = vpop.permute.xlu0 %248  ;;  %v688_v47 = vsub.f32 %v5700_v40, %v687_v43  ;;  %v370_v5 = vsel %vm368_vm0, %v5612_v8, %v5696_v39 }
  0x91   :  { %v263_v48 = vsel %vm262_vm4, %v249_v46, %v251_v45  ;;  %803 = vmatpush.msra.mxu3 %v5653_v23  ;;  %761 = vmatpush.msra.mxu2 %v5670_v29  ;;  %v5777_v12 = vpop.permute.xlu2 %252  ;;  %v5779_v13 = vand.u32 4294901760, %v370_v5 }
  0x92   :  { %v5720_v49 = vand.u32 4294901760, %v263_v48  ;;  %v689_v50 = vand.u32 4294901760, %v688_v47  ;;  %213 = vrot.lane.b32.xlu2 %v5610_v7, %s5471_s22  ;;  %v264_v36 = vsel %vm262_vm4, %v251_v45, %v5777_v12  ;;  %v5820_v45 = vsub.f32 %v5543_v1, %v5794_v31 }
  0x93   :  { %v5805_v41 = vsub.f32 %v370_v5, %v5779_v13  ;;  %v5822_v47 = vand.u32 4294901760, %v264_v36 }
  0x94   :  { %v5725_v52 = vsub.f32 %v263_v48, %v5720_v49  ;;  %609 = vmatpush.msra.mxu0 %v5720_v49  ;;  %690 = vmatpush.msra.mxu1 %v689_v50  ;;  %v1016_v50 = vand.u32 4294901760, %v5797_v32  ;;  %v8022_v0 = vand.u32 4294901760, %v5820_v45 }
  0x95   :  { %805 = vmatpush.msra.mxu3 %v5720_v49  ;;  %v5840_v5 = vsub.f32 %v264_v36, %v5822_v47 }
  0x96   :  { %764 = vmatpush.msra.mxu2 %v5725_v52  ;;  %696 = vmatpush.msra.mxu1 %v695_v51  ;;  %v699_v54 = vand.u32 4294901760, %v5725_v52  ;;  %v1011_v51 = vsub.f32 %v5775_v11, %v8020_v37 }
  0x97   :  { %119 = vrot.lane.b32.xlu1 %v5610_v7, %s5473_s24 }
  0x98   :  { %166 = vrot.lane.b32.xlu0 %v5610_v7, %s5472_s23  ;;  %v5740_v56 = vpop.permute.xlu1 %203  ;;  %v202_v57 = vpop.permute.xlu0 %201  ;;  %v700_v58 = vsub.f32 %v5725_v52, %v699_v54  ;;  %v323_v7 = vsel %vm321_vm3, %v5677_v30, %v5728_v53 }
  0x99   :  { %v216_v59 = vsel %vm215_vm5, %v202_v57, %v5740_v56  ;;  %v5789_v19 = vand.u32 4294901760, %v323_v7 }
  0x9a   :  { %v5750_v61 = vand.u32 4294901760, %v216_v59  ;;  %v701_v62 = vand.u32 4294901760, %v700_v58  ;;  %v8021_v58 = vand.u32 4294901760, %v5805_v41 }
  0x9b   :  { %v5815_v46 = vsub.f32 %v323_v7, %v5789_v19 }
  0x9c   :  { %v5758_v3 = vsub.f32 %v216_v59, %v5750_v61  ;;  %611 = vmatpush.msra.mxu0 %v5750_v61  ;;  %702 = vmatpush.msra.mxu1 %v701_v62  ;;  %v619_v59 = vsub.f32 %v5787_v18, %v5812_v44  ;;  %v1023_v36 = vsub.f32 %v5805_v41, %v8021_v58 }
  0x9d   :  { %807 = vmatpush.msra.mxu3 %v5750_v61  ;;  %v8023_v62 = vand.u32 4294901760, %v5815_v46 }
  0x9e   :  { %767 = vmatpush.msra.mxu2 %v5758_v3  ;;  %v705_v9 = vand.u32 4294901760, %v5758_v3 }
  0xa0   :  { %v5781_v8 = vpop.permute.xlu1 %156  ;;  %v155_v15 = vpop.permute.xlu0 %154  ;;  %v706_v16 = vsub.f32 %v5758_v3, %v705_v9 }
  0xa1   :  { %v169_v30 = vsel %vm168_vm6, %v155_v15, %v5781_v8 }
  0xa2   :  { %v5799_v33 = vand.u32 4294901760, %v169_v30  ;;  %v707_v34 = vand.u32 4294901760, %v706_v16  ;;  %v1017_v16 = vsub.f32 %v5797_v32, %v1016_v50 }
  0xa4   :  { %v5808_v42 = vsub.f32 %v169_v30, %v5799_v33  ;;  %613 = vmatpush.msra.mxu0 %v5799_v33  ;;  %708 = vmatpush.msra.mxu1 %v707_v34  ;;  %v5847_v30 = vpop.permute.xlu2 %111  ;;  %v1012_v34 = vand.u32 4294901760, %v1011_v51  ;;  %v1029_v51 = vsub.f32 %v5815_v46, %v8023_v62 }
  0xa5   :  { %809 = vmatpush.msra.mxu3 %v5799_v33 }
  0xa6   :  { %770 = vmatpush.msra.mxu2 %v5808_v42  ;;  %v711_v48 = vand.u32 4294901760, %v5808_v42 }
  0xa8   :  { %v110_v55 = vpop.permute.xlu1 %109  ;;  %v108_v57 = vpop.permute.xlu0 %107  ;;  %v712_v1 = vsub.f32 %v5808_v42, %v711_v48  ;;  %v8054_v42 = vand.u32 4294901760, %v5775_v11 }
  0xa9   :  { %v122_v60 = vsel %vm121_vm7, %v108_v57, %v110_v55  ;;  %v123_v57 = vsel %vm121_vm7, %v110_v55, %v5847_v30  ;;  %v1035_v55 = vsub.f32 %v5820_v45, %v8022_v0 }
  0xaa   :  { %v5842_v7 = vand.u32 4294901760, %v122_v60  ;;  %v713_v15 = vand.u32 4294901760, %v712_v1  ;;  %v5858_v1 = vand.u32 4294901760, %v619_v59  ;;  %v5872_v58 = vand.u32 4294901760, %v123_v57 }
  0xac   :  { %v5852_v37 = vsub.f32 %v122_v60, %v5842_v7  ;;  %615 = vmatpush.msra.mxu0 %v5842_v7  ;;  %714 = vmatpush.msra.mxu1 %v713_v15  ;;  %v1018_v60 = vand.u32 4294901760, %v1017_v16  ;;  %v1040_v15 = vand.u32 4294901760, %v5840_v5 }
  0xad   :  { %811 = vmatpush.msra.mxu3 %v5842_v7  ;;  %621 = vmatmul.f32.vlgmr.msra.gmra.mxu0 %v5858_v1 }
  0xae   :  { %850 = vmatpush.msrb.mxu0 %v669_v26  ;;  %773 = vmatpush.msra.mxu2 %v5852_v37  ;;  %v717_v59 = vand.u32 4294901760, %v5852_v37 }
  0xaf   :  { %1013 = vmatpush.msrb.mxu3 %v1012_v34  ;;  %v1024_v34 = vand.u32 4294901760, %v1023_v36  ;;  %776 = vmatmul.f32.vlgmr.msra.gmra.mxu2 %v5787_v18 }
  0xb0   :  { %854 = vmatpush.msrb.mxu0 %v675_v27  ;;  %940 = vmatpush.msrb.mxu2 %v5752_v63  ;;  %v5877_v24 = vpop.permute.xlu1 %158  ;;  %v5879_v26 = vpop.permute.xlu0 %205  ;;  %v718_v0 = vsub.f32 %v5852_v37, %v717_v59  ;;  %v1030_v27 = vand.u32 4294901760, %v1029_v51 }
  0xb1   :  { %1019 = vmatpush.msrb.mxu3 %v1018_v60  ;;  %v170_v16 = vsel %vm168_vm6, %v5781_v8, %v5877_v24  ;;  %v217_v25 = vsel %vm215_vm5, %v5740_v56, %v5879_v26  ;;  %v1036_v60 = vand.u32 4294901760, %v1035_v55  ;;  %v1041_v8 = vsub.f32 %v5840_v5, %v1040_v15 }
  0xb2   :  { %858 = vmatpush.msrb.mxu0 %v681_v28  ;;  %942 = vmatpush.msrb.mxu2 %v5767_v6  ;;  %v5892_v36 = vand.u32 4294901760, %v170_v16  ;;  %v5894_v37 = vand.u32 4294901760, %v217_v25  ;;  %v719_v62 = vand.u32 4294901760, %v718_v0  ;;  %v5901_v56 = vsub.f32 %v123_v57, %v5872_v58  ;;  %v5930_v57 = vpop.permute.xlu2 %360 }
  0xb3   :  { %1025 = vmatpush.msrb.mxu3 %v1024_v34  ;;  %v1042_v40 = vand.u32 4294901760, %v1041_v8 }
  0xb4   :  { %862 = vmatpush.msrb.mxu0 %v687_v43  ;;  %944 = vmatpush.msrb.mxu2 %v5779_v13  ;;  %v5907_v20 = vsub.f32 %v170_v16, %v5892_v36  ;;  %v5910_v28 = vsub.f32 %v217_v25, %v5894_v37 }
  0xb5   :  { %1031 = vmatpush.msrb.mxu3 %v1030_v27  ;;  %720 = vmatpush.msra.mxu1 %v719_v62  ;;  %v1058_v62 = vand.u32 4294901760, %v5901_v56 }
  0xb6   :  { %866 = vmatpush.msrb.mxu0 %v693_v38  ;;  %946 = vmatpush.msrb.mxu2 %v5789_v19  ;;  %v1046_v43 = vand.u32 4294901760, %v5910_v28  ;;  %v1052_v0 = vand.u32 4294901760, %v5907_v20 }
  0xb7   :  { %903 = vmatpush.msrb.mxu1 %v5648_v21  ;;  %1037 = vmatpush.msrb.mxu3 %v1036_v60 }
  0xb8   :  { %870 = vmatpush.msrb.mxu0 %v699_v54  ;;  %948 = vmatpush.msrb.mxu2 %v5794_v31  ;;  %v5923_v29 = vpop.permute.xlu1 %407  ;;  %v5925_v21 = vpop.permute.xlu0 %454  ;;  %v1047_v38 = vsub.f32 %v5910_v28, %v1046_v43  ;;  %v1059_v54 = vsub.f32 %v5901_v56, %v1058_v62 }
  0xb9   :  { %905 = vmatpush.msrb.mxu1 %v5650_v22  ;;  %1043 = vmatpush.msrb.mxu3 %v1042_v40  ;;  %v1053_v22 = vsub.f32 %v5907_v20, %v1052_v0 }
  0xba   :  { %874 = vmatpush.msrb.mxu0 %v705_v9  ;;  %950 = vmatpush.msrb.mxu2 %v5822_v47  ;;  %v1048_v52 = vand.u32 4294901760, %v1047_v38  ;;  %v284_v38 = vld [vmem:[#allocation4 + $0x20] sm:$0xff] }
  0xbb   :  { %907 = vmatpush.msrb.mxu1 %v5628_v14  ;;  %815 = vmatmul.f32.vlgmr.msra.gmra.mxu3 %v5812_v44  ;;  %v1054_v14 = vand.u32 4294901760, %v1053_v22 }
  0xbc   :  { %878 = vmatpush.msrb.mxu0 %v711_v48  ;;  %952 = vmatpush.msrb.mxu2 %v5894_v37 }
  0xbd   :  { %909 = vmatpush.msrb.mxu1 %v5689_v35  ;;  %1049 = vmatpush.msrb.mxu3 %v1048_v52  ;;  %v1060_v35 = vand.u32 4294901760, %v1059_v54 }
  0xbe   :  { %722 = vmatmul.f32.vlgmr.msra.gmra.mxu1 %v5761_v4  ;;  %882 = vmatpush.msrb.mxu0 %v717_v59 }
  0xbf   :  { %911 = vmatpush.msrb.mxu1 %v5653_v23  ;;  %954 = vmatpush.msrb.mxu2 %v5892_v36  ;;  %v5961_v23 = vpop.permute.xlu2 %409 }
  0xc0   :  { %1055 = vmatpush.msrb.mxu3 %v1054_v14  ;;  %1090 = vmatpush.msra.mxu0 %v5775_v11  ;;  %v5953_v3 = vpop.permute.xlu0 %313  ;;  %v5955_v9 = vpop.permute.xlu1 %456  ;;  %v419_v27 = vsel %vm415_vm2, %v5923_v29, %v5961_v23 }
  0xc1   :  { %913 = vmatpush.msrb.mxu1 %v5720_v49  ;;  %956 = vmatpush.msrb.mxu2 %v5872_v58  ;;  %v8055_v49 = vand.u32 4294901760, %v5805_v41  ;;  %v6111_v40 = vand.u32 4294901760, %v419_v27 }
  0xc2   :  { %1061 = vmatpush.msrb.mxu3 %v1060_v35  ;;  %1093 = vmatpush.msra.mxu0 %v5797_v32  ;;  %v465_v32 = vsel %vm462_vm1, %v5623_v10, %v5925_v21 }
  0xc3   :  { %1191 = vmatpush.msra.mxu2 %v8054_v42  ;;  %915 = vmatpush.msrb.mxu1 %v5750_v61  ;;  %v8056_v61 = vand.u32 4294901760, %v5815_v46  ;;  %v5995_v10 = vand.u32 4294901760, %v465_v32  ;;  %v6149_v42 = vsub.f32 %v419_v27, %v6111_v40 }
  0xc4   :  { %1244 = vmatpush.msra.mxu3 %v5752_v63  ;;  %1096 = vmatpush.msra.mxu0 %v5805_v41 }
  0xc5   :  { %1195 = vmatpush.msra.mxu2 %v1016_v50  ;;  %917 = vmatpush.msrb.mxu1 %v5799_v33  ;;  %v418_v33 = vsel %vm415_vm2, %v5639_v17, %v5923_v29  ;;  %v371_v17 = vsel %vm368_vm0, %v5696_v39, %v5930_v57  ;;  %v6022_v48 = vsub.f32 %v465_v32, %v5995_v10 }
  0xc6   :  { %1246 = vmatpush.msra.mxu3 %v5767_v6  ;;  %1099 = vmatpush.msra.mxu0 %v5815_v46  ;;  %v6004_v46 = vand.u32 4294901760, %v418_v33  ;;  %v6016_v39 = vand.u32 4294901760, %v371_v17 }
  0xc7   :  { %1199 = vmatpush.msra.mxu2 %v8055_v49  ;;  %919 = vmatpush.msrb.mxu1 %v5842_v7  ;;  %v1351_v55 = vand.u32 4294901760, %v6022_v48 }
  0xc8   :  { %1248 = vmatpush.msra.mxu3 %v5779_v13  ;;  %1102 = vmatpush.msra.mxu0 %v5820_v45  ;;  %v5978_v11 = vpop.permute.xlu0 %254  ;;  %v5991_v41 = vpop.permute.xlu1 %362 }
  0xc9   :  { %1136 = vmatpush.msra.mxu1 %v5752_v63  ;;  %1203 = vmatpush.msra.mxu2 %v8056_v61  ;;  %v8057_v63 = vand.u32 4294901760, %v5820_v45  ;;  %v265_v51 = vsel %vm262_vm4, %v5777_v12, %v5978_v11  ;;  %v1352_v60 = vsub.f32 %v6022_v48, %v1351_v55  ;;  %v6156_v61 = vand.u32 4294901760, %v284_v38 }
  0xca   :  { %1250 = vmatpush.msra.mxu3 %v5789_v19  ;;  %1105 = vmatpush.msra.mxu0 %v5840_v5  ;;  %v6040_v5 = vand.u32 4294901760, %v5551_v2  ;;  %v6067_v34 = vand.u32 4294901760, %v265_v51 }
  0xcb   :  { %1138 = vmatpush.msra.mxu1 %v5767_v6  ;;  %1207 = vmatpush.msra.mxu2 %v8057_v63  ;;  %v6002_v6 = vpop.permute.xlu2 %207 }
  0xcc   :  { %1252 = vmatpush.msra.mxu3 %v5794_v31  ;;  %884 = vmatmul.f32.vlgmr.msrb.gmra.mxu0 %v5761_v4  ;;  %v218_v45 = vsel %vm215_vm5, %v5879_v26, %v6002_v6 }
  0xcd   :  { %1108 = vmatpush.msra.mxu0 %v5910_v28  ;;  %1140 = vmatpush.msra.mxu1 %v5779_v13  ;;  %v324_v13 = vsel %vm321_vm3, %v5728_v53, %v5953_v3  ;;  %v6028_v53 = vsub.f32 %v418_v33, %v6004_v46  ;;  %v6042_v7 = vand.u32 4294901760, %v218_v45 }
  0xce   :  { %1211 = vmatpush.msra.mxu2 %v1040_v15  ;;  %1254 = vmatpush.msra.mxu3 %v5822_v47  ;;  %v466_v15 = vsel %vm462_vm1, %v5925_v21, %v5955_v9 }
  0xcf   :  { %962 = vmatmul.f32.vlgmr.msrb.gmra.mxu2 %v5858_v1  ;;  %921 = vmatmul.f32.vlgmr.msrb.gmra.mxu1 %v5761_v4  ;;  %v1357_v12 = vand.u32 4294901760, %v6028_v53  ;;  %v6076_v16 = vsub.f32 %v218_v45, %v6042_v7  ;;  %v6094_v8 = vand.u32 4294901760, %v466_v15 }
  0xd0   :  { %1111 = vmatpush.msra.mxu0 %v5907_v20  ;;  %1142 = vmatpush.msra.mxu1 %v5789_v19  ;;  %v6032_v19 = vand.u32 4294901760, %v324_v13  ;;  %v6037_v50 = vpop.permute.xlu0 %315  ;;  %v6056_v59 = vpop.permute.xlu1 %160  ;;  %v6105_v20 = vsub.f32 %v265_v51, %v6067_v34 }
  0xd1   :  { %1215 = vmatpush.msra.mxu2 %v1046_v43  ;;  %1063 = vmatmul.f32.vlgmr.msrb.gmra.mxu3 %v5761_v4  ;;  %v372_v43 = vsel %vm368_vm0, %v5930_v57, %v5991_v41  ;;  %v8025_v21 = vand.u32 4294901760, %v6076_v16  ;;  %v6131_v22 = vsub.f32 %v466_v15, %v6094_v8 }
  0xd2   :  { %1256 = vmatpush.msra.mxu3 %v5894_v37  ;;  %1114 = vmatpush.msra.mxu0 %v5901_v56  ;;  %v6065_v26 = vsub.f32 %v324_v13, %v6032_v19  ;;  %v1358_v56 = vsub.f32 %v6028_v53, %v1357_v12  ;;  %v6138_v54 = vand.u32 4294901760, %v372_v43 }
  0xd3   :  { %1144 = vmatpush.msra.mxu1 %v5794_v31  ;;  %1219 = vmatpush.msra.mxu2 %v1052_v0  ;;  %v6050_v31 = vsub.f32 %v371_v17, %v6016_v39  ;;  %v6078_v25 = vpop.permute.xlu2 %113  ;;  %v8024_v17 = vand.u32 4294901760, %v6131_v22  ;;  %v1388_v45 = vsub.f32 %v6076_v16, %v8025_v21 }
  0xd4   :  { %1258 = vmatpush.msra.mxu3 %v5892_v36  ;;  %1281 = vmatpush.msrb.mxu0 %v5995_v10  ;;  %v1369_v28 = vand.u32 4294901760, %v6065_v26  ;;  %v1359_v52 = vand.u32 4294901760, %v1358_v56  ;;  %v6174_v51 = vsub.f32 %v372_v43, %v6138_v54  ;;  %v8026_v56 = vand.u32 4294901760, %v6149_v42 }
  0xd5   :  { %1146 = vmatpush.msra.mxu1 %v5822_v47  ;;  %1223 = vmatpush.msra.mxu2 %v1058_v62  ;;  %v6073_v47 = vsub.f32 %v5551_v2, %v6040_v5  ;;  %v171_v2 = vsel %vm168_vm6, %v5877_v24, %v6056_v59  ;;  %v124_v24 = vsel %vm121_vm7, %v5847_v30, %v6078_v25  ;;  %v1353_v30 = vand.u32 4294901760, %v1352_v60 }
  0xd6   :  { %1260 = vmatpush.msra.mxu3 %v5872_v58  ;;  %1283 = vmatpush.msrb.mxu0 %v6004_v46  ;;  %v6116_v0 = vand.u32 4294901760, %v171_v2  ;;  %v6128_v57 = vand.u32 4294901760, %v124_v24  ;;  %v1370_v14 = vsub.f32 %v6065_v26, %v1369_v28 }
  0xd7   :  { %1431 = vmatpush.msrb.mxu2 %v6022_v48  ;;  %1148 = vmatpush.msra.mxu1 %v5894_v37  ;;  %v1363_v37 = vand.u32 4294901760, %v6050_v31 }
  0xd8   :  { %1477 = vmatpush.msrb.mxu3 %v5995_v10  ;;  %1225 = vmatmul.f32.vlgmr.msra.gmra.mxu2 %v5761_v4  ;;  %v6122_v62 = vpop.permute.xlu0 %256  ;;  %v6152_v49 = vsub.f32 %v171_v2, %v6116_v0  ;;  %v6162_v63 = vsub.f32 %v124_v24, %v6128_v57  ;;  %v6176_v15 = vpop.permute.xlu1 %209  ;;  %v1371_v27 = vand.u32 4294901760, %v1370_v14  ;;  %v6187_v24 = vsub.f32 %v284_v38, %v6156_v61 }
  0xd9   :  { %1285 = vmatpush.msrb.mxu0 %v6016_v39  ;;  %1434 = vmatpush.msrb.mxu2 %v6028_v53  ;;  %v1364_v29 = vsub.f32 %v6050_v31, %v1363_v37  ;;  %v266_v13 = vsel %vm262_vm4, %v5978_v11, %v6122_v62  ;;  %v8029_v53 = vmov 0  }
  0xda   :  { %1150 = vmatpush.msra.mxu1 %v5892_v36  ;;  %1479 = vmatpush.msrb.mxu3 %v6004_v46  ;;  %v1375_v36 = vand.u32 4294901760, %v6073_v47  ;;  %v8028_v2 = vand.u32 4294901760, %v6152_v49  ;;  %v8027_v38 = vand.u32 4294901760, %v6162_v63 }
  0xdb   :  { %1117 = vmatmul.f32.vlgmr.msra.gmra.mxu0 %v5787_v18  ;;  %1262 = vmatmul.f32.vlgmr.msra.gmra.mxu3 %v5761_v4  ;;  %v1365_v33 = vand.u32 4294901760, %v1364_v29  ;;  %v1693_v29 = vsub.f32 %v6131_v22, %v8024_v17 }
  0xdc   :  { %1287 = vmatpush.msrb.mxu0 %v6032_v19  ;;  %1437 = vmatpush.msrb.mxu2 %v6050_v31  ;;  %v1376_v35 = vsub.f32 %v6073_v47, %v1375_v36 }
  0xdd   :  { %1152 = vmatpush.msra.mxu1 %v5872_v58  ;;  %1481 = vmatpush.msrb.mxu3 %v6016_v39  ;;  %v325_v58 = vsel %vm321_vm3, %v5953_v3, %v6037_v50  ;;  %v1381_v3 = vand.u32 4294901760, %v6105_v20 }
  0xde   :  { %1156 = vmatmul.f32.vlgmr.msra.gmra.mxu1 %v5812_v44  ;;  %1289 = vmatpush.msrb.mxu0 %v6040_v5  ;;  %v6158_v32 = vand.u32 4294901760, %v325_v58  ;;  %v1377_v60 = vand.u32 4294901760, %v1376_v35 }
  0xdf   :  { %1354 = vmatpush.msrb.mxu1 %v1353_v30  ;;  %1440 = vmatpush.msrb.mxu2 %v6065_v26  ;;  %v1382_v11 = vsub.f32 %v6105_v20, %v1381_v3  ;;  %v6192_v30 = vand.u32 4294901760, %v266_v13 }
  0xe0   :  { %1483 = vmatpush.msrb.mxu3 %v6032_v19  ;;  %1291 = vmatpush.msrb.mxu0 %v6067_v34  ;;  %v6190_v43 = vsub.f32 %v325_v58, %v6158_v32  ;;  %v6204_v58 = vpop.permute.xlu2 %162  ;;  %v6207_v14 = vpop.permute.xlu0 %115 }
  0xe1   :  { %1360 = vmatpush.msrb.mxu1 %v1359_v52  ;;  %1443 = vmatpush.msrb.mxu2 %v6073_v47  ;;  %v219_v52 = vsel %vm215_vm5, %v6002_v6, %v6176_v15  ;;  %v1383_v35 = vand.u32 4294901760, %v1382_v11  ;;  %v172_v6 = vsel %vm168_vm6, %v6056_v59, %v6204_v58  ;;  %v1699_v11 = vsub.f32 %v6149_v42, %v8026_v56 }
  0xe2   :  { %1485 = vmatpush.msrb.mxu3 %v6040_v5  ;;  %1293 = vmatpush.msrb.mxu0 %v6042_v7  ;;  %v6223_v17 = vand.u32 4294901760, %v219_v52  ;;  %v6226_v21 = vsub.f32 %v266_v13, %v6192_v30  ;;  %v1710_v48 = vand.u32 4294901760, %v6190_v43  ;;  %v1694_v59 = vand.u32 4294901760, %v1693_v29 }
  0xe3   :  { %1366 = vmatpush.msrb.mxu1 %v1365_v33  ;;  %1446 = vmatpush.msrb.mxu2 %v6105_v20  ;;  %v1389_v33 = vand.u32 4294901760, %v1388_v45  ;;  %v1716_v45 = vand.u32 4294901760, %v6187_v24  ;;  %v1400_v13 = vsub.f32 %v6162_v63, %v8027_v38  ;;  %v6239_v56 = vand.u32 4294901760, %v172_v6 }
  0xe4   :  { %1487 = vmatpush.msrb.mxu3 %v6067_v34  ;;  %1295 = vmatpush.msrb.mxu0 %v6116_v0  ;;  %v1700_v29 = vand.u32 4294901760, %v1699_v11 }
  0xe5   :  { %1372 = vmatpush.msrb.mxu1 %v1371_v27  ;;  %1449 = vmatpush.msrb.mxu2 %v6076_v16  ;;  %v1704_v27 = vand.u32 4294901760, %v6174_v51  ;;  %v1717_v38 = vsub.f32 %v6187_v24, %v1716_v45  ;;  %v1401_v11 = vand.u32 4294901760, %v1400_v13 }
  0xe6   :  { %1489 = vmatpush.msrb.mxu3 %v6042_v7  ;;  %1297 = vmatpush.msrb.mxu0 %v6128_v57 }
  0xe7   :  { %1378 = vmatpush.msrb.mxu1 %v1377_v60  ;;  %1452 = vmatpush.msrb.mxu2 %v6152_v49  ;;  %v1394_v60 = vsub.f32 %v6152_v49, %v8028_v2 }
  0xe8   :  { %1491 = vmatpush.msrb.mxu3 %v6116_v0  ;;  %1532 = vmatpush.msra.mxu0 %v1351_v55  ;;  %v125_v55 = vsel %vm121_vm7, %v6078_v25, %v6207_v14  ;;  %v1705_v25 = vsub.f32 %v6174_v51, %v1704_v27 }
  0xe9   :  { %1384 = vmatpush.msrb.mxu1 %v1383_v35  ;;  %1455 = vmatpush.msrb.mxu2 %v6162_v63  ;;  %v578_v35 = vld [vmem:[%s8012_s3] sm:$0xff]  ;;  %v6255_v2 = vand.u32 4294901760, %v125_v55 }
  0xea   :  { %1493 = vmatpush.msrb.mxu3 %v6128_v57  ;;  %1536 = vmatpush.msra.mxu0 %v1357_v12  ;;  %v1395_v12 = vand.u32 4294901760, %v1394_v60  ;;  %v1722_v60 = vand.u32 4294901760, %v6226_v21  ;;  %v1706_v31 = vand.u32 4294901760, %v1705_v25  ;;  %v8060_v25 = vand.u32 4294901760, %v6162_v63 }
  0xeb   :  { %1622 = vmatpush.msra.mxu2 %v6094_v8  ;;  %1390 = vmatpush.msrb.mxu1 %v1389_v33  ;;  %v6253_v33 = vsub.f32 %v219_v52, %v6223_v17  ;;  %v6271_v52 = vsub.f32 %v125_v55, %v6255_v2 }
  0xec   :  { %1695 = vmatpush.msra.mxu3 %v1694_v59  ;;  %5407 = vset.pattern.permute.xlu2 %v8029_v53  ;;  %v1711_v59 = vsub.f32 %v6190_v43, %v1710_v48  ;;  %v6265_v53 = vsub.f32 %v172_v6, %v6239_v56  ;;  %v1723_v6 = vsub.f32 %v6226_v21, %v1722_v60 }
  0xed   :  { %1540 = vmatpush.msra.mxu0 %v1363_v37  ;;  %1624 = vmatpush.msra.mxu2 %v6111_v40  ;;  %v1718_v37 = vand.u32 4294901760, %v1717_v38  ;;  %v1728_v26 = vand.u32 4294901760, %v6253_v33  ;;  %v1740_v55 = vand.u32 4294901760, %v6271_v52 }
  0xee   :  { %581 = vperm.xlu2 %5407, %v578_v35   ;;  %1396 = vmatpush.msrb.mxu1 %v1395_v12  ;;  %v1712_v13 = vand.u32 4294901760, %v1711_v59  ;;  %v1734_v47 = vand.u32 4294901760, %v6265_v53  ;;  %v1724_v38 = vand.u32 4294901760, %v1723_v6  ;;  %v6294_v35 = vpop.permute.xlu0 %364  ;;  %v8062_v59 = vand.u32 4294901760, %v6149_v42 }
  0xef   :  { %1701 = vmatpush.msra.mxu3 %v1700_v29  ;;  %1544 = vmatpush.msra.mxu0 %v1369_v28  ;;  %v6281_v28 = vpop.permute.xlu1 %458 }
  0xf0   :  { %1626 = vmatpush.msra.mxu2 %v6138_v54  ;;  %1402 = vmatpush.msrb.mxu1 %v1401_v11 }
  0xf1   :  { %1707 = vmatpush.msra.mxu3 %v1706_v31  ;;  %1548 = vmatpush.msra.mxu0 %v1375_v36  ;;  %v8058_v36 = vand.u32 4294901760, %v6076_v16  ;;  %v8059_v16 = vand.u32 4294901760, %v6152_v49 }
  0xf2   :  { %1585 = vmatpush.msra.mxu1 %v5995_v10  ;;  %1628 = vmatpush.msra.mxu2 %v6158_v32  ;;  %v1729_v10 = vsub.f32 %v6253_v33, %v1728_v26 }
  0xf3   :  { %1713 = vmatpush.msra.mxu3 %v1712_v13  ;;  %1552 = vmatpush.msra.mxu0 %v1381_v3  ;;  %v6310_v3 = vpop.permute.xlu2 %411 }
  0xf4   :  { %1587 = vmatpush.msra.mxu1 %v6004_v46  ;;  %1630 = vmatpush.msra.mxu2 %v6156_v61  ;;  %v1735_v46 = vsub.f32 %v6265_v53, %v1734_v47  ;;  %v1730_v20 = vand.u32 4294901760, %v1729_v10 }
  0xf5   :  { %1719 = vmatpush.msra.mxu3 %v1718_v37  ;;  %1556 = vmatpush.msra.mxu0 %v8058_v36 }
  0xf6   :  { %1589 = vmatpush.msra.mxu1 %v6016_v39  ;;  %1632 = vmatpush.msra.mxu2 %v6192_v30  ;;  %v1741_v39 = vsub.f32 %v6271_v52, %v1740_v55  ;;  %v6324_v63 = vpop.permute.xlu0 %258 }
  0xf7   :  { %1458 = vmatmul.f32.vlgmr.msrb.gmra.mxu2 %v5787_v18  ;;  %1725 = vmatpush.msra.mxu3 %v1724_v38  ;;  %v6318_v49 = vpop.permute.xlu1 %317 }
  0xf8   :  { %1560 = vmatpush.msra.mxu0 %v8059_v16  ;;  %1591 = vmatpush.msra.mxu1 %v6032_v19  ;;  %v1736_v19 = vand.u32 4294901760, %v1735_v46  ;;  %v1742_v12 = vand.u32 4294901760, %v1741_v39  ;;  %v286_v46 = vld [vmem:[#allocation4 + $0x30] sm:$0xff] }
  0xf9   :  { %1634 = vmatpush.msra.mxu2 %v6223_v17  ;;  %1303 = vmatmul.f32.vlgmr.msrb.gmra.mxu0 %v5858_v1 }
  0xfa   :  { %1497 = vmatmul.f32.vlgmr.msrb.gmra.mxu3 %v5812_v44  ;;  %1564 = vmatpush.msra.mxu0 %v8060_v25 }
  0xfb   :  { %1731 = vmatpush.msra.mxu3 %v1730_v20  ;;  %1593 = vmatpush.msra.mxu1 %v6040_v5  ;;  %v8061_v5 = vand.u32 4294901760, %v6131_v22  ;;  %v461_v29 = vpop.permute.xlu2 %460 }
  0xfc   :  { %1636 = vmatpush.msra.mxu2 %v6239_v56  ;;  %1404 = vmatmul.f32.vlgmr.msrb.gmra.mxu1 %v5761_v4 }
  0xfd   :  { %1737 = vmatpush.msra.mxu3 %v1736_v19  ;;  %1772 = vmatpush.msrb.mxu0 %v6131_v22  ;;  %v326_v22 = vsel %vm321_vm3, %v6037_v50, %v6318_v49 }
  0xfe   :  { %1595 = vmatpush.msra.mxu1 %v6067_v34  ;;  %1638 = vmatpush.msra.mxu2 %v6255_v2  ;;  %v467_v34 = vsel %vm462_vm1, %v5955_v9, %v6281_v28  ;;  %v6361_v9 = vpop.permute.xlu0 %366  ;;  %v6391_v50 = vand.u32 4294901760, %v326_v22 }
  0xff   :  { %1743 = vmatpush.msra.mxu3 %v1742_v12  ;;  %1775 = vmatpush.msrb.mxu0 %v6149_v42  ;;  %v374_v36 = vsel %vm368_vm0, %v6294_v35, %v6361_v9 }
 0x100   :  { %1873 = vmatpush.msrb.mxu2 %v8061_v5  ;;  %1597 = vmatpush.msra.mxu1 %v6042_v7  ;;  %v420_v7 = vsel %vm415_vm2, %v5961_v23, %v6310_v3  ;;  %v6359_v23 = vand.u32 4294901760, %v467_v34  ;;  %v6492_v39 = vand.u32 4294901760, %v374_v36 }
 0x101   :  { %1926 = vmatpush.msrb.mxu3 %v6094_v8  ;;  %1778 = vmatpush.msrb.mxu0 %v6174_v51  ;;  %v267_v51 = vsel %vm262_vm4, %v6122_v62, %v6324_v63 }
 0x102   :  { %1877 = vmatpush.msrb.mxu2 %v8062_v59  ;;  %1599 = vmatpush.msra.mxu1 %v6116_v0  ;;  %v414_v0 = vpop.permute.xlu1 %413 }
 0x103   :  { %1928 = vmatpush.msrb.mxu3 %v6111_v40  ;;  %1566 = vmatmul.f32.vlgmr.msra.gmra.mxu0 %v5761_v4  ;;  %v421_v37 = vsel %vm415_vm2, %v6310_v3, %v414_v0 }
 0x104   :  { %1781 = vmatpush.msrb.mxu0 %v6190_v43  ;;  %1881 = vmatpush.msrb.mxu2 %v1704_v27 }
 0x105   :  { %1601 = vmatpush.msra.mxu1 %v6128_v57  ;;  %1930 = vmatpush.msrb.mxu3 %v6138_v54  ;;  %v6354_v57 = vand.u32 4294901760, %v420_v7 }
 0x106   :  { %1603 = vmatmul.f32.vlgmr.msra.gmra.mxu1 %v5761_v4  ;;  %1784 = vmatpush.msrb.mxu0 %v6187_v24 }
 0x107   :  { %1818 = vmatpush.msrb.mxu1 %v6094_v8  ;;  %1885 = vmatpush.msrb.mxu2 %v1710_v48  ;;  %v373_v8 = vsel %vm368_vm0, %v5991_v41, %v6294_v35  ;;  %v6379_v42 = vsub.f32 %v420_v7, %v6354_v57  ;;  %v285_v41 = vld [vmem:[#allocation4 + $0x28] sm:$0xff]  ;;  %v468_v48 = vsel %vm462_vm1, %v6281_v28, %v461_v29  ;;  %v6512_v29 = vand.u32 4294901760, %v286_v46 }
 0x108   :  { %1932 = vmatpush.msrb.mxu3 %v6158_v32  ;;  %1787 = vmatpush.msrb.mxu0 %v6226_v21  ;;  %v6384_v21 = vsub.f32 %v467_v34, %v6359_v23 }
 0x109   :  { %1820 = vmatpush.msrb.mxu1 %v6111_v40  ;;  %1889 = vmatpush.msrb.mxu2 %v1716_v45  ;;  %v6371_v40 = vpop.permute.xlu2 %211  ;;  %v2039_v43 = vand.u32 4294901760, %v6379_v42  ;;  %v6419_v45 = vsub.f32 %v326_v22, %v6391_v50 }
 0x10a   :  { %1934 = vmatpush.msrb.mxu3 %v6156_v61  ;;  %1790 = vmatpush.msrb.mxu0 %v6253_v33  ;;  %v6403_v24 = vpop.permute.xlu1 %164  ;;  %v2033_v27 = vand.u32 4294901760, %v6384_v21  ;;  %v220_v62 = vsel %vm215_vm5, %v6176_v15, %v6371_v40  ;;  %v6427_v33 = vpop.permute.xlu0 %117 }
 0x10b   :  { %1822 = vmatpush.msrb.mxu1 %v6138_v54  ;;  %1893 = vmatpush.msrb.mxu2 %v1722_v60  ;;  %v6386_v54 = vand.u32 4294901760, %v373_v8  ;;  %v173_v60 = vsel %vm168_vm6, %v6204_v58, %v6403_v24  ;;  %v2040_v11 = vsub.f32 %v6379_v42, %v2039_v43  ;;  %v126_v6 = vsel %vm121_vm7, %v6207_v14, %v6427_v33 }
 0x10c   :  { %1644 = vmatmul.f32.vlgmr.msra.gmra.mxu2 %v5858_v1  ;;  %1936 = vmatpush.msrb.mxu3 %v6192_v30  ;;  %v2034_v31 = vsub.f32 %v6384_v21, %v2033_v27  ;;  %v6480_v10 = vand.u32 4294901760, %v126_v6 }
 0x10d   :  { %1793 = vmatpush.msrb.mxu0 %v6265_v53  ;;  %1824 = vmatpush.msrb.mxu1 %v6158_v32  ;;  %v6398_v32 = vand.u32 4294901760, %v285_v41  ;;  %v6425_v53 = vand.u32 4294901760, %v267_v51 }
 0x10e   :  { %1897 = vmatpush.msrb.mxu2 %v1728_v26  ;;  %1745 = vmatmul.f32.vlgmr.msra.gmra.mxu3 %v5761_v4  ;;  %v2051_v26 = vand.u32 4294901760, %v6419_v45  ;;  %v6517_v7 = vsub.f32 %v126_v6, %v6480_v10 }
 0x10f   :  { %1938 = vmatpush.msrb.mxu3 %v6223_v17  ;;  %1796 = vmatpush.msrb.mxu0 %v6271_v52  ;;  %v6432_v15 = vsub.f32 %v285_v41, %v6398_v32  ;;  %v6452_v52 = vand.u32 4294901760, %v468_v48  ;;  %v6463_v28 = vsub.f32 %v267_v51, %v6425_v53  ;;  %v6526_v41 = vsub.f32 %v374_v36, %v6492_v39 }
 0x110   :  { %1826 = vmatpush.msrb.mxu1 %v6156_v61  ;;  %1901 = vmatpush.msrb.mxu2 %v1734_v47  ;;  %v6410_v61 = vsub.f32 %v373_v8, %v6386_v54  ;;  %v6465_v47 = vand.u32 4294901760, %v173_v60  ;;  %v2052_v19 = vsub.f32 %v6419_v45, %v2051_v26  ;;  %v2081_v6 = vand.u32 4294901760, %v6517_v7 }
 0x111   :  { %1940 = vmatpush.msrb.mxu3 %v6239_v56  ;;  %1963 = vmatpush.msra.mxu0 %v6359_v23  ;;  %v2057_v14 = vand.u32 4294901760, %v6432_v15  ;;  %v6488_v16 = vsub.f32 %v468_v48, %v6452_v52  ;;  %v2063_v12 = vand.u32 4294901760, %v6463_v28 }
 0x112   :  { %1828 = vmatpush.msrb.mxu1 %v6192_v30  ;;  %1905 = vmatpush.msrb.mxu2 %v1740_v55  ;;  %v320_v30 = vpop.permute.xlu2 %319  ;;  %v2045_v58 = vand.u32 4294901760, %v6410_v61  ;;  %v2035_v55 = vand.u32 4294901760, %v2034_v31  ;;  %v261_v3 = vpop.permute.xlu1 %260  ;;  %v6497_v25 = vsub.f32 %v173_v60, %v6465_v47 }
 0x113   :  { %1942 = vmatpush.msrb.mxu3 %v6255_v2  ;;  %1965 = vmatpush.msra.mxu0 %v6354_v57  ;;  %v327_v13 = vsel %vm321_vm3, %v6318_v49, %v320_v30  ;;  %v2058_v49 = vsub.f32 %v6432_v15, %v2057_v14  ;;  %v268_v59 = vsel %vm262_vm4, %v6324_v63, %v261_v3  ;;  %v2374_v8 = vand.u32 4294901760, %v6488_v16 }
 0x114   :  { %2113 = vmatpush.msra.mxu2 %v6384_v21  ;;  %1830 = vmatpush.msrb.mxu1 %v6223_v17  ;;  %v6445_v17 = vand.u32 4294901760, %v220_v62  ;;  %v2046_v35 = vsub.f32 %v6410_v61, %v2045_v58  ;;  %v6490_v20 = vand.u32 4294901760, %v327_v13  ;;  %v2053_v63 = vand.u32 4294901760, %v2052_v19 }
 0x115   :  { %2159 = vmatpush.msra.mxu3 %v6359_v23  ;;  %1907 = vmatmul.f32.vlgmr.msrb.gmra.mxu2 %v5761_v4  ;;  %v2059_v51 = vand.u32 4294901760, %v2058_v49  ;;  %v2075_v48 = vand.u32 4294901760, %v6497_v25  ;;  %v6535_v30 = vand.u32 4294901760, %v268_v59 }
 0x116   :  { %1967 = vmatpush.msra.mxu0 %v6386_v54  ;;  %2116 = vmatpush.msra.mxu2 %v6379_v42  ;;  %v6478_v38 = vsub.f32 %v220_v62, %v6445_v17  ;;  %v2047_v0 = vand.u32 4294901760, %v2046_v35  ;;  %v6523_v22 = vsub.f32 %v327_v13, %v6490_v20  ;;  %v2064_v62 = vsub.f32 %v6463_v28, %v2063_v12 }
 0x117   :  { %1832 = vmatpush.msrb.mxu1 %v6239_v56  ;;  %2161 = vmatpush.msra.mxu3 %v6354_v57  ;;  %v6473_v56 = vand.u32 4294901760, %v421_v37  ;;  %v2076_v19 = vsub.f32 %v6497_v25, %v2075_v48  ;;  %v6566_v49 = vsub.f32 %v268_v59, %v6535_v30  ;;  %v2082_v59 = vsub.f32 %v6517_v7, %v2081_v6 }
 0x118   :  { %1799 = vmatmul.f32.vlgmr.msrb.gmra.mxu0 %v5787_v18  ;;  %1944 = vmatmul.f32.vlgmr.msrb.gmra.mxu3 %v5761_v4  ;;  %v2069_v9 = vand.u32 4294901760, %v6478_v38  ;;  %v2392_v35 = vand.u32 4294901760, %v6523_v22 }
 0x119   :  { %1969 = vmatpush.msra.mxu0 %v6391_v50  ;;  %2119 = vmatpush.msra.mxu2 %v6410_v61  ;;  %v6508_v5 = vsub.f32 %v421_v37, %v6473_v56  ;;  %v6543_v37 = vsub.f32 %v286_v46, %v6512_v29 }
 0x11a   :  { %1834 = vmatpush.msrb.mxu1 %v6255_v2  ;;  %2163 = vmatpush.msra.mxu3 %v6386_v54  ;;  %v2041_v2 = vand.u32 4294901760, %v2040_v11  ;;  %v214_v34 = vpop.permute.xlu2 %213  ;;  %v167_v11 = vpop.permute.xlu0 %166  ;;  %v2070_v13 = vsub.f32 %v6478_v38, %v2069_v9 }
 0x11b   :  { %1838 = vmatmul.f32.vlgmr.msrb.gmra.mxu1 %v5812_v44  ;;  %1971 = vmatpush.msra.mxu0 %v6398_v32  ;;  %v221_v60 = vsel %vm215_vm5, %v6371_v40, %v214_v34  ;;  %v2380_v31 = vand.u32 4294901760, %v6508_v5  ;;  %v2375_v40 = vsub.f32 %v6488_v16, %v2374_v8  ;;  %v120_v36 = vpop.permute.xlu1 %119  ;;  %v174_v3 = vsel %vm168_vm6, %v6403_v24, %v167_v11 }
 0x11c   :  { %2036 = vmatpush.msra.mxu1 %v2035_v55  ;;  %2122 = vmatpush.msra.mxu2 %v6419_v45  ;;  %v2386_v55 = vand.u32 4294901760, %v6526_v41  ;;  %v6557_v46 = vand.u32 4294901760, %v221_v60  ;;  %v2398_v34 = vand.u32 4294901760, %v6543_v37  ;;  %v2393_v11 = vsub.f32 %v6523_v22, %v2392_v35 }
 0x11d   :  { %2165 = vmatpush.msra.mxu3 %v6391_v50  ;;  %1973 = vmatpush.msra.mxu0 %v6425_v53  ;;  %v2381_v24 = vsub.f32 %v6508_v5, %v2380_v31  ;;  %v2376_v21 = vand.u32 4294901760, %v2375_v40  ;;  %v2083_v40 = vand.u32 4294901760, %v2082_v59 }
 0x11e   :  { %2042 = vmatpush.msra.mxu1 %v2041_v2  ;;  %2125 = vmatpush.msra.mxu2 %v6432_v15  ;;  %v2065_v2 = vand.u32 4294901760, %v2064_v62  ;;  %v2077_v62 = vand.u32 4294901760, %v2076_v19 }
 0x11f   :  { %2167 = vmatpush.msra.mxu3 %v6398_v32  ;;  %1975 = vmatpush.msra.mxu0 %v6445_v17  ;;  %v2382_v42 = vand.u32 4294901760, %v2381_v24 }
 0x120   :  { %2048 = vmatpush.msra.mxu1 %v2047_v0  ;;  %2128 = vmatpush.msra.mxu2 %v6463_v28  ;;  %v127_v0 = vsel %vm121_vm7, %v6427_v33, %v120_v36  ;;  %v6590_v33 = vsub.f32 %v221_v60, %v6557_v46  ;;  %v2404_v60 = vand.u32 4294901760, %v6566_v49 }
 0x121   :  { %2169 = vmatpush.msra.mxu3 %v6425_v53  ;;  %1977 = vmatpush.msra.mxu0 %v6465_v47 }
 0x122   :  { %2054 = vmatpush.msra.mxu1 %v2053_v63  ;;  %2131 = vmatpush.msra.mxu2 %v6478_v38  ;;  %v2071_v63 = vand.u32 4294901760, %v2070_v13  ;;  %v6596_v13 = vand.u32 4294901760, %v127_v0  ;;  %v2410_v45 = vand.u32 4294901760, %v6590_v33 }
 0x123   :  { %2171 = vmatpush.msra.mxu3 %v6445_v17  ;;  %1979 = vmatpush.msra.mxu0 %v6480_v10 }
 0x124   :  { %2060 = vmatpush.msra.mxu1 %v2059_v51  ;;  %2134 = vmatpush.msra.mxu2 %v6497_v25  ;;  %v6581_v51 = vand.u32 4294901760, %v174_v3 }
 0x125   :  { %2173 = vmatpush.msra.mxu3 %v6465_v47  ;;  %2214 = vmatpush.msrb.mxu0 %v2033_v27  ;;  %v2387_v27 = vsub.f32 %v6526_v41, %v2386_v55 }
 0x126   :  { %2066 = vmatpush.msra.mxu1 %v2065_v2  ;;  %2137 = vmatpush.msra.mxu2 %v6517_v7  ;;  %v6606_v36 = vsub.f32 %v174_v3, %v6581_v51  ;;  %v6612_v2 = vsub.f32 %v127_v0, %v6596_v13  ;;  %v2405_v3 = vsub.f32 %v6566_v49, %v2404_v60 }
 0x127   :  { %2175 = vmatpush.msra.mxu3 %v6480_v10  ;;  %2218 = vmatpush.msrb.mxu0 %v2039_v43  ;;  %v2399_v43 = vsub.f32 %v6543_v37, %v2398_v34  ;;  %v2388_v61 = vand.u32 4294901760, %v2387_v27 }
 0x128   :  { %2304 = vmatpush.msrb.mxu2 %v6452_v52  ;;  %2072 = vmatpush.msra.mxu1 %v2071_v63  ;;  %v2406_v15 = vand.u32 4294901760, %v2405_v3  ;;  %v50_v3 = vld [vmem:[%s8010_s1] sm:$0x3f] }
 0x129   :  { %2377 = vmatpush.msrb.mxu3 %v2376_v21  ;;  %2222 = vmatpush.msrb.mxu0 %v2045_v58  ;;  %v2394_v58 = vand.u32 4294901760, %v2393_v11  ;;  %v2400_v19 = vand.u32 4294901760, %v2399_v43 }
 0x12a   :  { %2306 = vmatpush.msrb.mxu2 %v6473_v56  ;;  %2078 = vmatpush.msra.mxu1 %v2077_v62 }
 0x12b   :  { %2383 = vmatpush.msrb.mxu3 %v2382_v42  ;;  %2226 = vmatpush.msrb.mxu0 %v2051_v26  ;;  %v2416_v26 = vand.u32 4294901760, %v6606_v36 }
 0x12c   :  { %2308 = vmatpush.msrb.mxu2 %v6492_v39  ;;  %2084 = vmatpush.msra.mxu1 %v2083_v40 }
 0x12d   :  { %2389 = vmatpush.msrb.mxu3 %v2388_v61  ;;  %2230 = vmatpush.msrb.mxu0 %v2057_v14  ;;  %v2422_v14 = vand.u32 4294901760, %v6612_v2 }
 0x12e   :  { %2267 = vmatpush.msrb.mxu1 %v6359_v23  ;;  %2310 = vmatpush.msrb.mxu2 %v6490_v20  ;;  %v2411_v23 = vsub.f32 %v6590_v33, %v2410_v45 }
 0x12f   :  { %2395 = vmatpush.msrb.mxu3 %v2394_v58  ;;  %2234 = vmatpush.msrb.mxu0 %v2063_v12 }
 0x130   :  { %2269 = vmatpush.msrb.mxu1 %v6354_v57  ;;  %2312 = vmatpush.msrb.mxu2 %v6512_v29  ;;  %v2417_v57 = vsub.f32 %v6606_v36, %v2416_v26  ;;  %v2412_v28 = vand.u32 4294901760, %v2411_v23  ;;  %v6715_v23 = vperm.slane %v50_v3, 1 }
 0x131   :  { %2401 = vmatpush.msrb.mxu3 %v2400_v19  ;;  %2238 = vmatpush.msrb.mxu0 %v2069_v9 }
 0x132   :  { %2271 = vmatpush.msrb.mxu1 %v6386_v54  ;;  %2314 = vmatpush.msrb.mxu2 %v6535_v30  ;;  %v2423_v54 = vsub.f32 %v6612_v2, %v2422_v14  ;;  %v2418_v38 = vand.u32 4294901760, %v2417_v57 }
 0x133   :  { %2140 = vmatmul.f32.vlgmr.msra.gmra.mxu2 %v5787_v18  ;;  %2407 = vmatpush.msrb.mxu3 %v2406_v15 }
 0x134   :  { %2242 = vmatpush.msrb.mxu0 %v2075_v48  ;;  %2273 = vmatpush.msrb.mxu1 %v6391_v50  ;;  %v2424_v50 = vand.u32 4294901760, %v2423_v54  ;;  %v6721_v54 = vperm.slane %v50_v3, 0 }
 0x135   :  { %2316 = vmatpush.msrb.mxu2 %v6557_v46  ;;  %1985 = vmatmul.f32.vlgmr.msra.gmra.mxu0 %v5858_v1 }
 0x136   :  { %2179 = vmatmul.f32.vlgmr.msra.gmra.mxu3 %v5812_v44  ;;  %2246 = vmatpush.msrb.mxu0 %v2081_v6 }
 0x137   :  { %2413 = vmatpush.msrb.mxu3 %v2412_v28  ;;  %2275 = vmatpush.msrb.mxu1 %v6398_v32 }
 0x138   :  { %2318 = vmatpush.msrb.mxu2 %v6581_v51  ;;  %2086 = vmatmul.f32.vlgmr.msra.gmra.mxu1 %v5761_v4 }
 0x139   :  { %2419 = vmatpush.msrb.mxu3 %v2418_v38  ;;  %2454 = vmatpush.msra.mxu0 %v6488_v16 }
 0x13a   :  { %2277 = vmatpush.msrb.mxu1 %v6425_v53  ;;  %2320 = vmatpush.msrb.mxu2 %v6596_v13  ;;  %v777_v53 = vpop.f32.mrf.mxu2 }
 0x13b   :  { %2425 = vmatpush.msrb.mxu3 %v2424_v50  ;;  %2457 = vmatpush.msra.mxu0 %v6508_v5  ;;  %v723_v32 = vpop.f32.mrf.mxu1 }
 0x13c   :  { %2555 = vmatpush.msra.mxu2 %v2374_v8  ;;  %2279 = vmatpush.msrb.mxu1 %v6445_v17 }
 0x13d   :  { %2608 = vmatpush.msra.mxu3 %v6452_v52  ;;  %2460 = vmatpush.msra.mxu0 %v6526_v41 }
 0x13e   :  { %2559 = vmatpush.msra.mxu2 %v2380_v31  ;;  %2281 = vmatpush.msrb.mxu1 %v6465_v47  ;;  %v816_v17 = vpop.f32.mrf.mxu3 }
 0x13f   :  { %2326 = vmatmul.f32.vlgmr.msrb.gmra.mxu2 %v5858_v1  ;;  %2610 = vmatpush.msra.mxu3 %v6473_v56  ;;  %v8063_v1 = vmov 0  }
 0x140   :  { %2248 = vmatmul.f32.vlgmr.msrb.gmra.mxu0 %v5761_v4  ;;  %2563 = vmatpush.msra.mxu2 %v2386_v55 }
 0x141   :  { %2463 = vmatpush.msra.mxu0 %v6523_v22  ;;  %2283 = vmatpush.msrb.mxu1 %v6480_v10 }
 0x142   :  { %2427 = vmatmul.f32.vlgmr.msrb.gmra.mxu3 %v5761_v4  ;;  %2285 = vmatmul.f32.vlgmr.msrb.gmra.mxu1 %v5761_v4 }
 0x143   :  { %2612 = vmatpush.msra.mxu3 %v6492_v39  ;;  %2466 = vmatpush.msra.mxu0 %v6543_v37 }
 0x144   :  { %2500 = vmatpush.msra.mxu1 %v6452_v52  ;;  %2567 = vmatpush.msra.mxu2 %v2392_v35 }
 0x145   :  { %2614 = vmatpush.msra.mxu3 %v6490_v20  ;;  %2469 = vmatpush.msra.mxu0 %v6566_v49 }
 0x146   :  { %2502 = vmatpush.msra.mxu1 %v6473_v56  ;;  %2571 = vmatpush.msra.mxu2 %v2398_v34 }
 0x147   :  { %2616 = vmatpush.msra.mxu3 %v6512_v29  ;;  %2472 = vmatpush.msra.mxu0 %v6590_v33 }
 0x148   :  { %2504 = vmatpush.msra.mxu1 %v6492_v39  ;;  %2575 = vmatpush.msra.mxu2 %v2404_v60  ;;  %v582_v41 = vpop.permute.xlu2 %581 }
 0x149   :  { %2618 = vmatpush.msra.mxu3 %v6535_v30  ;;  %2475 = vmatpush.msra.mxu0 %v6606_v36 }
 0x14a   :  { %2506 = vmatpush.msra.mxu1 %v6490_v20  ;;  %2579 = vmatpush.msra.mxu2 %v2410_v45 }
 0x14b   :  { %2620 = vmatpush.msra.mxu3 %v6557_v46  ;;  %2478 = vmatpush.msra.mxu0 %v6612_v2 }
 0x14c   :  { %2508 = vmatpush.msra.mxu1 %v6512_v29  ;;  %2583 = vmatpush.msra.mxu2 %v2416_v26  ;;  %v922_v47 = vpop.f32.mrf.mxu1 }
 0x14d   :  { %2481 = vmatmul.f32.vlgmr.msra.gmra.mxu0 %v5787_v18  ;;  %2622 = vmatpush.msra.mxu3 %v6581_v51  ;;  %v622_v18 = vpop.f32.mrf.mxu0 }
 0x14e   :  { %2510 = vmatpush.msra.mxu1 %v6535_v30  ;;  %2587 = vmatpush.msra.mxu2 %v2422_v14  ;;  %v623_v31 = vadd.f32 %v622_v18, %v582_v41 }
 0x14f   :  { %2624 = vmatpush.msra.mxu3 %v6596_v13  ;;  %2589 = vmatmul.f32.vlgmr.msra.gmra.mxu2 %v5761_v4 }
 0x150   :  { %2512 = vmatpush.msra.mxu1 %v6557_v46  ;;  %2626 = vmatmul.f32.vlgmr.msra.gmra.mxu3 %v5761_v4  ;;  %v724_v49 = vadd.f32 %v723_v32, %v623_v31 }
 0x151   :  { %5408 = vset.pattern.permute.xlu0 %v8063_v1  ;;  %v6725_v1 = vperm.slane %v50_v3, 2 }
 0x152   :  { %2514 = vmatpush.msra.mxu1 %v6581_v51  ;;  %v963_v56 = vpop.f32.mrf.mxu2  ;;  %v778_v21 = vadd.f32 %v777_v53, %v724_v49 }
 0x153   :  { %v964_v48 = vadd.f32 %v963_v56, %v582_v41  ;;  %v6731_v56 = vperm.slane %v50_v3, 3 }
 0x154   :  { %2516 = vmatpush.msra.mxu1 %v6596_v13  ;;  %v1064_v10 = vpop.f32.mrf.mxu3  ;;  %v5475_v13 = vmov 0.0   ;;  %v817_v43 = vadd.f32 %v816_v17, %v778_v21 }
 0x155   :  { %2520 = vmatmul.f32.vlgmr.msra.gmra.mxu1 %v5812_v44  ;;  %v885_v52 = vpop.f32.mrf.mxu0  ;;  %v1065_v55 = vadd.f32 %v1064_v10, %v964_v48  ;;  %2896 = vrot.lane.b32.xlu2 %v5475_v13, %s5470_s21  ;;  %8064 = vst [vmem:[#allocation10_spill] sm:$0xff] %v6731_v56 }
 0x156   :  { %v886_v2 = vadd.f32 %v885_v52, %v817_v43 }
 0x158   :  { %v6719_v28 = vadd.f32 %v922_v47, %v886_v2 }
 0x15a   :  { %v2643_v47 = vmul.f32 %v6721_v54, %v6719_v28 }
 0x15b   :  { %v1157_v20 = vpop.f32.mrf.mxu1  ;;  %v1226_v39 = vpop.f32.mrf.mxu2 }
 0x15d   :  { %v1118_v16 = vpop.f32.mrf.mxu0  ;;  %2850 = vrot.lane.b32.xlu2 %v5475_v13, %s5471_s22 }
 0x15e   :  { %v1263_v25 = vpop.f32.mrf.mxu3  ;;  %v1119_v63 = vadd.f32 %v1118_v16, %v1065_v55  ;;  %v6751_v55 = vperm.slane %v50_v3, 5 }
 0x160   :  { %v1158_v11 = vadd.f32 %v1157_v20, %v1119_v63  ;;  %8066 = vst [vmem:[#allocation12_spill] sm:$0xff] %v6751_v55 }
 0x162   :  { %v1227_v61 = vadd.f32 %v1226_v39, %v1158_v11  ;;  %v6739_v39 = vperm.slane %v50_v3, 4 }
 0x164   :  { %v6713_v15 = vadd.f32 %v1263_v25, %v1227_v61  ;;  %8065 = vst [vmem:[#allocation11_spill] sm:$0xff] %v6739_v39 }
 0x165   :  { %2804 = vrot.lane.b32.xlu2 %v5475_v13, %s5472_s23 }
 0x166   :  { %v2644_v53 = vmul.f32 %v6715_v23, %v6713_v15 }
 0x168   :  { %v2657_v25 = vmul.f32 %v2644_v53, %v6713_v15 }
 0x16d   :  { %2758 = vrot.lane.b32.xlu2 %v5475_v13, %s5473_s24 }
 0x175   :  { %3012 = vrot.lane.b32.xlu2 %v5475_v13, %s5468_s20 }
 0x176   :  { %v1304_v4 = vpop.f32.mrf.mxu0 }
 0x177   :  { %v1305_v6 = vadd.f32 %v1304_v4, %v582_v41 }
 0x179   :  { %v1405_v12 = vpop.f32.mrf.mxu1 }
 0x17a   :  { %v1459_v5 = vpop.f32.mrf.mxu2  ;;  %v1406_v34 = vadd.f32 %v1405_v12, %v1305_v6 }
 0x17c   :  { %v1460_v33 = vadd.f32 %v1459_v5, %v1406_v34 }
 0x17d   :  { %v1498_v29 = vpop.f32.mrf.mxu3 }
 0x17e   :  { %v1499_v40 = vadd.f32 %v1498_v29, %v1460_v33  ;;  %v2656_v29 = vmul.f32 %v2643_v47, %v6719_v28 }
 0x180   :  { %v1567_v7 = vpop.f32.mrf.mxu0  ;;  %v2662_v48 = vadd.f32 %v2657_v25, %v2656_v29 }
 0x181   :  { %v1568_v45 = vadd.f32 %v1567_v7, %v1499_v40 }
 0x183   :  { %v1604_v9 = vpop.f32.mrf.mxu1 }
 0x184   :  { %v6723_v50 = vadd.f32 %v1604_v9, %v1568_v45  ;;  %v2674_v45 = vld [vmem:[%s8013_s4] sm:$0xff] }
 0x186   :  { %v2645_v16 = vmul.f32 %v6725_v1, %v6723_v50 }
 0x18f   :  { %v1645_v8 = vpop.f32.mrf.mxu2 }
 0x190   :  { %v1646_v46 = vadd.f32 %v1645_v8, %v582_v41  ;;  %v2649_v8 = vadd.f32 %v2644_v53, %v2643_v47 }
 0x191   :  { %v1746_v44 = vpop.f32.mrf.mxu3 }
 0x192   :  { %v1747_v51 = vadd.f32 %v1746_v44, %v1646_v46  ;;  %v2658_v44 = vmul.f32 %v2645_v16, %v6723_v50  ;;  %v2650_v31 = vadd.f32 %v2649_v8, %v2645_v16 }
 0x195   :  { %v1800_v22 = vpop.f32.mrf.mxu0 }
 0x196   :  { %v1801_v42 = vadd.f32 %v1800_v22, %v1747_v51 }
 0x198   :  { %v1839_v30 = vpop.f32.mrf.mxu1  ;;  %v1908_v37 = vpop.f32.mrf.mxu2 }
 0x199   :  { %v1840_v58 = vadd.f32 %v1839_v30, %v1801_v42 }
 0x19b   :  { %v1945_v24 = vpop.f32.mrf.mxu3  ;;  %v1909_v57 = vadd.f32 %v1908_v37, %v1840_v58 }
 0x19d   :  { %v6729_v52 = vadd.f32 %v1945_v24, %v1909_v57 }
 0x19f   :  { %v2646_v12 = vmul.f32 %v6731_v56, %v6729_v52 }
 0x1a1   :  { %v2659_v37 = vmul.f32 %v2646_v12, %v6729_v52  ;;  %v2651_v24 = vadd.f32 %v2650_v31, %v2646_v12 }
 0x1af   :  { %v6773_v53 = vpop.permute.xlu2 %2896 }
 0x1b2   :  { %v1986_v35 = vpop.f32.mrf.mxu0 }
 0x1b3   :  { %v1987_v0 = vadd.f32 %v1986_v35, %v582_v41  ;;  %v2663_v35 = vadd.f32 %v2662_v48, %v2658_v44 }
 0x1b5   :  { %v2087_v59 = vpop.f32.mrf.mxu1  ;;  %v2664_v63 = vadd.f32 %v2663_v35, %v2659_v37 }
 0x1b6   :  { %v2141_v27 = vpop.f32.mrf.mxu2  ;;  %v2088_v62 = vadd.f32 %v2087_v59, %v1987_v0 }
 0x1b8   :  { %v2142_v36 = vadd.f32 %v2141_v27, %v2088_v62 }
 0x1b9   :  { %v2180_v60 = vpop.f32.mrf.mxu3 }
 0x1ba   :  { %v2181_v26 = vadd.f32 %v2180_v60, %v2142_v36 }
 0x1bd   :  { %v2249_v19 = vpop.f32.mrf.mxu0 }
 0x1be   :  { %v2250_v18 = vadd.f32 %v2249_v19, %v2181_v26 }
 0x1bf   :  { %v2286_v38 = vpop.f32.mrf.mxu1 }
 0x1c0   :  { %v6737_v20 = vadd.f32 %v2286_v38, %v2250_v18  ;;  %v2687_v18 = vld [vmem:[%s8014_s5] sm:$0xff] }
 0x1c2   :  { %v2327_v14 = vpop.f32.mrf.mxu2  ;;  %v2647_v22 = vmul.f32 %v6739_v39, %v6737_v20 }
 0x1c3   :  { %v2328_v32 = vadd.f32 %v2327_v14, %v582_v41 }
 0x1c4   :  { %v2660_v46 = vmul.f32 %v2647_v22, %v6737_v20  ;;  %v2652_v0 = vadd.f32 %v2651_v24, %v2647_v22 }
 0x1c5   :  { %v2428_v17 = vpop.f32.mrf.mxu3 }
 0x1c6   :  { %v2429_v4 = vadd.f32 %v2428_v17, %v2328_v32  ;;  %v2665_v21 = vadd.f32 %v2664_v63, %v2660_v46  ;;  %v6775_v17 = vpop.permute.xlu2 %2850 }
 0x1ca   :  { %v2482_v10 = vpop.f32.mrf.mxu0 }
 0x1cb   :  { %v2483_v5 = vadd.f32 %v2482_v10, %v2429_v4 }
 0x1ce   :  { %v6777_v47 = vpop.permute.xlu2 %2804 }
 0x1d2   :  { %v2521_v7 = vpop.f32.mrf.mxu1  ;;  %v2590_v9 = vpop.f32.mrf.mxu2 }
 0x1d3   :  { %v2522_v41 = vadd.f32 %v2521_v7, %v2483_v5  ;;  %v2627_v30 = vpop.f32.mrf.mxu3 }
 0x1d5   :  { %v2591_v6 = vadd.f32 %v2590_v9, %v2522_v41 }
 0x1d6   :  { %v6779_v10 = vpop.permute.xlu2 %2758 }
 0x1d7   :  { %v6754_v49 = vadd.f32 %v2627_v30, %v2591_v6 }
 0x1d9   :  { %v2648_v34 = vmul.f32 %v6751_v55, %v6754_v49 }
 0x1db   :  { %v2653_v59 = vadd.f32 %v2652_v0, %v2648_v34  ;;  %v2661_v51 = vmul.f32 %v2648_v34, %v6754_v49 }
 0x1dd   :  { %2654 = vadd.xlane.f32.xlu0 %v2653_v59  ;;  %v2666_v27 = vadd.f32 %v2665_v21, %v2661_v51 }
 0x1de   :  { %v6781_v16 = vpop.permute.xlu2 %3012 }
 0x1df   :  { %2667 = vadd.xlane.f32.xlu1 %v2666_v27 }
 0x1f1   :  { %3104 = vrot.lane.b32.xlu0 %v5475_v13, %s5466_s18 }
 0x1f8   :  { %3058 = vrot.lane.b32.xlu1 %v5475_v13, %s5467_s19 }
 0x250   :  { %v2655_v33 = vpop.xlane.xlu0 %2654 }
 0x251   :  { %v2669_v62 = vmul.f32 0.001953125, %v2655_v33 }
 0x252   :  { %v2668_v11 = vpop.xlane.xlu1 %2667 }
 0x253   :  { %v2671_v42 = vmul.f32 %v2669_v62, %v2669_v62  ;;  %v2670_v43 = vmul.f32 0.001953125, %v2668_v11 }
 0x255   :  { %v2672_v60 = vsub.f32 %v2670_v43, %v2671_v42 }
 0x257   :  { %v2673_v40 = vmax.f32 %v2672_v60, 0.0 }
 0x259   :  { %v2675_v36 = vadd.f32 1e-05, %v2673_v40 }
 0x25b   :  { %5409 = vrsqrt.f32 %v2675_v36  ;;  %vm2682_vm9 = vweird.f32 %v2675_v36 }
 0x261   :  { %v5410_v61 = vpop.eup %5409 }
 0x262   :  { %v2677_v58 = vmul.f32 %v5410_v61, %v2675_v36  ;;  %vm2683_vm8 = vweird.f32 %v5410_v61 }
 0x263   :  { %vm2684_vm10 = vmor %vm2682_vm9, %vm2683_vm8  ;;  %v6898_v40 = vpop.permute.xlu0 %3104 }
 0x264   :  { %v2678_v2 = vmul.f32 %v5410_v61, %v2677_v58 }
 0x266   :  { %v2679_v19 = vmul.f32 0.5, %v2678_v2 }
 0x268   :  { %v2680_v3 = vsub.f32 1.5, %v2679_v19 }
 0x26a   :  { %v2681_v26 = vmul.f32 %v5410_v61, %v2680_v3  ;;  %v6903_v36 = vpop.permute.xlu1 %3058 }
 0x26c   :  { %v2685_v14 = vsel %vm2684_vm10, %v5410_v61, %v2681_v26 }
 0x26d   :  { %v2686_v57 = vmul.f32 %v2685_v14, %v2674_v45 }
 0x26f   :  { %2692 = vperm.xlu2 %5407, %v2686_v57   ;;  %v2688_v38 = vmul.f32 %v2686_v57, %v2669_v62 }
 0x271   :  { %v2689_v32 = vsub.f32 %v2687_v18, %v2688_v38 }
 0x277   :  { %2703 = vperm.xlu2 %5407, %v2689_v32  }
 0x2c9   :  { %v2693_v4 = vpop.permute.xlu2 %2692 }
 0x2ca   :  { %v2695_v25 = vmul.f32 %v2693_v4, %v6719_v28  ;;  %v2696_v12 = vmul.f32 %v2693_v4, %v6713_v15  ;;  %v2697_v9 = vmul.f32 %v2693_v4, %v6723_v50  ;;  %v2698_v37 = vmul.f32 %v2693_v4, %v6729_v52 }
 0x2cb   :  { %v2699_v46 = vmul.f32 %v2693_v4, %v6737_v20  ;;  %v2700_v20 = vmul.f32 %v2693_v4, %v6754_v49 }
 0x2d1   :  { %v2704_v5 = vpop.permute.xlu2 %2703 }
 0x2d2   :  { %v2706_v29 = vadd.f32 %v2704_v5, %v2695_v25  ;;  %v2707_v7 = vadd.f32 %v2704_v5, %v2696_v12  ;;  %v2708_v8 = vadd.f32 %v2704_v5, %v2697_v9  ;;  %v2709_v6 = vadd.f32 %v2704_v5, %v2698_v37 }
 0x2d3   :  { %v2710_v24 = vadd.f32 %v2704_v5, %v2699_v46  ;;  %v2711_v51 = vadd.f32 %v2704_v5, %v2700_v20 }
 0x2d4   :  { %vm2712_vm11 = vcmp.gt.f32.partialorder %v2706_v29, 0.0  ;;  %vm2713_vm12 = vcmp.gt.f32.partialorder %v2707_v7, 0.0  ;;  %v2718_v44 = vmul.f32 0.01, %v2706_v29  ;;  %v2719_v22 = vmul.f32 0.01, %v2707_v7 }
 0x2d5   :  { %v2720_v31 = vmul.f32 0.01, %v2708_v8  ;;  %vm2714_vm13 = vcmp.gt.f32.partialorder %v2708_v8, 0.0  ;;  %v2721_v35 = vmul.f32 0.01, %v2709_v6  ;;  %vm2715_vm14 = vcmp.gt.f32.partialorder %v2709_v6, 0.0 }
 0x2d6   :  { %v2724_v41 = vsel %vm2712_vm11, %v2706_v29, %v2718_v44  ;;  %v2725_v48 = vsel %vm2713_vm12, %v2707_v7, %v2719_v22  ;;  %v2722_v52 = vmul.f32 0.01, %v2710_v24  ;;  %vm2716_vm15 = vcmp.gt.f32.partialorder %v2710_v24, 0.0 }
 0x2d7   :  { %v6787_v30 = vmul.f32 %v2724_v41, %v6721_v54  ;;  %v6790_v28 = vmul.f32 %v2725_v48, %v6715_v23  ;;  %v2726_v15 = vsel %vm2714_vm13, %v2708_v8, %v2720_v31  ;;  %v2727_v34 = vsel %vm2715_vm14, %v2709_v6, %v2721_v35 }
 0x2d8   :  { %v6799_v50 = vmul.f32 %v2726_v15, %v6725_v1  ;;  %v6834_v0 = vmul.f32 %v2727_v34, %v6731_v56  ;;  %v2728_v63 = vsel %vm2716_vm15, %v2710_v24, %v2722_v52  ;;  %v2723_v21 = vmul.f32 0.01, %v2711_v51 }
 0x2d9   :  { %3000 = vrot.lane.b32.xlu0 %v6787_v30, %s5468_s20  ;;  %3092 = vrot.lane.b32.xlu2 %v6787_v30, %s5466_s18  ;;  %v6843_v59 = vmul.f32 %v2728_v63, %v6739_v39  ;;  %vm2717_vm8 = vcmp.gt.f32.partialorder %v2711_v51, 0.0  ;;  %v6957_v22 = vand.u32 4294901760, %v6787_v30 }
 0x2da   :  { %3002 = vrot.lane.b32.xlu1 %v6790_v28, %s5468_s20  ;;  %v2729_v27 = vsel %vm2717_vm8, %v2711_v51, %v2723_v21 }
 0x2db   :  { %v6871_v33 = vmul.f32 %v2729_v27, %v6751_v55  ;;  %v6969_v15 = vsub.f32 %v6787_v30, %v6957_v22 }
 0x2e1   :  { %3096 = vrot.lane.b32.xlu0 %v6799_v50, %s5466_s18  ;;  %3094 = vrot.lane.b32.xlu2 %v6790_v28, %s5466_s18 }
 0x2e2   :  { %2898 = vrot.lane.b32.xlu1 %v6787_v30, %s5470_s21 }
 0x2e9   :  { %3050 = vrot.lane.b32.xlu0 %v6799_v50, %s5467_s19  ;;  %3046 = vrot.lane.b32.xlu2 %v6787_v30, %s5467_s19 }
 0x2ea   :  { %2852 = vrot.lane.b32.xlu1 %v6787_v30, %s5471_s22 }
 0x2f1   :  { %3004 = vrot.lane.b32.xlu0 %v6799_v50, %s5468_s20  ;;  %3048 = vrot.lane.b32.xlu2 %v6790_v28, %s5467_s19 }
 0x2f2   :  { %2806 = vrot.lane.b32.xlu1 %v6787_v30, %s5472_s23 }
 0x2f9   :  { %2958 = vrot.lane.b32.xlu0 %v6799_v50, %s5469_s0  ;;  %2954 = vrot.lane.b32.xlu2 %v6787_v30, %s5469_s0 }
 0x2fa   :  { %2760 = vrot.lane.b32.xlu1 %v6787_v30, %s5473_s24  ;;  %v3124_v30 = vld [vmem:[%s8015_s6] sm:$0xff] }
 0x2fb   :  { %v7003_v21 = vand.u32 4294901760, %v3124_v30 }
 0x301   :  { %2900 = vrot.lane.b32.xlu0 %v6790_v28, %s5470_s21  ;;  %2956 = vrot.lane.b32.xlu2 %v6790_v28, %s5469_s0 }
 0x302   :  { %2808 = vrot.lane.b32.xlu1 %v6790_v28, %s5472_s23 }
 0x309   :  { %2762 = vrot.lane.b32.xlu0 %v6790_v28, %s5473_s24  ;;  %2854 = vrot.lane.b32.xlu2 %v6790_v28, %s5471_s22 }
 0x30a   :  { %3052 = vrot.lane.b32.xlu1 %v6834_v0, %s5467_s19 }
 0x311   :  { %3006 = vrot.lane.b32.xlu0 %v6834_v0, %s5468_s20  ;;  %3098 = vrot.lane.b32.xlu2 %v6834_v0, %s5466_s18 }
 0x312   :  { %3100 = vrot.lane.b32.xlu1 %v6843_v59, %s5466_s18 }
 0x319   :  { %3054 = vrot.lane.b32.xlu0 %v6843_v59, %s5467_s19  ;;  %2960 = vrot.lane.b32.xlu2 %v6834_v0, %s5469_s0 }
 0x31a   :  { %3008 = vrot.lane.b32.xlu1 %v6843_v59, %s5468_s20 }
 0x321   :  { %2856 = vrot.lane.b32.xlu0 %v6799_v50, %s5471_s22  ;;  %2902 = vrot.lane.b32.xlu2 %v6799_v50, %s5470_s21 }
 0x322   :  { %2810 = vrot.lane.b32.xlu1 %v6799_v50, %s5472_s23 }
 0x329   :  { %2764 = vrot.lane.b32.xlu0 %v6799_v50, %s5473_s24  ;;  %2962 = vrot.lane.b32.xlu2 %v6843_v59, %s5469_s0 }
 0x32a   :  { %2858 = vrot.lane.b32.xlu1 %v6834_v0, %s5471_s22 }
 0x331   :  { %2812 = vrot.lane.b32.xlu0 %v6834_v0, %s5472_s23  ;;  %2904 = vrot.lane.b32.xlu2 %v6834_v0, %s5470_s21 }
 0x332   :  { %3102 = vrot.lane.b32.xlu1 %v6871_v33, %s5466_s18  ;;  %s5385_s18 = sshll.u32 %s8019_s10, 4  ;;  %s5386_s18 = int_to_ptr.hbm [resolvable:$true] %s5385_s18 }
 0x333   :  { %v3093_v49 = vpop.permute.xlu2 %3092 }
 0x339   :  { %3056 = vrot.lane.b32.xlu0 %v6871_v33, %s5467_s19  ;;  %2766 = vrot.lane.b32.xlu2 %v6834_v0, %s5473_s24 }
 0x33a   :  { %2964 = vrot.lane.b32.xlu1 %v6871_v33, %s5469_s0 }
 0x33b   :  { %v3095_v62 = vpop.permute.xlu2 %3094 }
 0x33c   :  { %v3106_v11 = vsel %vm462_vm1, %v3093_v49, %v3095_v62 }
 0x33d   :  { %v6886_v42 = vand.u32 4294901760, %v3106_v11 }
 0x33f   :  { %v6889_v43 = vsub.f32 %v3106_v11, %v6886_v42  ;;  %3242 = vmatpush.msrb.mxu0 %v6886_v42  ;;  %3438 = vmatpush.msrb.mxu3 %v6886_v42 }
 0x341   :  { %v8038_v60 = vand.u32 4294901760, %v6889_v43  ;;  %2966 = vrot.lane.b32.xlu0 %v5475_v13, %s5469_s0  ;;  %3010 = vrot.lane.b32.xlu2 %v6871_v33, %s5468_s20 }
 0x342   :  { %2814 = vrot.lane.b32.xlu1 %v6843_v59, %s5472_s23  ;;  %3392 = vmatpush.msrb.mxu2 %v6889_v43 }
 0x343   :  { %v3313_v61 = vsub.f32 %v6889_v43, %v8038_v60  ;;  %v3047_v58 = vpop.permute.xlu2 %3046 }
 0x345   :  { %v3314_v2 = vand.u32 4294901760, %v3313_v61 }
 0x347   :  { %3315 = vmatpush.msrb.mxu1 %v3314_v2 }
 0x349   :  { %2860 = vrot.lane.b32.xlu0 %v6843_v59, %s5471_s22  ;;  %2906 = vrot.lane.b32.xlu2 %v6843_v59, %s5470_s21 }
 0x34a   :  { %2908 = vrot.lane.b32.xlu1 %v6871_v33, %s5470_s21 }
 0x34b   :  { %v3049_v13 = vpop.permute.xlu2 %3048  ;;  %v3001_v19 = vpop.permute.xlu0 %3000 }
 0x34c   :  { %v6914_v3 = vpop.permute.xlu1 %3002  ;;  %v3060_v45 = vsel %vm415_vm2, %v3047_v58, %v3049_v13 }
 0x34d   :  { %v6917_v26 = vand.u32 4294901760, %v3060_v45  ;;  %v3014_v14 = vsel %vm368_vm0, %v3001_v19, %v6914_v3 }
 0x34e   :  { %v6921_v57 = vand.u32 4294901760, %v3014_v14 }
 0x34f   :  { %v6924_v38 = vsub.f32 %v3060_v45, %v6917_v26  ;;  %3244 = vmatpush.msrb.mxu0 %v6917_v26  ;;  %3440 = vmatpush.msrb.mxu3 %v6917_v26 }
 0x350   :  { %v6929_v18 = vsub.f32 %v3014_v14, %v6921_v57  ;;  %v7033_v14 = vsub.f32 %v3124_v30, %v7003_v21 }
 0x351   :  { %2862 = vrot.lane.b32.xlu0 %v6871_v33, %s5471_s22  ;;  %2768 = vrot.lane.b32.xlu2 %v6843_v59, %s5473_s24  ;;  %v8036_v32 = vand.u32 4294901760, %v6924_v38 }
 0x352   :  { %2770 = vrot.lane.b32.xlu1 %v6871_v33, %s5473_s24  ;;  %3246 = vmatpush.msrb.mxu0 %v6921_v57  ;;  %v8035_v4 = vand.u32 4294901760, %v6929_v18 }
 0x353   :  { %3395 = vmatpush.msrb.mxu2 %v6924_v38  ;;  %3442 = vmatpush.msrb.mxu3 %v6921_v57  ;;  %v2955_v25 = vpop.permute.xlu2 %2954  ;;  %v6942_v12 = vpop.permute.xlu0 %3096  ;;  %v3319_v5 = vsub.f32 %v6924_v38, %v8036_v32 }
 0x354   :  { %v6947_v29 = vpop.permute.xlu1 %2898  ;;  %v3325_v7 = vsub.f32 %v6929_v18, %v8035_v4 }
 0x355   :  { %3398 = vmatpush.msrb.mxu2 %v6929_v18  ;;  %v3320_v9 = vand.u32 4294901760, %v3319_v5  ;;  %v2910_v8 = vsel %vm262_vm4, %v6773_v53, %v6947_v29  ;;  %v3107_v53 = vsel %vm462_vm1, %v3095_v62, %v6942_v12 }
 0x356   :  { %v3326_v44 = vand.u32 4294901760, %v3325_v7  ;;  %v6959_v41 = vand.u32 4294901760, %v2910_v8  ;;  %v6990_v52 = vand.u32 4294901760, %v3107_v53 }
 0x357   :  { %3321 = vmatpush.msrb.mxu1 %v3320_v9 }
 0x358   :  { %v6978_v35 = vsub.f32 %v2910_v8, %v6959_v41  ;;  %v7013_v11 = vsub.f32 %v3107_v53, %v6990_v52 }
 0x359   :  { %2816 = vrot.lane.b32.xlu2 %v6871_v33, %s5472_s23  ;;  %3327 = vmatpush.msrb.mxu1 %v3326_v44 }
 0x35a   :  { %v8031_v49 = vand.u32 4294901760, %v6978_v35 }
 0x35b   :  { %v6963_v48 = vpop.permute.xlu2 %2956  ;;  %v6965_v31 = vpop.permute.xlu0 %3050 }
 0x35c   :  { %v6973_v37 = vpop.permute.xlu1 %2852  ;;  %v2968_v6 = vsel %vm321_vm3, %v2955_v25, %v6963_v48  ;;  %v3061_v20 = vsel %vm415_vm2, %v3049_v13, %v6965_v31  ;;  %v3343_v9 = vsub.f32 %v6978_v35, %v8031_v49 }
 0x35d   :  { %v2864_v46 = vsel %vm215_vm5, %v6775_v17, %v6973_v37  ;;  %v6983_v24 = vand.u32 4294901760, %v2968_v6  ;;  %v8032_v17 = vand.u32 4294901760, %v6969_v15  ;;  %v7009_v62 = vand.u32 4294901760, %v3061_v20 }
 0x35e   :  { %v6988_v34 = vand.u32 4294901760, %v2864_v46 }
 0x35f   :  { %v6993_v63 = vsub.f32 %v2968_v6, %v6983_v24  ;;  %3248 = vmatpush.msrb.mxu0 %v6983_v24  ;;  %3444 = vmatpush.msrb.mxu3 %v6983_v24  ;;  %v3337_v2 = vsub.f32 %v6969_v15, %v8032_v17  ;;  %v7057_v6 = vand.u32 4294901760, %v6790_v28 }
 0x360   :  { %v7001_v51 = vsub.f32 %v2864_v46, %v6988_v34 }
 0x361   :  { %3250 = vmatpush.msrb.mxu0 %v6957_v22  ;;  %3401 = vmatpush.msrb.mxu2 %v6993_v63  ;;  %v8033_v27 = vand.u32 4294901760, %v6993_v63  ;;  %v3338_v44 = vand.u32 4294901760, %v3337_v2 }
 0x362   :  { %3446 = vmatpush.msrb.mxu3 %v6957_v22  ;;  %v8030_v13 = vand.u32 4294901760, %v7001_v51 }
 0x363   :  { %3252 = vmatpush.msrb.mxu0 %v6959_v41  ;;  %3404 = vmatpush.msrb.mxu2 %v6969_v15  ;;  %v7017_v61 = vpop.permute.xlu0 %3004  ;;  %v3331_v58 = vsub.f32 %v6993_v63, %v8033_v27  ;;  %v7070_v2 = vpop.permute.xlu2 %2854 }
 0x364   :  { %v7026_v19 = vpop.permute.xlu1 %2806  ;;  %3448 = vmatpush.msrb.mxu3 %v6959_v41  ;;  %v3015_v45 = vsel %vm368_vm0, %v6914_v3, %v7017_v61  ;;  %v7046_v3 = vsub.f32 %v3061_v20, %v7009_v62  ;;  %v3349_v53 = vsub.f32 %v7001_v51, %v8030_v13  ;;  %v7068_v20 = vand.u32 4294901760, %v7033_v14 }
 0x365   :  { %v2818_v25 = vsel %vm168_vm6, %v6777_v47, %v7026_v19  ;;  %v7038_v5 = vand.u32 4294901760, %v3015_v45  ;;  %3254 = vmatpush.msrb.mxu0 %v6988_v34  ;;  %3407 = vmatpush.msrb.mxu2 %v6978_v35  ;;  %v3332_v7 = vand.u32 4294901760, %v3331_v58  ;;  %v8034_v47 = vand.u32 4294901760, %v7013_v11 }
 0x366   :  { %v7048_v8 = vand.u32 4294901760, %v2818_v25  ;;  %3450 = vmatpush.msrb.mxu3 %v6988_v34  ;;  %v3344_v58 = vand.u32 4294901760, %v3343_v9  ;;  %v3350_v49 = vand.u32 4294901760, %v3349_v53 }
 0x367   :  { %3333 = vmatpush.msrb.mxu1 %v3332_v7  ;;  %3410 = vmatpush.msrb.mxu2 %v7001_v51  ;;  %v7063_v30 = vsub.f32 %v3015_v45, %v7038_v5  ;;  %v3654_v45 = vsub.f32 %v7013_v11, %v8034_v47 }
 0x368   :  { %v7060_v46 = vsub.f32 %v2818_v25, %v7048_v8  ;;  %3256 = vmatpush.msrb.mxu0 %v7048_v8  ;;  %3452 = vmatpush.msrb.mxu3 %v7048_v8  ;;  %v8041_v25 = vand.u32 4294901760, %v7046_v3 }
 0x369   :  { %3339 = vmatpush.msrb.mxu1 %v3338_v44  ;;  %v7082_v44 = vsub.f32 %v6790_v28, %v7057_v6  ;;  %v2865_v28 = vsel %vm215_vm5, %v6973_v37, %v7070_v2  ;;  %v3655_v47 = vand.u32 4294901760, %v3654_v45 }
 0x36a   :  { %3413 = vmatpush.msrb.mxu2 %v7060_v46  ;;  %v8037_v7 = vand.u32 4294901760, %v7060_v46  ;;  %v7112_v55 = vand.u32 4294901760, %v2865_v28 }
 0x36b   :  { %3345 = vmatpush.msrb.mxu1 %v3344_v58  ;;  %v7078_v13 = vpop.permute.xlu0 %2958  ;;  %v3262_v58 = vsub.f32 %v7033_v14, %v7068_v20  ;;  %v8043_v37 = vand.u32 4294901760, %v7082_v44 }
 0x36c   :  { %v7084_v9 = vpop.permute.xlu1 %2760  ;;  %v2969_v17 = vsel %vm321_vm3, %v6963_v48, %v7078_v13  ;;  %v3355_v27 = vsub.f32 %v7060_v46, %v8037_v7  ;;  %v3660_v7 = vsub.f32 %v7046_v3, %v8041_v25 }
 0x36d   :  { %v2772_v53 = vsel %vm121_vm7, %v6779_v10, %v7084_v9  ;;  %v7101_v4 = vand.u32 4294901760, %v2969_v17  ;;  %3351 = vmatpush.msrb.mxu1 %v3350_v49  ;;  %v7121_v39 = vand.u32 4294901760, %v3262_v58 }
 0x36e   :  { %v7103_v48 = vand.u32 4294901760, %v2772_v53  ;;  %v3356_v32 = vand.u32 4294901760, %v3355_v27  ;;  %v8067_v27 = vand.u32 4294901760, %v7063_v30 }
 0x36f   :  { %v7109_v60 = vsub.f32 %v2969_v17, %v7101_v4  ;;  %v8068_v17 = vand.u32 4294901760, %v6889_v43 }
 0x370   :  { %v7115_v10 = vsub.f32 %v2772_v53, %v7103_v48  ;;  %3258 = vmatpush.msrb.mxu0 %v7103_v48  ;;  %3357 = vmatpush.msrb.mxu1 %v3356_v32  ;;  %v3666_v49 = vsub.f32 %v7063_v30, %v8067_v27  ;;  %v3661_v53 = vand.u32 4294901760, %v3660_v7  ;;  %v8069_v32 = vand.u32 4294901760, %v6924_v38 }
 0x371   :  { %3454 = vmatpush.msrb.mxu3 %v7103_v48  ;;  %v8042_v45 = vand.u32 4294901760, %v7109_v60  ;;  %v7141_v27 = vsub.f32 %v2865_v28, %v7112_v55  ;;  %3264 = vmatmul.f32.vlgmr.msrb.gmra.mxu0 %v7121_v39  ;;  %v8070_v28 = vand.u32 4294901760, %v6929_v18 }
 0x372   :  { %3493 = vmatpush.msra.mxu0 %v8068_v17  ;;  %3416 = vmatpush.msrb.mxu2 %v7115_v10  ;;  %v3360_v25 = vand.u32 4294901760, %v7115_v10  ;;  %v3667_v17 = vand.u32 4294901760, %v3666_v49  ;;  %v8071_v49 = vand.u32 4294901760, %v6993_v63 }
 0x373   :  { %3656 = vmatpush.msra.mxu3 %v3655_v47  ;;  %v7132_v58 = vpop.permute.xlu0 %2900  ;;  %v3672_v43 = vsub.f32 %v7109_v60, %v8042_v45  ;;  %v3678_v47 = vsub.f32 %v7082_v44, %v8043_v37  ;;  %3419 = vmatmul.f32.vlgmr.msrb.gmra.mxu2 %v7033_v14 }
 0x374   :  { %3497 = vmatpush.msra.mxu0 %v8069_v32  ;;  %3583 = vmatpush.msra.mxu2 %v6990_v52  ;;  %v7143_v7 = vpop.permute.xlu1 %2808  ;;  %v2911_v38 = vsel %vm262_vm4, %v6947_v29, %v7132_v58  ;;  %v3361_v32 = vsub.f32 %v7115_v10, %v3360_v25 }
 0x375   :  { %3662 = vmatpush.msra.mxu3 %v3661_v53  ;;  %v2819_v45 = vsel %vm168_vm6, %v7026_v19, %v7143_v7  ;;  %v7153_v37 = vand.u32 4294901760, %v2911_v38  ;;  %v3673_v53 = vand.u32 4294901760, %v3672_v43  ;;  %v3679_v19 = vand.u32 4294901760, %v3678_v47 }
 0x376   :  { %3501 = vmatpush.msra.mxu0 %v8070_v28  ;;  %3585 = vmatpush.msra.mxu2 %v7009_v62  ;;  %v7158_v56 = vand.u32 4294901760, %v2819_v45  ;;  %v3362_v29 = vand.u32 4294901760, %v3361_v32  ;;  %v3689_v43 = vand.u32 4294901760, %v7141_v27 }
 0x377   :  { %3668 = vmatpush.msra.mxu3 %v3667_v17  ;;  %v7162_v10 = vsub.f32 %v2911_v38, %v7153_v37  ;;  %v8072_v17 = vand.u32 4294901760, %v6969_v15 }
 0x378   :  { %3505 = vmatpush.msra.mxu0 %v8071_v49  ;;  %3587 = vmatpush.msra.mxu2 %v7038_v5  ;;  %v7168_v18 = vsub.f32 %v2819_v45, %v7158_v56  ;;  %v8073_v45 = vand.u32 4294901760, %v6978_v35  ;;  %v3690_v35 = vsub.f32 %v7141_v27, %v3689_v43 }
 0x379   :  { %3363 = vmatpush.msrb.mxu1 %v3362_v29  ;;  %3674 = vmatpush.msra.mxu3 %v3673_v53  ;;  %v3683_v38 = vand.u32 4294901760, %v7162_v10  ;;  %v8074_v53 = vand.u32 4294901760, %v7001_v51 }
 0x37a   :  { %3509 = vmatpush.msra.mxu0 %v8072_v17  ;;  %3589 = vmatpush.msra.mxu2 %v7101_v4  ;;  %v3695_v63 = vand.u32 4294901760, %v7168_v18 }
 0x37b   :  { %3546 = vmatpush.msra.mxu1 %v6886_v42  ;;  %3680 = vmatpush.msra.mxu3 %v3679_v19  ;;  %v7180_v47 = vpop.permute.xlu0 %2762  ;;  %v3684_v15 = vsub.f32 %v7162_v10, %v3683_v38  ;;  %v8075_v19 = vand.u32 4294901760, %v7060_v46 }
 0x37c   :  { %3513 = vmatpush.msra.mxu0 %v8073_v45  ;;  %3591 = vmatpush.msra.mxu2 %v7057_v6  ;;  %v7186_v42 = vpop.permute.xlu1 %3052  ;;  %v2773_v32 = vsel %vm121_vm7, %v7084_v9, %v7180_v47  ;;  %v3696_v9 = vsub.f32 %v7168_v18, %v3695_v63 }
 0x37d   :  { %3548 = vmatpush.msra.mxu1 %v6917_v26  ;;  %3458 = vmatmul.f32.vlgmr.msrb.gmra.mxu3 %v7068_v20  ;;  %v7195_v26 = vpop.permute.xlu2 %3098  ;;  %v7197_v28 = vand.u32 4294901760, %v2773_v32  ;;  %v3685_v29 = vand.u32 4294901760, %v3684_v15  ;;  %v8077_v15 = vand.u32 4294901760, %v7046_v3 }
 0x37e   :  { %3517 = vmatpush.msra.mxu0 %v8074_v53  ;;  %3593 = vmatpush.msra.mxu2 %v7153_v37  ;;  %v3697_v17 = vand.u32 4294901760, %v3696_v9 }
 0x37f   :  { %3550 = vmatpush.msra.mxu1 %v6921_v57  ;;  %v7208_v49 = vsub.f32 %v2773_v32, %v7197_v28  ;;  %3686 = vmatpush.msra.mxu3 %v3685_v29  ;;  %v3691_v57 = vand.u32 4294901760, %v3690_v35 }
 0x380   :  { %3365 = vmatmul.f32.vlgmr.msrb.gmra.mxu1 %v7003_v21  ;;  %3521 = vmatpush.msra.mxu0 %v8075_v19 }
 0x381   :  { %3552 = vmatpush.msra.mxu1 %v6983_v24  ;;  %3595 = vmatpush.msra.mxu2 %v7112_v55  ;;  %v3701_v51 = vand.u32 4294901760, %v7208_v49 }
 0x382   :  { %3525 = vmatpush.msra.mxu0 %v3360_v25  ;;  %3692 = vmatpush.msra.mxu3 %v3691_v57 }
 0x383   :  { %3554 = vmatpush.msra.mxu1 %v6957_v22  ;;  %3597 = vmatpush.msra.mxu2 %v7158_v56  ;;  %v7219_v46 = vpop.permute.xlu0 %3006  ;;  %v3702_v24 = vsub.f32 %v7208_v49, %v3701_v51  ;;  %v8076_v22 = vand.u32 4294901760, %v7013_v11 }
 0x384   :  { %3733 = vmatpush.msrb.mxu0 %v7013_v11  ;;  %v7225_v25 = vpop.permute.xlu1 %3100  ;;  %3698 = vmatpush.msra.mxu3 %v3697_v17  ;;  %v8078_v11 = vand.u32 4294901760, %v7063_v30 }
 0x385   :  { %3556 = vmatpush.msra.mxu1 %v6959_v41  ;;  %3599 = vmatpush.msra.mxu2 %v7197_v28  ;;  %v3703_v45 = vand.u32 4294901760, %v3702_v24  ;;  %v7232_v41 = vpop.permute.xlu2 %2960 }
 0x386   :  { %3736 = vmatpush.msrb.mxu0 %v7046_v3  ;;  %v3108_v3 = vsel %vm462_vm1, %v6942_v12, %v7195_v26  ;;  %3605 = vmatmul.f32.vlgmr.msra.gmra.mxu2 %v7121_v39 }
 0x387   :  { %3834 = vmatpush.msrb.mxu2 %v8076_v22  ;;  %3558 = vmatpush.msra.mxu1 %v6988_v34  ;;  %v7263_v12 = vand.u32 4294901760, %v3108_v3 }
 0x388   :  { %3527 = vmatmul.f32.vlgmr.msra.gmra.mxu0 %v7003_v21  ;;  %3704 = vmatpush.msra.mxu3 %v3703_v45 }
 0x389   :  { %3739 = vmatpush.msrb.mxu0 %v7063_v30  ;;  %3838 = vmatpush.msrb.mxu2 %v8077_v15  ;;  %v3062_v30 = vsel %vm415_vm2, %v6965_v31, %v7186_v42 }
 0x38a   :  { %3560 = vmatpush.msra.mxu1 %v7048_v8  ;;  %3887 = vmatpush.msrb.mxu3 %v6990_v52  ;;  %v8079_v8 = vand.u32 4294901760, %v7109_v60  ;;  %v7273_v31 = vand.u32 4294901760, %v3062_v30 }
 0x38b   :  { %3742 = vmatpush.msrb.mxu0 %v7109_v60  ;;  %3842 = vmatpush.msrb.mxu2 %v8078_v11  ;;  %v7245_v34 = vpop.permute.xlu0 %3054  ;;  %v3016_v60 = vsel %vm368_vm0, %v7017_v61, %v7219_v46  ;;  %v2970_v61 = vsel %vm321_vm3, %v7078_v13, %v7232_v41 }
 0x38c   :  { %3562 = vmatpush.msra.mxu1 %v7103_v48  ;;  %3889 = vmatpush.msrb.mxu3 %v7009_v62  ;;  %v8080_v48 = vand.u32 4294901760, %v7082_v44  ;;  %v7298_v13 = vand.u32 4294901760, %v2970_v61 }
 0x38d   :  { %3745 = vmatpush.msrb.mxu0 %v7082_v44  ;;  %3846 = vmatpush.msrb.mxu2 %v8079_v8  ;;  %v7289_v44 = vsub.f32 %v3108_v3, %v7263_v12 }
 0x38e   :  { %3779 = vmatpush.msrb.mxu1 %v6990_v52  ;;  %v7258_v52 = vpop.permute.xlu1 %3008  ;;  %3891 = vmatpush.msrb.mxu3 %v7038_v5 }
 0x38f   :  { %3748 = vmatpush.msrb.mxu0 %v7162_v10  ;;  %3850 = vmatpush.msrb.mxu2 %v8080_v48  ;;  %v7291_v10 = vand.u32 4294901760, %v3016_v60  ;;  %v3994_v32 = vand.u32 4294901760, %v7289_v44 }
 0x390   :  { %3781 = vmatpush.msrb.mxu1 %v7009_v62  ;;  %3893 = vmatpush.msrb.mxu3 %v7101_v4  ;;  %v7275_v62 = vpop.permute.xlu2 %2902 }
 0x391   :  { %3751 = vmatpush.msrb.mxu0 %v7141_v27  ;;  %3854 = vmatpush.msrb.mxu2 %v3683_v38  ;;  %v2912_v27 = vsel %vm262_vm4, %v7132_v58, %v7275_v62  ;;  %v7316_v35 = vsub.f32 %v3016_v60, %v7291_v10  ;;  %v7326_v58 = vsub.f32 %v2970_v61, %v7298_v13 }
 0x392   :  { %3783 = vmatpush.msrb.mxu1 %v7038_v5  ;;  %v3221_v5 = vld [vmem:[%s8016_s7] sm:$0xff]  ;;  %3895 = vmatpush.msrb.mxu3 %v7057_v6  ;;  %v3995_v29 = vsub.f32 %v7289_v44, %v3994_v32 }
 0x393   :  { %3754 = vmatpush.msrb.mxu0 %v7168_v18  ;;  %3858 = vmatpush.msrb.mxu2 %v3689_v43  ;;  %v7295_v38 = vpop.permute.xlu0 %2856  ;;  %v7312_v43 = vand.u32 4294901760, %v6799_v50  ;;  %v7328_v18 = vand.u32 4294901760, %v2912_v27 }
 0x394   :  { %3785 = vmatpush.msrb.mxu1 %v7101_v4  ;;  %3224 = vperm.xlu0 %5408, %v3221_v5   ;;  %v7301_v4 = vsub.f32 %v3062_v30, %v7273_v31  ;;  %v3996_v22 = vand.u32 4294901760, %v3995_v29 }
 0x395   :  { %3564 = vmatmul.f32.vlgmr.msra.gmra.mxu1 %v7003_v21  ;;  %3706 = vmatmul.f32.vlgmr.msra.gmra.mxu3 %v7003_v21  ;;  %v7340_v53 = vsub.f32 %v6799_v50, %v7312_v43  ;;  %v3109_v50 = vsel %vm462_vm1, %v7195_v26, %v7225_v25 }
 0x396   :  { %3757 = vmatpush.msrb.mxu0 %v7208_v49  ;;  %3787 = vmatpush.msrb.mxu1 %v7057_v6  ;;  %v7320_v6 = vpop.permute.xlu1 %2810  ;;  %v8050_v49 = vand.u32 4294901760, %v7316_v35  ;;  %v7379_v24 = vand.u32 4294901760, %v3109_v50 }
 0x397   :  { %3862 = vmatpush.msrb.mxu2 %v3695_v63  ;;  %3897 = vmatpush.msrb.mxu3 %v7153_v37  ;;  %v2866_v63 = vsel %vm215_vm5, %v7070_v2, %v7295_v38  ;;  %v2820_v2 = vsel %vm168_vm6, %v7143_v7, %v7320_v6  ;;  %v7363_v7 = vsub.f32 %v2912_v27, %v7328_v18  ;;  %v8046_v17 = vand.u32 4294901760, %v7340_v53 }
 0x398   :  { %3924 = vmatpush.msra.mxu0 %v7263_v12  ;;  %3789 = vmatpush.msrb.mxu1 %v7153_v37  ;;  %v4000_v37 = vand.u32 4294901760, %v7301_v4  ;;  %v7345_v9 = vpop.permute.xlu2 %2962  ;;  %v7358_v19 = vand.u32 4294901760, %v2866_v63  ;;  %v4007_v45 = vsub.f32 %v7316_v35, %v8050_v49 }
 0x399   :  { %3866 = vmatpush.msrb.mxu2 %v3701_v51  ;;  %3899 = vmatpush.msrb.mxu3 %v7112_v55  ;;  %v8048_v51 = vand.u32 4294901760, %v7326_v58  ;;  %v8045_v8 = vand.u32 4294901760, %v7363_v7  ;;  %v2971_v60 = vsel %vm321_vm3, %v7232_v41, %v7345_v9  ;;  %v4019_v61 = vsub.f32 %v7340_v53, %v8046_v17 }
 0x39a   :  { %3926 = vmatpush.msra.mxu0 %v7273_v31  ;;  %3791 = vmatpush.msrb.mxu1 %v7112_v55  ;;  %v4001_v26 = vsub.f32 %v7301_v4, %v4000_v37  ;;  %v7390_v15 = vsub.f32 %v2866_v63, %v7358_v19  ;;  %v4008_v5 = vand.u32 4294901760, %v4007_v45 }
 0x39b   :  { %4074 = vmatpush.msra.mxu2 %v7289_v44  ;;  %3901 = vmatpush.msrb.mxu3 %v7158_v56  ;;  %v7352_v55 = vpop.permute.xlu0 %2764  ;;  %v4013_v3 = vsub.f32 %v7326_v58, %v8048_v51 }
 0x39c   :  { %3928 = vmatpush.msra.mxu0 %v7291_v10  ;;  %3793 = vmatpush.msrb.mxu1 %v7158_v56  ;;  %v2774_v57 = vsel %vm121_vm7, %v7180_v47, %v7352_v55  ;;  %v7374_v56 = vand.u32 4294901760, %v2820_v2  ;;  %v3063_v47 = vsel %vm415_vm2, %v7186_v42, %v7245_v34  ;;  %v3017_v42 = vsel %vm368_vm0, %v7219_v46, %v7258_v52 }
 0x39d   :  { %4077 = vmatpush.msra.mxu2 %v7301_v4  ;;  %3903 = vmatpush.msrb.mxu3 %v7197_v28  ;;  %v7394_v11 = vand.u32 4294901760, %v2774_v57  ;;  %v7404_v30 = vand.u32 4294901760, %v3063_v47  ;;  %v7412_v46 = vsub.f32 %v3109_v50, %v7379_v24  ;;  %v7421_v27 = vand.u32 4294901760, %v3017_v42 }
 0x39e   :  { %3868 = vmatmul.f32.vlgmr.msrb.gmra.mxu2 %v7003_v21  ;;  %3930 = vmatpush.msra.mxu0 %v7298_v13  ;;  %v7407_v48 = vsub.f32 %v2820_v2, %v7374_v56  ;;  %v8047_v29 = vand.u32 4294901760, %v7390_v15  ;;  %v4014_v2 = vand.u32 4294901760, %v4013_v3  ;;  %v4025_v50 = vsub.f32 %v7363_v7, %v8045_v8 }
 0x39f   :  { %4080 = vmatpush.msra.mxu2 %v7316_v35  ;;  %3760 = vmatmul.f32.vlgmr.msrb.gmra.mxu0 %v7033_v14  ;;  %v7424_v63 = vsub.f32 %v2774_v57, %v7394_v11  ;;  %v7438_v57 = vsub.f32 %v3063_v47, %v7404_v30  ;;  %v8051_v45 = vand.u32 4294901760, %v7412_v46  ;;  %v7446_v3 = vsub.f32 %v3017_v42, %v7421_v27 }
 0x3a0   :  { %3795 = vmatpush.msrb.mxu1 %v7197_v28  ;;  %3905 = vmatmul.f32.vlgmr.msrb.gmra.mxu3 %v7003_v21  ;;  %v4002_v28 = vand.u32 4294901760, %v4001_v26  ;;  %v7429_v41 = vpop.permute.xlu2 %2904  ;;  %v7435_v26 = vand.u32 4294901760, %v2971_v60  ;;  %v4031_v8 = vsub.f32 %v7390_v15, %v8047_v29  ;;  %v4026_v42 = vand.u32 4294901760, %v4025_v50 }
 0x3a1   :  { %4120 = vmatpush.msra.mxu3 %v7263_v12  ;;  %3932 = vmatpush.msra.mxu0 %v7312_v43  ;;  %v2913_v47 = vsel %vm262_vm4, %v7275_v62, %v7429_v41  ;;  %v4336_v50 = vsub.f32 %v7412_v46, %v8051_v45  ;;  %v8053_v45 = vand.u32 4294901760, %v7446_v3 }
 0x3a2   :  { %3997 = vmatpush.msra.mxu1 %v3996_v22  ;;  %4083 = vmatpush.msra.mxu2 %v7326_v58  ;;  %v8049_v22 = vand.u32 4294901760, %v7407_v48  ;;  %v7464_v62 = vsub.f32 %v2971_v60, %v7435_v26 }
 0x3a3   :  { %3799 = vmatmul.f32.vlgmr.msrb.gmra.mxu1 %v7068_v20  ;;  %4122 = vmatpush.msra.mxu3 %v7273_v31  ;;  %v7468_v17 = vpop.permute.xlu0 %2812 }
 0x3a4   :  { %3934 = vmatpush.msra.mxu0 %v7328_v18  ;;  %4003 = vmatpush.msra.mxu1 %v4002_v28  ;;  %v4020_v28 = vand.u32 4294901760, %v4019_v61  ;;  %v7461_v61 = vand.u32 4294901760, %v6834_v0  ;;  %v4037_v29 = vsub.f32 %v7407_v48, %v8049_v22  ;;  %v4032_v22 = vand.u32 4294901760, %v4031_v8 }
 0x3a5   :  { %4086 = vmatpush.msra.mxu2 %v7340_v53  ;;  %4124 = vmatpush.msra.mxu3 %v7291_v10  ;;  %v2821_v51 = vsel %vm168_vm6, %v7320_v6, %v7468_v17  ;;  %v8081_v8 = vand.u32 4294901760, %v7438_v57  ;;  %v4353_v6 = vand.u32 4294901760, %v7464_v62 }
 0x3a6   :  { %3936 = vmatpush.msra.mxu0 %v7358_v19  ;;  %4009 = vmatpush.msra.mxu1 %v4008_v5  ;;  %v7451_v5 = vpop.permute.xlu1 %2858  ;;  %v7498_v44 = vsub.f32 %v6834_v0, %v7461_v61  ;;  %v8082_v0 = vand.u32 4294901760, %v7316_v35  ;;  %v8083_v35 = vand.u32 4294901760, %v7326_v58 }
 0x3a7   :  { %4089 = vmatpush.msra.mxu2 %v7363_v7  ;;  %4126 = vmatpush.msra.mxu3 %v7298_v13  ;;  %v2867_v60 = vsel %vm215_vm5, %v7295_v38, %v7451_v5 }
 0x3a8   :  { %3938 = vmatpush.msra.mxu0 %v7374_v56  ;;  %4015 = vmatpush.msra.mxu1 %v4014_v2  ;;  %v8052_v2 = vand.u32 4294901760, %v7424_v63  ;;  %v7500_v38 = vand.u32 4294901760, %v2867_v60 }
 0x3a9   :  { %4092 = vmatpush.msra.mxu2 %v7390_v15  ;;  %4128 = vmatpush.msra.mxu3 %v7312_v43 }
 0x3aa   :  { %3940 = vmatpush.msra.mxu0 %v7394_v11  ;;  %4021 = vmatpush.msra.mxu1 %v4020_v28  ;;  %v7477_v28 = vand.u32 4294901760, %v2913_v47  ;;  %v4043_v49 = vsub.f32 %v7424_v63, %v8052_v2  ;;  %v7518_v2 = vand.u32 4294901760, %v2821_v51 }
 0x3ab   :  { %4095 = vmatpush.msra.mxu2 %v7407_v48  ;;  %4130 = vmatpush.msra.mxu3 %v7328_v18 }
 0x3ac   :  { %4175 = vmatpush.msrb.mxu0 %v3994_v32  ;;  %4027 = vmatpush.msra.mxu1 %v4026_v42  ;;  %v4038_v32 = vand.u32 4294901760, %v4037_v29  ;;  %v4342_v42 = vsub.f32 %v7438_v57, %v8081_v8  ;;  %v7508_v4 = vsub.f32 %v2913_v47, %v7477_v28  ;;  %v4044_v8 = vand.u32 4294901760, %v4043_v49 }
 0x3ad   :  { %4098 = vmatpush.msra.mxu2 %v7424_v63  ;;  %4132 = vmatpush.msra.mxu3 %v7358_v19  ;;  %v4348_v47 = vsub.f32 %v7446_v3, %v8053_v45  ;;  %v4359_v49 = vand.u32 4294901760, %v7498_v44  ;;  %v8084_v45 = vand.u32 4294901760, %v7340_v53  ;;  %v7540_v58 = vsub.f32 %v2821_v51, %v7518_v2 }
 0x3ae   :  { %4179 = vmatpush.msrb.mxu0 %v4000_v37  ;;  %4033 = vmatpush.msra.mxu1 %v4032_v22  ;;  %v7510_v37 = vpop.permute.xlu2 %2766  ;;  %v4337_v22 = vand.u32 4294901760, %v4336_v50  ;;  %v7528_v50 = vsub.f32 %v2867_v60, %v7500_v38 }
 0x3af   :  { %4265 = vmatpush.msrb.mxu2 %v7379_v24  ;;  %4134 = vmatpush.msra.mxu3 %v7374_v56  ;;  %v2775_v29 = vsel %vm121_vm7, %v7352_v55, %v7510_v37  ;;  %v4343_v55 = vand.u32 4294901760, %v4342_v42  ;;  %v4349_v60 = vand.u32 4294901760, %v4348_v47  ;;  %v4365_v42 = vand.u32 4294901760, %v7508_v4 }
 0x3b0   :  { %4183 = vmatpush.msrb.mxu0 %v8082_v0  ;;  %4039 = vmatpush.msra.mxu1 %v4038_v32  ;;  %v4354_v32 = vsub.f32 %v7464_v62, %v4353_v6  ;;  %v7534_v0 = vand.u32 4294901760, %v2775_v29  ;;  %v4371_v51 = vand.u32 4294901760, %v7528_v50  ;;  %v8087_v47 = vand.u32 4294901760, %v7407_v48 }
 0x3b1   :  { %4267 = vmatpush.msrb.mxu2 %v7404_v30  ;;  %4136 = vmatpush.msra.mxu3 %v7394_v11 }
 0x3b2   :  { %4187 = vmatpush.msrb.mxu0 %v8083_v35  ;;  %4045 = vmatpush.msra.mxu1 %v4044_v8  ;;  %v4355_v53 = vand.u32 4294901760, %v4354_v32  ;;  %v8086_v8 = vand.u32 4294901760, %v7390_v15  ;;  %v8088_v35 = vand.u32 4294901760, %v7424_v63 }
 0x3b3   :  { %4269 = vmatpush.msrb.mxu2 %v7421_v27  ;;  %4338 = vmatpush.msrb.mxu3 %v4337_v22  ;;  %v8085_v22 = vand.u32 4294901760, %v7363_v7  ;;  %v4377_v7 = vand.u32 4294901760, %v7540_v58 }
 0x3b4   :  { %4191 = vmatpush.msrb.mxu0 %v8084_v45  ;;  %4228 = vmatpush.msrb.mxu1 %v7263_v12  ;;  %v4360_v12 = vsub.f32 %v7498_v44, %v4359_v49  ;;  %v7553_v45 = vsub.f32 %v2775_v29, %v7534_v0 }
 0x3b5   :  { %4271 = vmatpush.msrb.mxu2 %v7435_v26  ;;  %4344 = vmatpush.msrb.mxu3 %v4343_v55  ;;  %v7581_v55 = vpop.permute.xlu0 %3056 }
 0x3b6   :  { %4195 = vmatpush.msrb.mxu0 %v8085_v22  ;;  %4230 = vmatpush.msrb.mxu1 %v7273_v31  ;;  %v4366_v31 = vsub.f32 %v7508_v4, %v4365_v42  ;;  %v4361_v15 = vand.u32 4294901760, %v4360_v12  ;;  %v4383_v29 = vand.u32 4294901760, %v7553_v45  ;;  %v8089_v22 = vand.u32 4294901760, %v7412_v46 }
 0x3b7   :  { %4273 = vmatpush.msrb.mxu2 %v7461_v61  ;;  %4350 = vmatpush.msrb.mxu3 %v4349_v60  ;;  %v7589_v60 = vpop.permute.xlu1 %3102 }
 0x3b8   :  { %4199 = vmatpush.msrb.mxu0 %v8086_v8  ;;  %4232 = vmatpush.msrb.mxu1 %v7291_v10  ;;  %v4372_v10 = vsub.f32 %v7528_v50, %v4371_v51  ;;  %v4367_v48 = vand.u32 4294901760, %v4366_v31  ;;  %v4384_v63 = vsub.f32 %v7553_v45, %v4383_v29  ;;  %v3111_v8 = vsel %vm462_vm1, %v7589_v60, %v6898_v40 }
 0x3b9   :  { %4275 = vmatpush.msrb.mxu2 %v7477_v28  ;;  %4356 = vmatpush.msrb.mxu3 %v4355_v53  ;;  %v7595_v53 = vpop.permute.xlu2 %3010 }
 0x3ba   :  { %4101 = vmatmul.f32.vlgmr.msra.gmra.mxu2 %v7033_v14  ;;  %4203 = vmatpush.msrb.mxu0 %v8087_v47  ;;  %v4373_v32 = vand.u32 4294901760, %v4372_v10  ;;  %v4385_v12 = vand.u32 4294901760, %v4384_v63 }
 0x3bb   :  { %4234 = vmatpush.msrb.mxu1 %v7298_v13  ;;  %4277 = vmatpush.msrb.mxu2 %v7500_v38  ;;  %v4378_v13 = vsub.f32 %v7540_v58, %v4377_v7 }
 0x3bc   :  { %3946 = vmatmul.f32.vlgmr.msra.gmra.mxu0 %v7121_v39  ;;  %4140 = vmatmul.f32.vlgmr.msra.gmra.mxu3 %v7068_v20 }
 0x3bd   :  { %4362 = vmatpush.msrb.mxu3 %v4361_v15  ;;  %4207 = vmatpush.msrb.mxu0 %v8088_v35  ;;  %v7739_v15 = vand.u32 4294901760, %v3111_v8  ;;  %v3019_v35 = vsel %vm368_vm0, %v7595_v53, %v6781_v16 }
 0x3be   :  { %4236 = vmatpush.msrb.mxu1 %v7312_v43  ;;  %4279 = vmatpush.msrb.mxu2 %v7518_v2  ;;  %v4379_v43 = vand.u32 4294901760, %v4378_v13 }
 0x3bf   :  { %4047 = vmatmul.f32.vlgmr.msra.gmra.mxu1 %v7003_v21  ;;  %4368 = vmatpush.msrb.mxu3 %v4367_v48 }
 0x3c0   :  { %4415 = vmatpush.msra.mxu0 %v7412_v46  ;;  %4238 = vmatpush.msrb.mxu1 %v7328_v18  ;;  %v8090_v18 = vand.u32 4294901760, %v7438_v57  ;;  %v8091_v46 = vand.u32 4294901760, %v7446_v3 }
 0x3c1   :  { %4281 = vmatpush.msrb.mxu2 %v7534_v0  ;;  %4374 = vmatpush.msrb.mxu3 %v4373_v32 }
 0x3c2   :  { %4418 = vmatpush.msra.mxu0 %v7438_v57  ;;  %4240 = vmatpush.msrb.mxu1 %v7358_v19  ;;  %v3110_v19 = vsel %vm462_vm1, %v7225_v25, %v7589_v60  ;;  %v7612_v57 = vpop.permute.xlu0 %2966  ;;  %v7774_v60 = vand.u32 4294901760, %v3019_v35 }
 0x3c3   :  { %4516 = vmatpush.msra.mxu2 %v8089_v22  ;;  %4380 = vmatpush.msrb.mxu3 %v4379_v43  ;;  %v7626_v25 = vand.u32 4294901760, %v3110_v19  ;;  %v7777_v43 = vsub.f32 %v3111_v8, %v7739_v15 }
 0x3c4   :  { %4421 = vmatpush.msra.mxu0 %v7446_v3  ;;  %4242 = vmatpush.msrb.mxu1 %v7374_v56  ;;  %v7619_v56 = vpop.permute.xlu1 %2964  ;;  %v7634_v3 = vpop.permute.xlu2 %2906 }
 0x3c5   :  { %4520 = vmatpush.msra.mxu2 %v8090_v18  ;;  %4209 = vmatmul.f32.vlgmr.msrb.gmra.mxu0 %v7003_v21  ;;  %v2973_v22 = vsel %vm321_vm3, %v7619_v56, %v7612_v57 }
 0x3c6   :  { %4386 = vmatpush.msrb.mxu3 %v4385_v12  ;;  %4424 = vmatpush.msra.mxu0 %v7464_v62  ;;  %v7651_v62 = vsub.f32 %v3110_v19, %v7626_v25 }
 0x3c7   :  { %4524 = vmatpush.msra.mxu2 %v8091_v46  ;;  %4244 = vmatpush.msrb.mxu1 %v7394_v11  ;;  %v3064_v11 = vsel %vm415_vm2, %v7245_v34, %v7581_v55 }
 0x3c8   :  { %4569 = vmatpush.msra.mxu3 %v7379_v24  ;;  %4246 = vmatmul.f32.vlgmr.msrb.gmra.mxu1 %v7003_v21  ;;  %v7638_v34 = vand.u32 4294901760, %v3064_v11 }
 0x3c9   :  { %4427 = vmatpush.msra.mxu0 %v7498_v44  ;;  %4461 = vmatpush.msra.mxu1 %v7379_v24  ;;  %v3018_v24 = vsel %vm368_vm0, %v7258_v52, %v7595_v53 }
 0x3ca   :  { %4528 = vmatpush.msra.mxu2 %v4353_v6  ;;  %4571 = vmatpush.msra.mxu3 %v7404_v30  ;;  %v7648_v52 = vand.u32 4294901760, %v3018_v24  ;;  %v7668_v44 = vpop.permute.xlu0 %2860  ;;  %v7674_v6 = vand.u32 4294901760, %v6843_v59 }
 0x3cb   :  { %4430 = vmatpush.msra.mxu0 %v7508_v4  ;;  %4463 = vmatpush.msra.mxu1 %v7404_v30  ;;  %v2972_v30 = vsel %vm321_vm3, %v7345_v9, %v7619_v56  ;;  %v7661_v9 = vsub.f32 %v3064_v11, %v7638_v34  ;;  %v7796_v11 = vand.u32 4294901760, %v2973_v22 }
 0x3cc   :  { %4532 = vmatpush.msra.mxu2 %v4359_v49  ;;  %4573 = vmatpush.msra.mxu3 %v7421_v27  ;;  %v7677_v4 = vsub.f32 %v3018_v24, %v7648_v52 }
 0x3cd   :  { %4433 = vmatpush.msra.mxu0 %v7528_v50  ;;  %4465 = vmatpush.msra.mxu1 %v7421_v27  ;;  %v7658_v27 = vand.u32 4294901760, %v2972_v30  ;;  %v4676_v50 = vand.u32 4294901760, %v7651_v62 }
 0x3ce   :  { %4536 = vmatpush.msra.mxu2 %v4365_v42  ;;  %4575 = vmatpush.msra.mxu3 %v7435_v26  ;;  %v7698_v42 = vpop.permute.xlu2 %2768 }
 0x3cf   :  { %4287 = vmatmul.f32.vlgmr.msrb.gmra.mxu2 %v7121_v39  ;;  %4436 = vmatpush.msra.mxu0 %v7540_v58  ;;  %v7690_v49 = vsub.f32 %v2972_v30, %v7658_v27  ;;  %v2868_v58 = vsel %vm215_vm5, %v7451_v5, %v7668_v44  ;;  %v4677_v5 = vsub.f32 %v7651_v62, %v4676_v50 }
 0x3d0   :  { %4467 = vmatpush.msra.mxu1 %v7435_v26  ;;  %4540 = vmatpush.msra.mxu2 %v4371_v51  ;;  %v2914_v26 = vsel %vm262_vm4, %v7429_v41, %v7634_v3  ;;  %v7682_v41 = vpop.permute.xlu1 %2814  ;;  %v7704_v51 = vsub.f32 %v6843_v59, %v7674_v6  ;;  %v7718_v59 = vand.u32 4294901760, %v2868_v58  ;;  %v7802_v30 = vsub.f32 %v3019_v35, %v7774_v60 }
 0x3d1   :  { %4577 = vmatpush.msra.mxu3 %v7461_v61  ;;  %4439 = vmatpush.msra.mxu0 %v7553_v45  ;;  %v2822_v45 = vsel %vm168_vm6, %v7468_v17, %v7682_v41  ;;  %v2776_v17 = vsel %vm121_vm7, %v7510_v37, %v7698_v42  ;;  %v3065_v37 = vsel %vm415_vm2, %v7581_v55, %v6903_v36  ;;  %v4678_v10 = vand.u32 4294901760, %v4677_v5 }
 0x3d2   :  { %4388 = vmatmul.f32.vlgmr.msrb.gmra.mxu3 %v7003_v21  ;;  %4469 = vmatpush.msra.mxu1 %v7461_v61  ;;  %v7687_v61 = vand.u32 4294901760, %v2914_v26  ;;  %v4700_v47 = vand.u32 4294901760, %v7704_v51  ;;  %v7752_v48 = vand.u32 4294901760, %v2776_v17  ;;  %v7755_v13 = vsub.f32 %v2868_v58, %v7718_v59  ;;  %v2863_v5 = vpop.permute.xlu0 %2862 }
 0x3d3   :  { %4544 = vmatpush.msra.mxu2 %v4377_v7  ;;  %4579 = vmatpush.msra.mxu3 %v7477_v28  ;;  %v4694_v7 = vand.u32 4294901760, %v7690_v49  ;;  %v7764_v16 = vand.u32 4294901760, %v3065_v37 }
 0x3d4   :  { %4606 = vmatpush.msrb.mxu0 %v7626_v25  ;;  %4471 = vmatpush.msra.mxu1 %v7477_v28  ;;  %v4682_v28 = vand.u32 4294901760, %v7661_v9  ;;  %v7723_v31 = vsub.f32 %v2914_v26, %v7687_v61  ;;  %v4701_v63 = vsub.f32 %v7704_v51, %v4700_v47  ;;  %v7784_v12 = vsub.f32 %v2776_v17, %v7752_v48 }
 0x3d5   :  { %4548 = vmatpush.msra.mxu2 %v4383_v29  ;;  %4581 = vmatpush.msra.mxu3 %v7500_v38  ;;  %v4712_v46 = vand.u32 4294901760, %v7755_v13  ;;  %v7794_v56 = vsub.f32 %v3065_v37, %v7764_v16  ;;  %v5017_v26 = vand.u32 4294901760, %v7777_v43  ;;  %v7816_v37 = vand.u32 4294901760, %v6871_v33 }
 0x3d6   :  { %4608 = vmatpush.msrb.mxu0 %v7638_v34  ;;  %4473 = vmatpush.msra.mxu1 %v7500_v38  ;;  %v4688_v38 = vand.u32 4294901760, %v7677_v4  ;;  %v4683_v40 = vsub.f32 %v7661_v9, %v4682_v28  ;;  %v4706_v55 = vand.u32 4294901760, %v7723_v31  ;;  %v4702_v58 = vand.u32 4294901760, %v4701_v63 }
 0x3d7   :  { %4756 = vmatpush.msrb.mxu2 %v7651_v62  ;;  %4583 = vmatpush.msra.mxu3 %v7518_v2  ;;  %v4724_v8 = vand.u32 4294901760, %v7784_v12  ;;  %v5029_v63 = vand.u32 4294901760, %v7802_v30  ;;  %v7849_v62 = vsub.f32 %v6871_v33, %v7816_v37 }
 0x3d8   :  { %4610 = vmatpush.msrb.mxu0 %v7648_v52  ;;  %4475 = vmatpush.msra.mxu1 %v7518_v2  ;;  %v7734_v2 = vand.u32 4294901760, %v2822_v45  ;;  %v4689_v29 = vsub.f32 %v7677_v4, %v4688_v38  ;;  %v4684_v36 = vand.u32 4294901760, %v4683_v40  ;;  %v2909_v53 = vpop.permute.xlu1 %2908  ;;  %v4707_v57 = vsub.f32 %v7723_v31, %v4706_v55 }
 0x3d9   :  { %4759 = vmatpush.msrb.mxu2 %v7661_v9  ;;  %4585 = vmatpush.msra.mxu3 %v7534_v0  ;;  %v2915_v17 = vsel %vm262_vm4, %v7634_v3, %v2909_v53  ;;  %v5023_v3 = vand.u32 4294901760, %v7794_v56  ;;  %v5030_v33 = vsub.f32 %v7802_v30, %v5029_v63 }
 0x3da   :  { %4550 = vmatmul.f32.vlgmr.msra.gmra.mxu2 %v7003_v21  ;;  %4612 = vmatpush.msrb.mxu0 %v7658_v27  ;;  %v7767_v32 = vsub.f32 %v2822_v45, %v7734_v2  ;;  %v4690_v18 = vand.u32 4294901760, %v4689_v29  ;;  %v4713_v45 = vsub.f32 %v7755_v13, %v4712_v46  ;;  %v4708_v40 = vand.u32 4294901760, %v4707_v57 }
 0x3db   :  { %4762 = vmatpush.msrb.mxu2 %v7677_v4  ;;  %4442 = vmatmul.f32.vlgmr.msra.gmra.mxu0 %v7033_v14  ;;  %v7819_v29 = vsub.f32 %v2973_v22, %v7796_v11  ;;  %v7835_v22 = vand.u32 4294901760, %v2915_v17 }
 0x3dc   :  { %4477 = vmatpush.msra.mxu1 %v7534_v0  ;;  %4587 = vmatmul.f32.vlgmr.msra.gmra.mxu3 %v7003_v21  ;;  %v4695_v0 = vsub.f32 %v7690_v49, %v4694_v7  ;;  %v4718_v24 = vand.u32 4294901760, %v7767_v32  ;;  %v4714_v53 = vand.u32 4294901760, %v4713_v45 }
 0x3dd   :  { %4802 = vmatpush.msrb.mxu3 %v7626_v25  ;;  %4614 = vmatpush.msrb.mxu0 %v7674_v6 }
 0x3de   :  { %4679 = vmatpush.msrb.mxu1 %v4678_v10  ;;  %4765 = vmatpush.msrb.mxu2 %v7690_v49  ;;  %v4696_v19 = vand.u32 4294901760, %v4695_v0  ;;  %v2817_v10 = vpop.permute.xlu2 %2816  ;;  %v4719_v35 = vsub.f32 %v7767_v32, %v4718_v24  ;;  %v2869_v0 = vsel %vm215_vm5, %v7668_v44, %v2863_v5  ;;  %v7867_v5 = vsub.f32 %v2915_v17, %v7835_v22 }
 0x3df   :  { %4481 = vmatmul.f32.vlgmr.msra.gmra.mxu1 %v7068_v20  ;;  %4804 = vmatpush.msrb.mxu3 %v7638_v34  ;;  %v2823_v44 = vsel %vm168_vm6, %v7682_v41, %v2817_v10  ;;  %v5024_v41 = vsub.f32 %v7794_v56, %v5023_v3 }
 0x3e0   :  { %4616 = vmatpush.msrb.mxu0 %v7687_v61  ;;  %4685 = vmatpush.msrb.mxu1 %v4684_v36  ;;  %v5018_v36 = vsub.f32 %v7777_v43, %v5017_v26  ;;  %v4720_v57 = vand.u32 4294901760, %v4719_v35  ;;  %v5047_v35 = vand.u32 4294901760, %v7867_v5 }
 0x3e1   :  { %4768 = vmatpush.msrb.mxu2 %v7704_v51  ;;  %4806 = vmatpush.msrb.mxu3 %v7648_v52 }
 0x3e2   :  { %4618 = vmatpush.msrb.mxu0 %v7718_v59  ;;  %4691 = vmatpush.msrb.mxu1 %v4690_v18  ;;  %v4725_v18 = vsub.f32 %v7784_v12, %v4724_v8  ;;  %v5019_v9 = vand.u32 4294901760, %v5018_v36 }
 0x3e3   :  { %4771 = vmatpush.msrb.mxu2 %v7723_v31  ;;  %4808 = vmatpush.msrb.mxu3 %v7658_v27 }
 0x3e4   :  { %4620 = vmatpush.msrb.mxu0 %v7734_v2  ;;  %4697 = vmatpush.msrb.mxu1 %v4696_v19  ;;  %v2771_v19 = vpop.permute.xlu1 %2770  ;;  %v4726_v4 = vand.u32 4294901760, %v4725_v18 }
 0x3e5   :  { %4774 = vmatpush.msrb.mxu2 %v7755_v13  ;;  %4810 = vmatpush.msrb.mxu3 %v7674_v6  ;;  %v2777_v45 = vsel %vm121_vm7, %v7698_v42, %v2771_v19  ;;  %v5041_v42 = vand.u32 4294901760, %v7849_v62 }
 0x3e6   :  { %4622 = vmatpush.msrb.mxu0 %v7752_v48  ;;  %4703 = vmatpush.msrb.mxu1 %v4702_v58  ;;  %v5035_v58 = vand.u32 4294901760, %v7819_v29  ;;  %v7882_v10 = vand.u32 4294901760, %v2777_v45 }
 0x3e7   :  { %4777 = vmatpush.msrb.mxu2 %v7767_v32  ;;  %4812 = vmatpush.msrb.mxu3 %v7687_v61 }
 0x3e8   :  { %4857 = vmatpush.msra.mxu0 %v4676_v50  ;;  %4709 = vmatpush.msrb.mxu1 %v4708_v40  ;;  %v7851_v50 = vand.u32 4294901760, %v2869_v0  ;;  %v5025_v40 = vand.u32 4294901760, %v5024_v41  ;;  %v5036_v17 = vsub.f32 %v7819_v29, %v5035_v58  ;;  %v7901_v36 = vsub.f32 %v2777_v45, %v7882_v10 }
 0x3e9   :  { %4780 = vmatpush.msrb.mxu2 %v7784_v12  ;;  %4814 = vmatpush.msrb.mxu3 %v7718_v59 }
 0x3ea   :  { %4861 = vmatpush.msra.mxu0 %v4682_v28  ;;  %4715 = vmatpush.msrb.mxu1 %v4714_v53  ;;  %v7864_v28 = vand.u32 4294901760, %v2823_v44  ;;  %v5037_v51 = vand.u32 4294901760, %v5036_v17 }
 0x3eb   :  { %4947 = vmatpush.msra.mxu2 %v7739_v15  ;;  %4816 = vmatpush.msrb.mxu3 %v7734_v2 }
 0x3ec   :  { %4865 = vmatpush.msra.mxu0 %v4688_v38  ;;  %4721 = vmatpush.msrb.mxu1 %v4720_v57  ;;  %v7876_v38 = vsub.f32 %v2869_v0, %v7851_v50  ;;  %v7888_v49 = vsub.f32 %v2823_v44, %v7864_v28 }
 0x3ed   :  { %4949 = vmatpush.msra.mxu2 %v7764_v16  ;;  %4818 = vmatpush.msrb.mxu3 %v7752_v48 }
 0x3ee   :  { %4869 = vmatpush.msra.mxu0 %v4694_v7  ;;  %4727 = vmatpush.msrb.mxu1 %v4726_v4  ;;  %v5031_v7 = vand.u32 4294901760, %v5030_v33  ;;  %v5059_v31 = vand.u32 4294901760, %v7888_v49 }
 0x3ef   :  { %4951 = vmatpush.msra.mxu2 %v7774_v60  ;;  %5020 = vmatpush.msra.mxu3 %v5019_v9 }
 0x3f0   :  { %4873 = vmatpush.msra.mxu0 %v4700_v47  ;;  %4910 = vmatpush.msra.mxu1 %v7626_v25  ;;  %v5042_v25 = vsub.f32 %v7849_v62, %v5041_v42  ;;  %v5053_v47 = vand.u32 4294901760, %v7876_v38  ;;  %v5060_v32 = vsub.f32 %v7888_v49, %v5059_v31 }
 0x3f1   :  { %4953 = vmatpush.msra.mxu2 %v7796_v11  ;;  %5026 = vmatpush.msra.mxu3 %v5025_v40 }
 0x3f2   :  { %4877 = vmatpush.msra.mxu0 %v4706_v55  ;;  %4912 = vmatpush.msra.mxu1 %v7638_v34  ;;  %v5048_v34 = vsub.f32 %v7867_v5, %v5047_v35  ;;  %v5043_v13 = vand.u32 4294901760, %v5042_v25  ;;  %v5065_v55 = vand.u32 4294901760, %v7901_v36  ;;  %v5061_v12 = vand.u32 4294901760, %v5060_v32 }
 0x3f3   :  { %4955 = vmatpush.msra.mxu2 %v7816_v37  ;;  %5032 = vmatpush.msra.mxu3 %v5031_v7 }
 0x3f4   :  { %4881 = vmatpush.msra.mxu0 %v4712_v46  ;;  %4914 = vmatpush.msra.mxu1 %v7648_v52  ;;  %v5054_v52 = vsub.f32 %v7876_v38, %v5053_v47  ;;  %v5049_v46 = vand.u32 4294901760, %v5048_v34 }
 0x3f5   :  { %4957 = vmatpush.msra.mxu2 %v7835_v22  ;;  %5038 = vmatpush.msra.mxu3 %v5037_v51 }
 0x3f6   :  { %4783 = vmatmul.f32.vlgmr.msrb.gmra.mxu2 %v7033_v14  ;;  %4885 = vmatpush.msra.mxu0 %v4718_v24  ;;  %v5066_v24 = vsub.f32 %v7901_v36, %v5065_v55 }
 0x3f7   :  { %4916 = vmatpush.msra.mxu1 %v7658_v27  ;;  %4959 = vmatpush.msra.mxu2 %v7851_v50  ;;  %v5055_v27 = vand.u32 4294901760, %v5054_v52 }
 0x3f8   :  { %4628 = vmatmul.f32.vlgmr.msrb.gmra.mxu0 %v7121_v39  ;;  %4822 = vmatmul.f32.vlgmr.msrb.gmra.mxu3 %v7068_v20 }
 0x3f9   :  { %5044 = vmatpush.msra.mxu3 %v5043_v13  ;;  %4889 = vmatpush.msra.mxu0 %v4724_v8 }
 0x3fa   :  { %4918 = vmatpush.msra.mxu1 %v7674_v6  ;;  %4961 = vmatpush.msra.mxu2 %v7864_v28  ;;  %v5067_v6 = vand.u32 4294901760, %v5066_v24 }
 0x3fb   :  { %4729 = vmatmul.f32.vlgmr.msrb.gmra.mxu1 %v7003_v21  ;;  %5050 = vmatpush.msra.mxu3 %v5049_v46 }
 0x3fc   :  { %5097 = vmatpush.msrb.mxu0 %v7777_v43  ;;  %4920 = vmatpush.msra.mxu1 %v7687_v61  ;;  %v3420_v61 = vpop.f32.mrf.mxu2 }
 0x3fd   :  { %4963 = vmatpush.msra.mxu2 %v7882_v10  ;;  %5056 = vmatpush.msra.mxu3 %v5055_v27 }
 0x3fe   :  { %5100 = vmatpush.msrb.mxu0 %v7794_v56  ;;  %4922 = vmatpush.msra.mxu1 %v7718_v59 }
 0x3ff   :  { %5198 = vmatpush.msrb.mxu2 %v5017_v26  ;;  %5062 = vmatpush.msra.mxu3 %v5061_v12 }
 0x400   :  { %5103 = vmatpush.msrb.mxu0 %v7802_v30  ;;  %4924 = vmatpush.msra.mxu1 %v7734_v2  ;;  %v3459_v59 = vpop.f32.mrf.mxu3 }
 0x401   :  { %5202 = vmatpush.msrb.mxu2 %v5023_v3  ;;  %4891 = vmatmul.f32.vlgmr.msra.gmra.mxu0 %v7003_v21 }
 0x402   :  { %4969 = vmatmul.f32.vlgmr.msra.gmra.mxu2 %v7121_v39  ;;  %5068 = vmatpush.msra.mxu3 %v5067_v6  ;;  %v3265_v39 = vpop.f32.mrf.mxu0 }
 0x403   :  { %5106 = vmatpush.msrb.mxu0 %v7819_v29  ;;  %5206 = vmatpush.msrb.mxu2 %v5029_v63 }
 0x404   :  { %4926 = vmatpush.msra.mxu1 %v7752_v48  ;;  %5251 = vmatpush.msrb.mxu3 %v7739_v15 }
 0x405   :  { %4928 = vmatmul.f32.vlgmr.msra.gmra.mxu1 %v7003_v21  ;;  %5070 = vmatmul.f32.vlgmr.msra.gmra.mxu3 %v7003_v21 }
 0x406   :  { %5109 = vmatpush.msrb.mxu0 %v7849_v62  ;;  %5143 = vmatpush.msrb.mxu1 %v7739_v15  ;;  %v3225_v63 = vpop.permute.xlu0 %3224 }
 0x407   :  { %5210 = vmatpush.msrb.mxu2 %v5035_v58  ;;  %5253 = vmatpush.msrb.mxu3 %v7764_v16  ;;  %v3266_v44 = vadd.f32 %v3265_v39, %v3225_v63 }
 0x408   :  { %5112 = vmatpush.msrb.mxu0 %v7867_v5  ;;  %5145 = vmatpush.msrb.mxu1 %v7764_v16 }
 0x409   :  { %5214 = vmatpush.msrb.mxu2 %v5041_v42  ;;  %5255 = vmatpush.msrb.mxu3 %v7774_v60  ;;  %v3606_v15 = vpop.f32.mrf.mxu2 }
 0x40a   :  { %5115 = vmatpush.msrb.mxu0 %v7876_v38  ;;  %5147 = vmatpush.msrb.mxu1 %v7774_v60  ;;  %v3528_v2 = vpop.f32.mrf.mxu0  ;;  %v3607_v18 = vadd.f32 %v3606_v15, %v3225_v63 }
 0x40b   :  { %5218 = vmatpush.msrb.mxu2 %v5047_v35  ;;  %5257 = vmatpush.msrb.mxu3 %v7796_v11 }
 0x40c   :  { %5118 = vmatpush.msrb.mxu0 %v7888_v49  ;;  %5149 = vmatpush.msrb.mxu1 %v7796_v11 }
 0x40d   :  { %5222 = vmatpush.msrb.mxu2 %v5053_v47  ;;  %5259 = vmatpush.msrb.mxu3 %v7816_v37 }
 0x40e   :  { %5121 = vmatpush.msrb.mxu0 %v7901_v36  ;;  %5151 = vmatpush.msrb.mxu1 %v7816_v37 }
 0x40f   :  { %5226 = vmatpush.msrb.mxu2 %v5059_v31  ;;  %5124 = vmatmul.f32.vlgmr.msrb.gmra.mxu0 %v7033_v14  ;;  %v3366_v14 = vpop.f32.mrf.mxu1 }
 0x410   :  { %5261 = vmatpush.msrb.mxu3 %v7835_v22  ;;  %5153 = vmatpush.msrb.mxu1 %v7835_v22  ;;  %v3367_v58 = vadd.f32 %v3366_v14, %v3266_v44 }
 0x411   :  { %5230 = vmatpush.msrb.mxu2 %v5065_v55 }
 0x412   :  { %5263 = vmatpush.msrb.mxu3 %v7851_v50  ;;  %5155 = vmatpush.msrb.mxu1 %v7851_v50  ;;  %v3421_v38 = vadd.f32 %v3420_v61, %v3367_v58 }
 0x413   :  { %5232 = vmatmul.f32.vlgmr.msrb.gmra.mxu2 %v7003_v21 }
 0x414   :  { %5265 = vmatpush.msrb.mxu3 %v7864_v28  ;;  %5157 = vmatpush.msrb.mxu1 %v7864_v28  ;;  %v3460_v7 = vadd.f32 %v3459_v59, %v3421_v38 }
 0x416   :  { %5267 = vmatpush.msrb.mxu3 %v7882_v10  ;;  %5159 = vmatpush.msrb.mxu1 %v7882_v10  ;;  %v3529_v31 = vadd.f32 %v3528_v2, %v3460_v7 }
 0x417   :  { %5269 = vmatmul.f32.vlgmr.msrb.gmra.mxu3 %v7003_v21  ;;  %5163 = vmatmul.f32.vlgmr.msrb.gmra.mxu1 %v7068_v20  ;;  %v3565_v48 = vpop.f32.mrf.mxu1 }
 0x418   :  { %v3707_v16 = vpop.f32.mrf.mxu3  ;;  %v7981_v12 = vadd.f32 %v3565_v48, %v3529_v31 }
 0x419   :  { %v3708_v57 = vadd.f32 %v3707_v16, %v3607_v18 }
 0x41a   :  { %v5273_v2 = vmul.f32 %v7981_v12, %v6721_v54 }
 0x41c   :  { %v3761_v60 = vpop.f32.mrf.mxu0 }
 0x41d   :  { %v3762_v45 = vadd.f32 %v3761_v60, %v3708_v57 }
 0x420   :  { %v3800_v43 = vpop.f32.mrf.mxu1 }
 0x421   :  { %v3869_v56 = vpop.f32.mrf.mxu2  ;;  %v3801_v10 = vadd.f32 %v3800_v43, %v3762_v45 }
 0x423   :  { %v3906_v11 = vpop.f32.mrf.mxu3  ;;  %v3870_v36 = vadd.f32 %v3869_v56, %v3801_v10 }
 0x425   :  { %v7979_v27 = vadd.f32 %v3906_v11, %v3870_v36  ;;  %v8092_v11 = vld [vmem:[#allocation10_spill] sm:$0xff] }
 0x427   :  { %v5274_v59 = vmul.f32 %v7979_v27, %v6715_v23 }
 0x429   :  { %v5287_v48 = vmul.f32 %v5274_v59, %v7979_v27 }
 0x439   :  { %v3947_v30 = vpop.f32.mrf.mxu0 }
 0x43a   :  { %v3948_v19 = vadd.f32 %v3947_v30, %v3225_v63 }
 0x43c   :  { %v4048_v26 = vpop.f32.mrf.mxu1 }
 0x43d   :  { %v4102_v8 = vpop.f32.mrf.mxu2  ;;  %v4049_v9 = vadd.f32 %v4048_v26, %v3948_v19  ;;  %v8094_v19 = vld [vmem:[#allocation12_spill] sm:$0xff] }
 0x43f   :  { %v4141_v37 = vpop.f32.mrf.mxu3  ;;  %v4103_v40 = vadd.f32 %v4102_v8, %v4049_v9  ;;  %v5286_v8 = vmul.f32 %v5273_v2, %v7981_v12 }
 0x441   :  { %v4142_v35 = vadd.f32 %v4141_v37, %v4103_v40 }
 0x442   :  { %v4210_v29 = vpop.f32.mrf.mxu0 }
 0x443   :  { %v4211_v13 = vadd.f32 %v4210_v29, %v4142_v35  ;;  %v5279_v29 = vadd.f32 %v5274_v59, %v5273_v2 }
 0x445   :  { %v4247_v3 = vpop.f32.mrf.mxu1 }
 0x446   :  { %v7983_v6 = vadd.f32 %v4247_v3, %v4211_v13  ;;  %v5317_v13 = vld [vmem:[%s8018_s9] sm:$0xff] }
 0x448   :  { %v5275_v16 = vmul.f32 %v7983_v6, %v6725_v1 }
 0x44a   :  { %v5288_v23 = vmul.f32 %v5275_v16, %v7983_v6 }
 0x452   :  { %v4288_v21 = vpop.f32.mrf.mxu2 }
 0x453   :  { %v4289_v41 = vadd.f32 %v4288_v21, %v3225_v63  ;;  %v8093_v21 = vld [vmem:[#allocation11_spill] sm:$0xff] }
 0x455   :  { %v4389_v20 = vpop.f32.mrf.mxu3 }
 0x456   :  { %v4390_v4 = vadd.f32 %v4389_v20, %v4289_v41  ;;  %v5292_v20 = vadd.f32 %v5287_v48, %v5286_v8  ;;  %v5360_v48 = vld [vmem:[#allocation4 + $0x8] sm:$0xff]  ;;  %v5362_v8 = vld [vmem:[#allocation4 + $0x18] sm:$0xff] }
 0x458   :  { %v4443_v0 = vpop.f32.mrf.mxu0 }
 0x459   :  { %v4444_v49 = vadd.f32 %v4443_v0, %v4390_v4  ;;  %v5280_v0 = vadd.f32 %v5279_v29, %v5275_v16  ;;  %v5364_v29 = vld [vmem:[#allocation4 + $0x28] sm:$0xff] }
 0x45c   :  { %v4482_v22 = vpop.f32.mrf.mxu1 }
 0x45d   :  { %v4551_v53 = vpop.f32.mrf.mxu2  ;;  %v4483_v34 = vadd.f32 %v4482_v22, %v4444_v49  ;;  %v5293_v22 = vadd.f32 %v5292_v20, %v5288_v23 }
 0x45f   :  { %v4588_v62 = vpop.f32.mrf.mxu3  ;;  %v4552_v24 = vadd.f32 %v4551_v53, %v4483_v34 }
 0x461   :  { %v4589_v15 = vadd.f32 %v4588_v62, %v4552_v24 }
 0x463   :  { %v5276_v30 = vmul.f32 %v4589_v15, %v8092_v11 }
 0x465   :  { %v5289_v1 = vmul.f32 %v5276_v30, %v4589_v15  ;;  %v5281_v44 = vadd.f32 %v5280_v0, %v5276_v30 }
 0x467   :  { %v5294_v57 = vadd.f32 %v5293_v22, %v5289_v1 }
 0x475   :  { %v4629_v50 = vpop.f32.mrf.mxu0 }
 0x476   :  { %v4630_v33 = vadd.f32 %v4629_v50, %v3225_v63 }
 0x478   :  { %v4730_v28 = vpop.f32.mrf.mxu1 }
 0x479   :  { %v4784_v5 = vpop.f32.mrf.mxu2  ;;  %v4731_v17 = vadd.f32 %v4730_v28, %v4630_v33 }
 0x47b   :  { %v4823_v42 = vpop.f32.mrf.mxu3  ;;  %v4785_v51 = vadd.f32 %v4784_v5, %v4731_v17 }
 0x47d   :  { %v4824_v52 = vadd.f32 %v4823_v42, %v4785_v51 }
 0x47e   :  { %v4892_v25 = vpop.f32.mrf.mxu0 }
 0x47f   :  { %v4893_v39 = vadd.f32 %v4892_v25, %v4824_v52  ;;  %v5304_v25 = vld [vmem:[%s8017_s8] sm:$0xff]  ;;  %s5476_s8 = smov [#allocation7]  }
 0x480   :  { %s5383_s9 = sshll.u32 %s5476_s8, 4  ;;  %s5384_s9 = int_to_ptr.vmem [resolvable:$true] %s5383_s9 }
 0x482   :  { %v4929_v46 = vpop.f32.mrf.mxu1 }
 0x483   :  { %v4930_v60 = vadd.f32 %v4929_v46, %v4893_v39 }
 0x485   :  { %v4970_v47 = vpop.f32.mrf.mxu2  ;;  %v5277_v3 = vmul.f32 %v4930_v60, %v8093_v21 }
 0x486   :  { %v4971_v55 = vadd.f32 %v4970_v47, %v3225_v63 }
 0x487   :  { %v5290_v53 = vmul.f32 %v5277_v3, %v4930_v60  ;;  %v5282_v50 = vadd.f32 %v5281_v44, %v5277_v3 }
 0x488   :  { %v5071_v32 = vpop.f32.mrf.mxu3 }
 0x489   :  { %v5072_v14 = vadd.f32 %v5071_v32, %v4971_v55  ;;  %v5295_v9 = vadd.f32 %v5294_v57, %v5290_v53 }
 0x48c   :  { %v5125_v61 = vpop.f32.mrf.mxu0 }
 0x48d   :  { %v5126_v43 = vadd.f32 %v5125_v61, %v5072_v14 }
 0x494   :  { %v5164_v56 = vpop.f32.mrf.mxu1 }
 0x495   :  { %v5165_v26 = vadd.f32 %v5164_v56, %v5126_v43 }
 0x496   :  { %v5233_v37 = vpop.f32.mrf.mxu2 }
 0x497   :  { %v5234_v54 = vadd.f32 %v5233_v37, %v5165_v26  ;;  %v5361_v26 = vld [vmem:[#allocation4 + $0x10] sm:$0xff]  ;;  %v5363_v37 = vld [vmem:[#allocation4 + $0x20] sm:$0xff] }
 0x49a   :  { %v5270_v63 = vpop.f32.mrf.mxu3 }
 0x49b   :  { %v5271_v18 = vadd.f32 %v5270_v63, %v5234_v54  ;;  %v5365_v54 = vld [vmem:[#allocation4 + $0x30] sm:$0xff] }
 0x49d   :  { %v5278_v62 = vmul.f32 %v5271_v18, %v8094_v19 }
 0x49f   :  { %v5283_v41 = vadd.f32 %v5282_v50, %v5278_v62  ;;  %v5291_v58 = vmul.f32 %v5278_v62, %v5271_v18 }
 0x4a1   :  { %5284 = vadd.xlane.f32.xlu2 %v5283_v41  ;;  %v5296_v33 = vadd.f32 %v5295_v9, %v5291_v58 }
 0x4a3   :  { %5297 = vadd.xlane.f32.xlu1 %v5296_v33 }
 0x514   :  { %v5285_v28 = vpop.xlane.xlu2 %5284 }
 0x515   :  { %v5299_v5 = vmul.f32 0.001953125, %v5285_v28 }
 0x516   :  { %v5298_v45 = vpop.xlane.xlu1 %5297 }
 0x517   :  { %v5301_v4 = vmul.f32 %v5299_v5, %v5299_v5  ;;  %v5300_v38 = vmul.f32 0.001953125, %v5298_v45 }
 0x519   :  { %v5302_v40 = vsub.f32 %v5300_v38, %v5301_v4 }
 0x51b   :  { %v5303_v17 = vmax.f32 %v5302_v40, 0.0 }
 0x51d   :  { %v5305_v42 = vadd.f32 1e-05, %v5303_v17 }
 0x51f   :  { %5411 = vrsqrt.f32 %v5305_v42  ;;  %vm5312_vm1 = vweird.f32 %v5305_v42 }
 0x525   :  { %v5412_v10 = vpop.eup %5411 }
 0x526   :  { %v5307_v49 = vmul.f32 %v5412_v10, %v5305_v42  ;;  %vm5313_vm0 = vweird.f32 %v5412_v10 }
 0x527   :  { %vm5314_vm2 = vmor %vm5312_vm1, %vm5313_vm0 }
 0x528   :  { %v5308_v7 = vmul.f32 %v5412_v10, %v5307_v49 }
 0x52a   :  { %v5309_v35 = vmul.f32 0.5, %v5308_v7 }
 0x52c   :  { %v5310_v51 = vsub.f32 1.5, %v5309_v35 }
 0x52e   :  { %v5311_v47 = vmul.f32 %v5412_v10, %v5310_v51 }
 0x530   :  { %v5315_v36 = vsel %vm5314_vm2, %v5412_v10, %v5311_v47 }
 0x531   :  { %v5316_v34 = vmul.f32 %v5315_v36, %v5304_v25 }
 0x533   :  { %5322 = vperm.xlu0 %5408, %v5316_v34   ;;  %v5318_v31 = vmul.f32 %v5316_v34, %v5299_v5 }
 0x535   :  { %v5319_v52 = vsub.f32 %v5317_v13, %v5318_v31 }
 0x53b   :  { %5333 = vperm.xlu0 %5408, %v5319_v52  }
 0x5a5   :  { %v5323_v55 = vpop.permute.xlu0 %5322 }
 0x5a6   :  { %v5325_v46 = vmul.f32 %v5323_v55, %v7981_v12  ;;  %v5326_v32 = vmul.f32 %v5323_v55, %v7979_v27  ;;  %v5327_v24 = vmul.f32 %v5323_v55, %v7983_v6  ;;  %v5328_v39 = vmul.f32 %v5323_v55, %v4589_v15 }
 0x5a7   :  { %v5329_v14 = vmul.f32 %v5323_v55, %v4930_v60  ;;  %v5330_v61 = vmul.f32 %v5323_v55, %v5271_v18 }
 0x5ad   :  { %v5334_v59 = vpop.permute.xlu0 %5333 }
 0x5ae   :  { %v5336_v2 = vadd.f32 %v5334_v59, %v5325_v46  ;;  %v5337_v16 = vadd.f32 %v5334_v59, %v5326_v32  ;;  %v5338_v43 = vadd.f32 %v5334_v59, %v5327_v24  ;;  %v5339_v56 = vadd.f32 %v5334_v59, %v5328_v39 }
 0x5af   :  { %v5340_v11 = vadd.f32 %v5334_v59, %v5329_v14  ;;  %v5341_v30 = vadd.f32 %v5334_v59, %v5330_v61 }
 0x5b0   :  { %vm5342_vm3 = vcmp.gt.f32.partialorder %v5336_v2, 0.0  ;;  %vm5343_vm4 = vcmp.gt.f32.partialorder %v5337_v16, 0.0  ;;  %vm5344_vm5 = vcmp.gt.f32.partialorder %v5338_v43, 0.0  ;;  %vm5345_vm6 = vcmp.gt.f32.partialorder %v5339_v56, 0.0 }
 0x5b1   :  { %vm5346_vm7 = vcmp.gt.f32.partialorder %v5340_v11, 0.0  ;;  %vm5347_vm9 = vcmp.gt.f32.partialorder %v5341_v30, 0.0  ;;  %v5348_v27 = vmul.f32 0.01, %v5336_v2  ;;  %v5349_v12 = vmul.f32 0.01, %v5337_v16 }
 0x5b2   :  { %v5350_v6 = vmul.f32 0.01, %v5338_v43  ;;  %v5351_v15 = vmul.f32 0.01, %v5339_v56  ;;  %v5352_v60 = vmul.f32 0.01, %v5340_v11 }
 0x5b3   :  { %v5353_v23 = vmul.f32 0.01, %v5341_v30  ;;  %v5354_v21 = vsel %vm5342_vm3, %v5336_v2, %v5348_v27  ;;  %v5355_v3 = vsel %vm5343_vm4, %v5337_v16, %v5349_v12 }
 0x5b4   :  { %v5356_v20 = vsel %vm5344_vm5, %v5338_v43, %v5350_v6  ;;  %v5357_v0 = vsel %vm5345_vm6, %v5339_v56, %v5351_v15  ;;  %v5358_v1 = vsel %vm5346_vm7, %v5340_v11, %v5352_v60  ;;  %v5366_v63 = vadd.f32 %v5360_v48, %v5354_v21 }
 0x5b5   :  { %v5359_v22 = vsel %vm5347_vm9, %v5341_v30, %v5353_v23  ;;  %v5367_v53 = vadd.f32 %v5361_v26, %v5355_v3  ;;  %v5368_v18 = vadd.f32 %v5362_v8, %v5356_v20  ;;  %v5369_v44 = vadd.f32 %v5363_v37, %v5357_v0 }
 0x5b6   :  { %v5370_v19 = vadd.f32 %v5364_v29, %v5358_v1  ;;  %5372 = vst [vmem:[#allocation7] sm:$0xff] %v5366_v63  ;;  %v5371_v62 = vadd.f32 %v5365_v54, %v5359_v22 }
 0x5b7   :  { %5373 = vst [vmem:[#allocation7 + $0x8] sm:$0xff] %v5367_v53 }
 0x5b8   :  { %5374 = vst [vmem:[#allocation7 + $0x10] sm:$0xff] %v5368_v18 }
 0x5b9   :  { %5375 = vst [vmem:[#allocation7 + $0x18] sm:$0xff] %v5369_v44 }
 0x5ba   :  { %5376 = vst [vmem:[#allocation7 + $0x20] sm:$0xff] %v5370_v19 }
 0x5bb   :  { %5377 = vst [vmem:[#allocation7 + $0x28] sm:$0xff] %v5371_v62 }
 0x5bc   :  { %5388 = dma.vmem_to_hbm [thread:$0]  %s5384_s9, 768, %s5386_s18, [#allocation6]  }
 0x5bd   :  { %5463 = dma.done.wait [#allocation6], 768  }
 0x5be   :  { %5464 = vsyncadd [#allocation6], 4294966528 }
 0x5bf   :  { %5393 = vsyncpa [#allocation5], 1 }
 0x5c0   :  { %5394 = vsyncpa [#allocation6], 1 }

// kernel: tpu_custom_call.1
= control target key start
LH: loop header
LB: loop body
LE: loop exit
PB: predicated region body
PF: predicated region fallthrough
CT: control target
= control target key end

     0   :  { %15 = vsyncpa [#allocation5], 0  ;;  %s2376_s0 = inlined_call_operand.hbm [shape: f32[8,1024], index: 0, kind: input, shape index: {}]   ;;  %s2377_s1 = inlined_call_operand.vmem [shape: f32[1,768], index: 1, kind: input, shape index: {}]   ;;  %s2378_s2 = inlined_call_operand.vmem [shape: f32[8,128], index: 2, kind: input, shape index: {}]   ;;  %s2379_s3 = inlined_call_operand.vmem [shape: f32[8,1], index: 3, kind: input, shape index: {}]   ;;  %s2380_s4 = inlined_call_operand.vmem [shape: f32[8,1], index: 4, kind: input, shape index: {}]   ;;  %s2381_s5 = inlined_call_operand.vmem [shape: f32[8,1], index: 5, kind: input, shape index: {}]   ;;  %s2382_s6 = inlined_call_operand.vmem [shape: f32[8,128], index: 6, kind: input, shape index: {}]   ;;  %s2383_s7 = inlined_call_operand.vmem [shape: f32[8,1], index: 7, kind: input, shape index: {}]   ;;  %s2384_s8 = inlined_call_operand.vmem [shape: f32[8,1], index: 8, kind: input, shape index: {}]   ;;  %s2385_s9 = inlined_call_operand.vmem [shape: f32[8,1], index: 9, kind: input, shape index: {}]   ;;  %s2386_s10 = inlined_call_operand.hbm [shape: f32[8,768], index: 10, kind: output, shape index: {}]  }
   0x1   :  { %16 = vsyncpa [#allocation6], 0  ;;  %s22_s15 = sshll.u32 %s2376_s0, 4  ;;  %s1853_s16 = smov [#allocation4]   ;;  %s23_s15 = int_to_ptr.hbm [resolvable:$true] %s22_s15 }
   0x2   :  { %s24_s17 = sshll.u32 %s1853_s16, 4  ;;  %s25_s17 = int_to_ptr.vmem [resolvable:$true] %s24_s17 }
   0x3   :  { %27 = dma.hbm_to_vmem [thread:$0]  %s23_s15, 1024, %s25_s17, [#allocation5]  }
   0x4   :  { %1849 = dma.done.wait [#allocation5], 1024  }
   0x5   :  { %1850 = vsyncadd [#allocation5], 4294966272  ;;  %v1923_v0 = vld [vmem:[#allocation4 + $0x18] sm:$0xff]  ;;  %v1925_v1 = vld [vmem:[#allocation4 + $0x20] sm:$0xff]  ;;  %s1854_s0 = smov 109   ;;  %s1855_s18 = smov 111  }
   0x6   :  { %v1927_v2 = vld [vmem:[#allocation4 + $0x8] sm:$0xff]  ;;  %v1555_v3 = vpack.i.bf16 %v1925_v1, %v1923_v0  ;;  %v1931_v4 = vld [vmem:[#allocation4 + $0x10] sm:$0xff]  ;;  %s1856_s19 = smov 110   ;;  %s1857_s20 = smov 127   ;;  %v234_v9 = vld [vmem:[#allocation4] sm:$0xff]  ;;  %vm462_vm0 = vcmask 891904  }
   0x7   :  { %v1565_v5 = vpack.i.bf16 %v1931_v4, %v1927_v2  ;;  %v1938_v6 = vld [vmem:[#allocation4 + $0x28] sm:$0xff]  ;;  %v1940_v7 = vld [vmem:[#allocation4 + $0x30] sm:$0xff]  ;;  %v1615_v10 = vpack.i.bf16 %v1923_v0, %v1931_v4  ;;  %v1625_v11 = vpack.i.bf16 %v1927_v2, %v234_v9  ;;  %s1858_s21 = smov 1   ;;  %s1859_s22 = smov 17   ;;  %v440_v13 = vld [vmem:[#allocation4 + $0x38] sm:$0xff]  ;;  %vm415_vm1 = vcmask 900096  }
   0x8   :  { %1556 = vrot.lane.b32.xlu0 %v1555_v3, %s1854_s0  ;;  %1576 = vrot.lane.b32.xlu2 %v1555_v3, %s1855_s18  ;;  %v1570_v8 = vpack.i.bf16 %v1940_v7, %v1938_v6  ;;  %v1630_v12 = vpack.i.bf16 %v1938_v6, %v1925_v1  ;;  %s1860_s23 = smov 18   ;;  %s1861_s24 = smov 19   ;;  %vm368_vm2 = vcmask 908288   ;;  %vm321_vm3 = vcmask 1039360  }
   0x9   :  { %1566 = vrot.lane.b32.xlu1 %v1565_v5, %s1854_s0  ;;  %vm262_vm4 = vcmask 7168   ;;  %vm215_vm5 = vcmask 138240   ;;  %vm168_vm6 = vcmask 146432   ;;  %vm121_vm7 = vcmask 154624  }
  0x10   :  { %1561 = vrot.lane.b32.xlu0 %v1555_v3, %s1856_s19  ;;  %1581 = vrot.lane.b32.xlu2 %v1565_v5, %s1856_s19 }
  0x11   :  { %1571 = vrot.lane.b32.xlu1 %v1570_v8, %s1854_s0 }
  0x18   :  { %1586 = vrot.lane.b32.xlu0 %v1570_v8, %s1856_s19  ;;  %1596 = vrot.lane.b32.xlu2 %v1565_v5, %s1855_s18 }
  0x19   :  { %1591 = vrot.lane.b32.xlu1 %v1555_v3, %s1857_s20 }
  0x20   :  { %1601 = vrot.lane.b32.xlu0 %v1570_v8, %s1855_s18  ;;  %1611 = vrot.lane.b32.xlu2 %v1570_v8, %s1857_s20 }
  0x21   :  { %1606 = vrot.lane.b32.xlu1 %v1565_v5, %s1857_s20 }
  0x28   :  { %1616 = vrot.lane.b32.xlu0 %v1615_v10, %s1858_s21  ;;  %1626 = vrot.lane.b32.xlu2 %v1625_v11, %s1858_s21 }
  0x29   :  { %1621 = vrot.lane.b32.xlu1 %v1615_v10, %s1859_s22 }
  0x30   :  { %1631 = vrot.lane.b32.xlu0 %v1630_v12, %s1858_s21  ;;  %1636 = vrot.lane.b32.xlu2 %v1615_v10, %s1860_s23 }
  0x31   :  { %460 = vrot.lane.b32.xlu1 %v440_v13, %s1854_s0 }
  0x38   :  { %1641 = vrot.lane.b32.xlu0 %v1625_v11, %s1859_s22  ;;  %413 = vrot.lane.b32.xlu2 %v440_v13, %s1856_s19 }
  0x39   :  { %1646 = vrot.lane.b32.xlu1 %v1630_v12, %s1859_s22 }
  0x40   :  { %1651 = vrot.lane.b32.xlu0 %v1615_v10, %s1861_s24  ;;  %1661 = vrot.lane.b32.xlu2 %v1630_v12, %s1860_s23 }
  0x41   :  { %1656 = vrot.lane.b32.xlu1 %v1625_v11, %s1860_s23 }
  0x48   :  { %366 = vrot.lane.b32.xlu0 %v440_v13, %s1855_s18  ;;  %115 = vrot.lane.b32.xlu2 %v1925_v1, %s1861_s24 }
  0x49   :  { %1666 = vrot.lane.b32.xlu1 %v1625_v11, %s1861_s24 }
  0x50   :  { %319 = vrot.lane.b32.xlu0 %v440_v13, %s1857_s20  ;;  %213 = vrot.lane.b32.xlu2 %v1940_v7, %s1859_s22 }
  0x51   :  { %260 = vrot.lane.b32.xlu1 %v1940_v7, %s1858_s21 }
  0x58   :  { %1671 = vrot.lane.b32.xlu0 %v1570_v8, %s1861_s24 }
  0x59   :  { %166 = vrot.lane.b32.xlu1 %v1940_v7, %s1860_s23 }
  0x62   :  { %v1982_v14 = vpop.permute.xlu2 %1576 }
  0x63   :  { %v1579_v32 = vunpack.i.h.bf16 %v1982_v14  ;;  %v1578_v33 = vunpack.i.l.bf16 %v1982_v14 }
  0x65   :  { %v371_v43 = vsel %vm368_vm2, %v1578_v33, %v1579_v32 }
  0x6a   :  { %v1582_v15 = vpop.permute.xlu2 %1581 }
  0x6b   :  { %v1583_v17 = vunpack.i.l.bf16 %v1582_v15  ;;  %v1584_v22 = vunpack.i.h.bf16 %v1582_v15 }
  0x6d   :  { %v416_v30 = vsel %vm415_vm1, %v1583_v17, %v1584_v22 }
  0x72   :  { %v1597_v16 = vpop.permute.xlu2 %1596 }
  0x73   :  { %v1598_v23 = vunpack.i.l.bf16 %v1597_v16  ;;  %v1599_v27 = vunpack.i.h.bf16 %v1597_v16 }
  0x75   :  { %v369_v31 = vsel %vm368_vm2, %v1598_v23, %v1599_v27  ;;  %v370_v42 = vsel %vm368_vm2, %v1599_v27, %v1578_v33  ;;  %v578_v33 = vld [vmem:[%s2379_s3] sm:$0xff] }
  0x7a   :  { %v1557_v18 = vpop.permute.xlu0 %1556  ;;  %v1991_v35 = vpop.permute.xlu2 %1611 }
  0x7b   :  { %v1559_v19 = vunpack.i.h.bf16 %v1557_v18  ;;  %v1558_v20 = vunpack.i.l.bf16 %v1557_v18  ;;  %v1567_v21 = vpop.permute.xlu1 %1566  ;;  %v1613_v54 = vunpack.i.l.bf16 %v1991_v35 }
  0x7c   :  { %v1569_v24 = vunpack.i.h.bf16 %v1567_v21  ;;  %v1568_v25 = vunpack.i.l.bf16 %v1567_v21 }
  0x7d   :  { %v465_v26 = vsel %vm462_vm0, %v1558_v20, %v1559_v19 }
  0x7e   :  { %v463_v28 = vsel %vm462_vm0, %v1568_v25, %v1569_v24  ;;  %v464_v29 = vsel %vm462_vm0, %v1569_v24, %v1558_v20  ;;  %631 = vmatpush.msra.mxu2 %v465_v26 }
  0x7f   :  { %591 = vmatpush.msra.mxu0 %v463_v28  ;;  %611 = vmatpush.msra.mxu1 %v464_v29 }
  0x81   :  { %592 = vmatpush.msra.mxu0 %v416_v30 }
  0x82   :  { %v1562_v34 = vpop.permute.xlu0 %1561  ;;  %v1627_v50 = vpop.permute.xlu2 %1626 }
  0x83   :  { %v1993_v36 = vpop.permute.xlu1 %1571  ;;  %v1564_v37 = vunpack.i.h.bf16 %v1562_v34  ;;  %v1563_v38 = vunpack.i.l.bf16 %v1562_v34  ;;  %593 = vmatpush.msra.mxu0 %v369_v31  ;;  %v1628_v57 = vunpack.i.l.bf16 %v1627_v50  ;;  %v1629_v61 = vunpack.i.h.bf16 %v1627_v50 }
  0x84   :  { %v1573_v39 = vunpack.i.l.bf16 %v1993_v36 }
  0x85   :  { %v417_v40 = vsel %vm415_vm1, %v1584_v22, %v1563_v38  ;;  %v418_v41 = vsel %vm415_vm1, %v1563_v38, %v1564_v37  ;;  %v263_v5 = vsel %vm262_vm4, %v1628_v57, %v1629_v61 }
  0x86   :  { %612 = vmatpush.msra.mxu1 %v417_v40  ;;  %632 = vmatpush.msra.mxu2 %v418_v41  ;;  %v466_v44 = vsel %vm462_vm0, %v1559_v19, %v1573_v39 }
  0x87   :  { %651 = vmatpush.msra.mxu3 %v466_v44 }
  0x88   :  { %613 = vmatpush.msra.mxu1 %v370_v42  ;;  %633 = vmatpush.msra.mxu2 %v371_v43 }
  0x8a   :  { %v2003_v45 = vpop.permute.xlu0 %1586 }
  0x8b   :  { %v1588_v46 = vunpack.i.l.bf16 %v2003_v45  ;;  %v1592_v47 = vpop.permute.xlu1 %1591 }
  0x8c   :  { %v1594_v48 = vunpack.i.h.bf16 %v1592_v47  ;;  %v1593_v49 = vunpack.i.l.bf16 %v1592_v47 }
  0x8d   :  { %v419_v51 = vsel %vm415_vm1, %v1564_v37, %v1588_v46  ;;  %v1862_v37 = vmov 0  }
  0x8e   :  { %v324_v52 = vsel %vm321_vm3, %v1593_v49, %v1594_v48  ;;  %652 = vmatpush.msra.mxu3 %v419_v51  ;;  %v325_v3 = vsel %vm321_vm3, %v1594_v48, %v1613_v54  ;;  %1675 = vset.pattern.permute.xlu2 %v1862_v37 }
  0x8f   :  { %634 = vmatpush.msra.mxu2 %v324_v52  ;;  %1796 = vset.pattern.permute.xlu0 %v1862_v37 }
  0x90   :  { %581 = vperm.xlu2 %1675, %v578_v33  }
  0x91   :  { %635 = vmatpush.msra.mxu2 %v1923_v0  ;;  %v2020_v0 = vpop.permute.xlu2 %1636 }
  0x92   :  { %v2011_v53 = vpop.permute.xlu0 %1601  ;;  %v1639_v9 = vunpack.i.h.bf16 %v2020_v0  ;;  %v1638_v10 = vunpack.i.l.bf16 %v2020_v0 }
  0x93   :  { %v1603_v55 = vunpack.i.l.bf16 %v2011_v53  ;;  %v1607_v56 = vpop.permute.xlu1 %1606 }
  0x94   :  { %v1609_v58 = vunpack.i.h.bf16 %v1607_v56  ;;  %v1608_v59 = vunpack.i.l.bf16 %v1607_v56  ;;  %v1574_v56 = vunpack.i.h.bf16 %v1993_v36 }
  0x95   :  { %v372_v60 = vsel %vm368_vm2, %v1579_v32, %v1603_v55 }
  0x96   :  { %v322_v62 = vsel %vm321_vm3, %v1608_v59, %v1609_v58  ;;  %v323_v63 = vsel %vm321_vm3, %v1609_v58, %v1593_v49  ;;  %653 = vmatpush.msra.mxu3 %v372_v60  ;;  %v2068_v49 = vld [vmem:[%s2378_s2] sm:$0xff]  ;;  %v1589_v60 = vunpack.i.h.bf16 %v2003_v45  ;;  %v467_v0 = vsel %vm462_vm0, %v1573_v39, %v1574_v56 }
  0x97   :  { %594 = vmatpush.msra.mxu0 %v322_v62  ;;  %614 = vmatpush.msra.mxu1 %v323_v63  ;;  %v1604_v63 = vunpack.i.h.bf16 %v2011_v53 }
  0x98   :  { %654 = vmatpush.msra.mxu3 %v325_v3 }
  0x99   :  { %615 = vmatpush.msra.mxu1 %v1931_v4  ;;  %595 = vmatpush.msra.mxu0 %v1927_v2  ;;  %v171_v2 = vsel %vm168_vm6, %v1638_v10, %v1639_v9  ;;  %v2035_v17 = vpop.permute.xlu2 %413 }
  0x9a   :  { %v1617_v8 = vpop.permute.xlu0 %1616  ;;  %655 = vmatpush.msra.mxu3 %v1925_v1 }
  0x9b   :  { %v1619_v11 = vunpack.i.h.bf16 %v1617_v8  ;;  %v1618_v12 = vunpack.i.l.bf16 %v1617_v8  ;;  %v1622_v13 = vpop.permute.xlu1 %1621  ;;  %596 = vmatpush.msra.mxu0 %v263_v5  ;;  %v1614_v5 = vunpack.i.h.bf16 %v1991_v35  ;;  %v420_v8 = vsel %vm415_vm1, %v1588_v46, %v1589_v60 }
  0x9c   :  { %v1624_v14 = vunpack.i.h.bf16 %v1622_v13  ;;  %v1623_v15 = vunpack.i.l.bf16 %v1622_v13 }
  0x9d   :  { %v265_v16 = vsel %vm262_vm4, %v1618_v12, %v1619_v11  ;;  %v264_v4 = vsel %vm262_vm4, %v1629_v61, %v1618_v12  ;;  %v326_v12 = vsel %vm321_vm3, %v1613_v54, %v1614_v5 }
  0x9e   :  { %636 = vmatpush.msra.mxu2 %v265_v16  ;;  %616 = vmatpush.msra.mxu1 %v264_v4  ;;  %v218_v1 = vsel %vm215_vm5, %v1623_v15, %v1624_v14 }
  0xa0   :  { %637 = vmatpush.msra.mxu2 %v218_v1 }
  0xa1   :  { %v2043_v22 = vpop.permute.xlu2 %1661 }
  0xa2   :  { %v2037_v18 = vpop.permute.xlu0 %1631  ;;  %638 = vmatpush.msra.mxu2 %v171_v2  ;;  %v1663_v23 = vunpack.i.l.bf16 %v2043_v22  ;;  %v1664_v53 = vunpack.i.h.bf16 %v2043_v22 }
  0xa3   :  { %v1633_v19 = vunpack.i.l.bf16 %v2037_v18  ;;  %v461_v20 = vpop.permute.xlu1 %460  ;;  %v1634_v46 = vunpack.i.h.bf16 %v2037_v18 }
  0xa4   :  { %v172_v32 = vsel %vm168_vm6, %v1639_v9, %v1663_v23  ;;  %v468_v3 = vsel %vm462_vm0, %v1574_v56, %v461_v20  ;;  %v421_v9 = vsel %vm415_vm1, %v1589_v60, %v2035_v17  ;;  %v173_v2 = vsel %vm168_vm6, %v1663_v23, %v1664_v53  ;;  %v50_v20 = vld [vmem:[%s2377_s1] sm:$0x3f] }
  0xa5   :  { %v266_v21 = vsel %vm262_vm4, %v1619_v11, %v1633_v19  ;;  %v2140_v33 = vperm.slane %v50_v20, 3 }
  0xa6   :  { %656 = vmatpush.msra.mxu3 %v266_v21 }
  0xa9   :  { %v2060_v42 = vpop.permute.xlu2 %115 }
  0xaa   :  { %v1642_v24 = vpop.permute.xlu0 %1641 }
  0xab   :  { %v2046_v25 = vpop.permute.xlu1 %1646  ;;  %v1644_v26 = vunpack.i.h.bf16 %v1642_v24  ;;  %v1643_v27 = vunpack.i.l.bf16 %v1642_v24  ;;  %v2126_v24 = vperm.slane %v50_v20, 0 }
  0xac   :  { %v1648_v28 = vunpack.i.l.bf16 %v2046_v25  ;;  %v1649_v13 = vunpack.i.h.bf16 %v2046_v25 }
  0xad   :  { %v217_v29 = vsel %vm215_vm5, %v1644_v26, %v1623_v15  ;;  %v216_v30 = vsel %vm215_vm5, %v1643_v27, %v1644_v26  ;;  %v2130_v26 = vperm.slane %v50_v20, 1 }
  0xae   :  { %617 = vmatpush.msra.mxu1 %v217_v29  ;;  %v219_v31 = vsel %vm215_vm5, %v1624_v14, %v1648_v28  ;;  %597 = vmatpush.msra.mxu0 %v216_v30 }
  0xaf   :  { %657 = vmatpush.msra.mxu3 %v219_v31  ;;  %v2138_v31 = vperm.slane %v50_v20, 2 }
  0xb1   :  { %658 = vmatpush.msra.mxu3 %v172_v32  ;;  %v214_v14 = vpop.permute.xlu2 %213 }
  0xb2   :  { %v1652_v34 = vpop.permute.xlu0 %1651 }
  0xb3   :  { %v1657_v38 = vpop.permute.xlu1 %1656  ;;  %v1654_v40 = vunpack.i.h.bf16 %v1652_v34  ;;  %v1653_v41 = vunpack.i.l.bf16 %v1652_v34 }
  0xb4   :  { %v1659_v43 = vunpack.i.h.bf16 %v1657_v38  ;;  %v1658_v44 = vunpack.i.l.bf16 %v1657_v38 }
  0xb5   :  { %v124_v47 = vsel %vm121_vm7, %v1653_v41, %v1654_v40  ;;  %v125_v48 = vsel %vm121_vm7, %v1654_v40, %v2060_v42 }
  0xb6   :  { %v169_v50 = vsel %vm168_vm6, %v1658_v44, %v1659_v43  ;;  %v170_v51 = vsel %vm168_vm6, %v1659_v43, %v1638_v10  ;;  %639 = vmatpush.msra.mxu2 %v124_v47  ;;  %659 = vmatpush.msra.mxu3 %v125_v48  ;;  %v373_v10 = vsel %vm368_vm2, %v1603_v55, %v1604_v63  ;;  %v2148_v48 = vperm.slane %v50_v20, 4 }
  0xb7   :  { %598 = vmatpush.msra.mxu0 %v169_v50  ;;  %618 = vmatpush.msra.mxu1 %v170_v51  ;;  %v267_v55 = vsel %vm262_vm4, %v1633_v19, %v1634_v46 }
  0xb8   :  { %640 = vmatmul.f32.vlgmr.msra.gmra.mxu2 %v2068_v49  ;;  %660 = vmatmul.f32.vlgmr.msra.gmra.mxu3 %v2068_v49 }
  0xba   :  { %v367_v52 = vpop.permute.xlu0 %366 }
  0xbb   :  { %v1667_v57 = vpop.permute.xlu1 %1666  ;;  %v374_v11 = vsel %vm368_vm2, %v1604_v63, %v367_v52 }
  0xbc   :  { %v1669_v58 = vunpack.i.h.bf16 %v1667_v57  ;;  %v1668_v59 = vunpack.i.l.bf16 %v1667_v57 }
  0xbe   :  { %v122_v61 = vsel %vm121_vm7, %v1668_v59, %v1669_v58  ;;  %v123_v62 = vsel %vm121_vm7, %v1669_v58, %v1653_v41 }
  0xbf   :  { %599 = vmatpush.msra.mxu0 %v122_v61  ;;  %619 = vmatpush.msra.mxu1 %v123_v62 }
  0xc0   :  { %600 = vmatmul.f32.vlgmr.msra.gmra.mxu0 %v2068_v49  ;;  %620 = vmatmul.f32.vlgmr.msra.gmra.mxu1 %v2068_v49 }
  0xc1   :  { %671 = vmatpush.msrb.mxu0 %v467_v0  ;;  %691 = vmatpush.msrb.mxu1 %v468_v3 }
  0xc2   :  { %v320_v36 = vpop.permute.xlu0 %319 }
  0xc3   :  { %672 = vmatpush.msrb.mxu0 %v420_v8  ;;  %692 = vmatpush.msrb.mxu1 %v421_v9  ;;  %v261_v39 = vpop.permute.xlu1 %260  ;;  %v327_v45 = vsel %vm321_vm3, %v1614_v5, %v320_v36  ;;  %v1863_v36 = vmov 0.0  }
  0xc4   :  { %v268_v15 = vsel %vm262_vm4, %v1634_v46, %v261_v39  ;;  %1132 = vrot.lane.b32.xlu2 %v1863_v36, %s1856_s19 }
  0xc5   :  { %673 = vmatpush.msrb.mxu0 %v373_v10  ;;  %693 = vmatpush.msrb.mxu1 %v374_v11 }
  0xc7   :  { %674 = vmatpush.msrb.mxu0 %v326_v12  ;;  %694 = vmatpush.msrb.mxu1 %v327_v45 }
  0xc9   :  { %675 = vmatpush.msrb.mxu0 %v1938_v6  ;;  %695 = vmatpush.msrb.mxu1 %v1940_v7  ;;  %v220_v6 = vsel %vm215_vm5, %v1648_v28, %v1649_v13  ;;  %v221_v7 = vsel %vm215_vm5, %v1649_v13, %v214_v14 }
  0xca   :  { %v1672_v35 = vpop.permute.xlu0 %1671 }
  0xcb   :  { %676 = vmatpush.msrb.mxu0 %v267_v55  ;;  %696 = vmatpush.msrb.mxu1 %v268_v15  ;;  %v1674_v54 = vunpack.i.h.bf16 %v1672_v35  ;;  %v1673_v16 = vunpack.i.l.bf16 %v1672_v35  ;;  %v167_v4 = vpop.permute.xlu1 %166 }
  0xcc   :  { %v174_v1 = vsel %vm168_vm6, %v1664_v53, %v167_v4 }
  0xcd   :  { %677 = vmatpush.msrb.mxu0 %v220_v6  ;;  %697 = vmatpush.msrb.mxu1 %v221_v7  ;;  %v126_v17 = vsel %vm121_vm7, %v2060_v42, %v1673_v16  ;;  %v127_v18 = vsel %vm121_vm7, %v1673_v16, %v1674_v54  ;;  %v748_v16 = vld [vmem:[%s2380_s4] sm:$0xff] }
  0xcf   :  { %678 = vmatpush.msrb.mxu0 %v173_v2  ;;  %698 = vmatpush.msrb.mxu1 %v174_v1  ;;  %v761_v2 = vld [vmem:[%s2381_s5] sm:$0xff] }
  0xd1   :  { %679 = vmatpush.msrb.mxu0 %v126_v17  ;;  %699 = vmatpush.msrb.mxu1 %v127_v18 }
  0xd2   :  { %680 = vmatmul.f32.vlgmr.msrb.gmra.mxu0 %v2068_v49  ;;  %700 = vmatmul.f32.vlgmr.msrb.gmra.mxu1 %v2068_v49  ;;  %v2150_v49 = vperm.slane %v50_v20, 5 }
  0xea   :  { %v582_v19 = vpop.permute.xlu2 %581 }
 0x11e   :  { %v2168_v18 = vpop.permute.xlu2 %1132 }
 0x13b   :  { %v641_v27 = vpop.f32.mrf.mxu2  ;;  %v661_v32 = vpop.f32.mrf.mxu3 }
 0x13c   :  { %v2136_v30 = vadd.f32 %v641_v27, %v582_v19  ;;  %v662_v40 = vadd.f32 %v661_v32, %v582_v19 }
 0x13d   :  { %v601_v21 = vpop.f32.mrf.mxu0  ;;  %v621_v22 = vpop.f32.mrf.mxu1 }
 0x13e   :  { %v2124_v23 = vadd.f32 %v601_v21, %v582_v19  ;;  %v2128_v25 = vadd.f32 %v621_v22, %v582_v19  ;;  %v719_v38 = vmul.f32 %v2138_v31, %v2136_v30  ;;  %v720_v44 = vmul.f32 %v2140_v33, %v662_v40 }
 0x140   :  { %v717_v28 = vmul.f32 %v2126_v24, %v2124_v23  ;;  %v718_v29 = vmul.f32 %v2130_v26, %v2128_v25  ;;  %v732_v43 = vmul.f32 %v719_v38, %v2136_v30  ;;  %v733_v56 = vmul.f32 %v720_v44, %v662_v40 }
 0x142   :  { %v730_v34 = vmul.f32 %v717_v28, %v2124_v23  ;;  %v731_v37 = vmul.f32 %v718_v29, %v2128_v25  ;;  %v723_v41 = vadd.f32 %v718_v29, %v717_v28 }
 0x144   :  { %v736_v42 = vadd.f32 %v731_v37, %v730_v34  ;;  %v724_v47 = vadd.f32 %v723_v41, %v719_v38 }
 0x146   :  { %v737_v52 = vadd.f32 %v736_v42, %v732_v43  ;;  %v725_v61 = vadd.f32 %v724_v47, %v720_v44 }
 0x148   :  { %v738_v0 = vadd.f32 %v737_v52, %v733_v56 }
 0x14f   :  { %v681_v50 = vpop.f32.mrf.mxu0  ;;  %v701_v51 = vpop.f32.mrf.mxu1 }
 0x150   :  { %v682_v57 = vadd.f32 %v681_v50, %v582_v19  ;;  %v702_v58 = vadd.f32 %v701_v51, %v582_v19 }
 0x152   :  { %v721_v59 = vmul.f32 %v2148_v48, %v682_v57  ;;  %v722_v60 = vmul.f32 %v2150_v49, %v702_v58 }
 0x154   :  { %v734_v62 = vmul.f32 %v721_v59, %v682_v57  ;;  %v726_v63 = vadd.f32 %v725_v61, %v721_v59  ;;  %v735_v5 = vmul.f32 %v722_v60, %v702_v58 }
 0x156   :  { %v727_v3 = vadd.f32 %v726_v63, %v722_v60  ;;  %v739_v8 = vadd.f32 %v738_v0, %v734_v62 }
 0x158   :  { %728 = vadd.xlane.f32.xlu0 %v727_v3  ;;  %v740_v9 = vadd.f32 %v739_v8, %v735_v5 }
 0x15a   :  { %741 = vadd.xlane.f32.xlu1 %v740_v9 }
 0x16c   :  { %1178 = vrot.lane.b32.xlu0 %v1863_v36, %s1854_s0 }
 0x173   :  { %1086 = vrot.lane.b32.xlu1 %v1863_v36, %s1855_s18 }
 0x17b   :  { %1040 = vrot.lane.b32.xlu1 %v1863_v36, %s1857_s20 }
 0x1cb   :  { %v729_v39 = vpop.xlane.xlu0 %728 }
 0x1cc   :  { %v743_v10 = vmul.f32 0.001953125, %v729_v39 }
 0x1cd   :  { %v742_v11 = vpop.xlane.xlu1 %741 }
 0x1ce   :  { %v745_v45 = vmul.f32 %v743_v10, %v743_v10  ;;  %v744_v46 = vmul.f32 0.001953125, %v742_v11 }
 0x1d0   :  { %v746_v12 = vsub.f32 %v744_v46, %v745_v45 }
 0x1d2   :  { %v747_v13 = vmax.f32 %v746_v12, 0.0 }
 0x1d4   :  { %v749_v14 = vadd.f32 1e-05, %v747_v13 }
 0x1d6   :  { %1797 = vrsqrt.f32 %v749_v14  ;;  %vm756_vm9 = vweird.f32 %v749_v14 }
 0x1dc   :  { %v1798_v53 = vpop.eup %1797 }
 0x1dd   :  { %v751_v55 = vmul.f32 %v1798_v53, %v749_v14  ;;  %vm757_vm8 = vweird.f32 %v1798_v53 }
 0x1de   :  { %vm758_vm10 = vmor %vm756_vm9, %vm757_vm8 }
 0x1df   :  { %v752_v15 = vmul.f32 %v1798_v53, %v751_v55 }
 0x1e1   :  { %v753_v35 = vmul.f32 0.5, %v752_v15 }
 0x1e3   :  { %v754_v54 = vsub.f32 1.5, %v753_v35  ;;  %v2241_v35 = vpop.permute.xlu0 %1178 }
 0x1e5   :  { %v755_v4 = vmul.f32 %v1798_v53, %v754_v54  ;;  %v2234_v12 = vpop.permute.xlu1 %1086 }
 0x1e7   :  { %v759_v6 = vsel %vm758_vm10, %v1798_v53, %v755_v4 }
 0x1e8   :  { %v760_v7 = vmul.f32 %v759_v6, %v748_v16 }
 0x1ea   :  { %766 = vperm.xlu2 %1675, %v760_v7   ;;  %v762_v1 = vmul.f32 %v760_v7, %v743_v10 }
 0x1ec   :  { %v763_v17 = vsub.f32 %v761_v2, %v762_v1 }
 0x1ed   :  { %v2239_v15 = vpop.permute.xlu1 %1040 }
 0x1f2   :  { %777 = vperm.xlu2 %1675, %v763_v17  }
 0x244   :  { %v767_v19 = vpop.permute.xlu2 %766 }
 0x245   :  { %v769_v20 = vmul.f32 %v767_v19, %v2124_v23  ;;  %v770_v21 = vmul.f32 %v767_v19, %v2128_v25  ;;  %v771_v22 = vmul.f32 %v767_v19, %v2136_v30  ;;  %v772_v27 = vmul.f32 %v767_v19, %v662_v40 }
 0x246   :  { %v773_v28 = vmul.f32 %v767_v19, %v682_v57  ;;  %v774_v32 = vmul.f32 %v767_v19, %v702_v58 }
 0x24c   :  { %v778_v29 = vpop.permute.xlu2 %777 }
 0x24d   :  { %v780_v34 = vadd.f32 %v778_v29, %v769_v20  ;;  %v781_v37 = vadd.f32 %v778_v29, %v770_v21  ;;  %v782_v38 = vadd.f32 %v778_v29, %v771_v22  ;;  %v783_v41 = vadd.f32 %v778_v29, %v772_v27 }
 0x24e   :  { %v784_v42 = vadd.f32 %v778_v29, %v773_v28  ;;  %v785_v43 = vadd.f32 %v778_v29, %v774_v32 }
 0x24f   :  { %vm786_vm11 = vcmp.gt.f32.partialorder %v780_v34, 0.0  ;;  %vm787_vm12 = vcmp.gt.f32.partialorder %v781_v37, 0.0  ;;  %vm788_vm13 = vcmp.gt.f32.partialorder %v782_v38, 0.0  ;;  %v792_v44 = vmul.f32 0.01, %v780_v34 }
 0x250   :  { %vm790_vm14 = vcmp.gt.f32.partialorder %v784_v42, 0.0  ;;  %v793_v23 = vmul.f32 0.01, %v781_v37  ;;  %v794_v47 = vmul.f32 0.01, %v782_v38  ;;  %vm789_vm15 = vcmp.gt.f32.partialorder %v783_v41, 0.0 }
 0x251   :  { %v796_v25 = vmul.f32 0.01, %v784_v42  ;;  %v795_v50 = vmul.f32 0.01, %v783_v41  ;;  %v798_v30 = vsel %vm786_vm11, %v780_v34, %v792_v44  ;;  %v797_v51 = vmul.f32 0.01, %v785_v43 }
 0x252   :  { %v799_v40 = vsel %vm787_vm12, %v781_v37, %v793_v23  ;;  %v800_v52 = vsel %vm788_vm13, %v782_v38, %v794_v47  ;;  %v2174_v57 = vmul.f32 %v798_v30, %v2126_v24  ;;  %vm791_vm8 = vcmp.gt.f32.partialorder %v785_v43, 0.0 }
 0x253   :  { %v802_v56 = vsel %vm790_vm14, %v784_v42, %v796_v25  ;;  %v2177_v58 = vmul.f32 %v799_v40, %v2130_v26  ;;  %v2180_v59 = vmul.f32 %v800_v52, %v2138_v31  ;;  %v801_v62 = vsel %vm789_vm15, %v783_v41, %v795_v50 }
 0x254   :  { %v2183_v60 = vmul.f32 %v802_v56, %v2148_v48  ;;  %v803_v63 = vsel %vm791_vm8, %v785_v43, %v797_v51  ;;  %v2193_v3 = vmul.f32 %v801_v62, %v2140_v33  ;;  %v1746_v39 = vpack.i.bf16 %v2174_v57, %v1863_v36 }
 0x255   :  { %v1701_v61 = vpack.i.bf16 %v2177_v58, %v2174_v57  ;;  %v2196_v5 = vmul.f32 %v803_v63, %v2150_v49 }
 0x256   :  { %v1696_v0 = vpack.i.bf16 %v2183_v60, %v2180_v59  ;;  %v1736_v9 = vpack.i.bf16 %v2193_v3, %v2177_v58  ;;  %v1781_v10 = vpack.i.bf16 %v2180_v59, %v2183_v60 }
 0x257   :  { %1702 = vrot.lane.b32.xlu1 %v1701_v61, %s1857_s20  ;;  %1677 = vrot.lane.b32.xlu2 %v1701_v61, %s1854_s0  ;;  %v1726_v8 = vpack.i.bf16 %v2193_v3, %v2196_v5 }
 0x258   :  { %1697 = vrot.lane.b32.xlu0 %v1696_v0, %s1856_s19 }
 0x25f   :  { %1727 = vrot.lane.b32.xlu1 %v1726_v8, %s1856_s19  ;;  %1682 = vrot.lane.b32.xlu2 %v1701_v61, %s1856_s19 }
 0x260   :  { %1717 = vrot.lane.b32.xlu0 %v1726_v8, %s1854_s0 }
 0x267   :  { %1737 = vrot.lane.b32.xlu1 %v1736_v9, %s1858_s21  ;;  %1687 = vrot.lane.b32.xlu2 %v1696_v0, %s1854_s0  ;;  %s1533_s0 = sshll.u32 %s2386_s10, 4  ;;  %s1534_s0 = int_to_ptr.hbm [resolvable:$true] %s1533_s0 }
 0x268   :  { %1742 = vrot.lane.b32.xlu0 %v1726_v8, %s1855_s18 }
 0x26f   :  { %1747 = vrot.lane.b32.xlu1 %v1746_v39, %s1860_s23  ;;  %1692 = vrot.lane.b32.xlu2 %v1701_v61, %s1855_s18 }
 0x270   :  { %1752 = vrot.lane.b32.xlu0 %v1736_v9, %s1859_s22 }
 0x277   :  { %1782 = vrot.lane.b32.xlu1 %v1781_v10, %s1859_s22  ;;  %1707 = vrot.lane.b32.xlu2 %v1696_v0, %s1855_s18 }
 0x278   :  { %1762 = vrot.lane.b32.xlu0 %v1746_v39, %s1861_s24 }
 0x27f   :  { %936 = vrot.lane.b32.xlu1 %v2196_v5, %s1859_s22  ;;  %1712 = vrot.lane.b32.xlu2 %v1696_v0, %s1857_s20 }
 0x280   :  { %1772 = vrot.lane.b32.xlu0 %v1736_v9, %s1861_s24 }
 0x287   :  { %844 = vrot.lane.b32.xlu1 %v2196_v5, %s1861_s24  ;;  %1722 = vrot.lane.b32.xlu2 %v1746_v39, %s1858_s21 }
 0x288   :  { %982 = vrot.lane.b32.xlu0 %v2196_v5, %s1858_s21 }
 0x28f   :  { %1732 = vrot.lane.b32.xlu2 %v1746_v39, %s1859_s22 }
 0x290   :  { %1792 = vrot.lane.b32.xlu0 %v1781_v10, %s1861_s24 }
 0x297   :  { %1757 = vrot.lane.b32.xlu2 %v1726_v8, %s1857_s20 }
 0x29f   :  { %1767 = vrot.lane.b32.xlu2 %v1736_v9, %s1860_s23 }
 0x2a7   :  { %1777 = vrot.lane.b32.xlu2 %v1781_v10, %s1858_s21 }
 0x2af   :  { %1787 = vrot.lane.b32.xlu2 %v1781_v10, %s1860_s23 }
 0x2b1   :  { %v1678_v36 = vpop.permute.xlu2 %1677 }
 0x2b2   :  { %v1680_v11 = vunpack.i.h.bf16 %v1678_v36  ;;  %v1679_v45 = vunpack.i.l.bf16 %v1678_v36 }
 0x2b4   :  { %v1180_v46 = vsel %vm462_vm0, %v1679_v45, %v1680_v11 }
 0x2b5   :  { %1308 = vmatpush.msrb.mxu2 %v1180_v46 }
 0x2b7   :  { %890 = vrot.lane.b32.xlu2 %v2196_v5, %s1860_s23 }
 0x2b9   :  { %v1683_v13 = vpop.permute.xlu2 %1682 }
 0x2ba   :  { %v1685_v14 = vunpack.i.h.bf16 %v1683_v13  ;;  %v1684_v53 = vunpack.i.l.bf16 %v1683_v13 }
 0x2bc   :  { %v1134_v55 = vsel %vm415_vm1, %v1684_v53, %v1685_v14 }
 0x2bd   :  { %1309 = vmatpush.msrb.mxu2 %v1134_v55 }
 0x2c1   :  { %v2243_v54 = vpop.permute.xlu2 %1687 }
 0x2c2   :  { %v1689_v16 = vunpack.i.l.bf16 %v2243_v54  ;;  %v1690_v38 = vunpack.i.h.bf16 %v2243_v54 }
 0x2c4   :  { %v1181_v4 = vsel %vm462_vm0, %v1680_v11, %v1689_v16 }
 0x2c5   :  { %1328 = vmatpush.msrb.mxu3 %v1181_v4 }
 0x2c9   :  { %v1703_v6 = vpop.permute.xlu1 %1702  ;;  %v1693_v7 = vpop.permute.xlu2 %1692 }
 0x2ca   :  { %v1705_v1 = vunpack.i.h.bf16 %v1703_v6  ;;  %v1704_v2 = vunpack.i.l.bf16 %v1703_v6  ;;  %v1695_v17 = vunpack.i.h.bf16 %v1693_v7  ;;  %v1694_v19 = vunpack.i.l.bf16 %v1693_v7  ;;  %v2247_v20 = vpop.permute.xlu0 %1697 }
 0x2cb   :  { %v1699_v21 = vunpack.i.l.bf16 %v2247_v20  ;;  %v1700_v44 = vunpack.i.h.bf16 %v2247_v20  ;;  %v2302_v20 = vld [vmem:[%s2382_s6] sm:$0xff] }
 0x2cc   :  { %v1088_v22 = vsel %vm368_vm2, %v1694_v19, %v1695_v17  ;;  %v1042_v28 = vsel %vm321_vm3, %v1704_v2, %v1705_v1 }
 0x2cd   :  { %1310 = vmatpush.msrb.mxu2 %v1088_v22  ;;  %v1135_v27 = vsel %vm415_vm1, %v1685_v14, %v1699_v21 }
 0x2ce   :  { %1329 = vmatpush.msrb.mxu3 %v1135_v27 }
 0x2cf   :  { %1311 = vmatpush.msrb.mxu2 %v1042_v28 }
 0x2d1   :  { %v2253_v29 = vpop.permute.xlu1 %1727  ;;  %v2255_v32 = vpop.permute.xlu2 %1707  ;;  %1312 = vmatpush.msrb.mxu2 %v2174_v57 }
 0x2d2   :  { %v1709_v34 = vunpack.i.l.bf16 %v2255_v32  ;;  %v2259_v37 = vpop.permute.xlu0 %1717  ;;  %v1730_v41 = vunpack.i.h.bf16 %v2253_v29  ;;  %v1710_v52 = vunpack.i.h.bf16 %v2255_v32 }
 0x2d3   :  { %v1720_v42 = vunpack.i.h.bf16 %v2259_v37 }
 0x2d4   :  { %v1089_v43 = vsel %vm368_vm2, %v1695_v17, %v1709_v34  ;;  %v1136_v25 = vsel %vm415_vm1, %v1699_v21, %v1730_v41  ;;  %v1137_v50 = vsel %vm415_vm1, %v1730_v41, %v1700_v44  ;;  %v1729_v17 = vunpack.i.l.bf16 %v2253_v29 }
 0x2d5   :  { %1330 = vmatpush.msrb.mxu3 %v1089_v43  ;;  %v1182_v23 = vsel %vm462_vm0, %v1689_v16, %v1720_v42  ;;  %v1183_v47 = vsel %vm462_vm0, %v1720_v42, %v1690_v38  ;;  %v1295_v43 = vld [vmem:[%s2383_s7] sm:$0xff] }
 0x2d6   :  { %1348 = vmatpush.msra.mxu0 %v1182_v23  ;;  %1368 = vmatpush.msra.mxu1 %v1183_v47 }
 0x2d7   :  { %1298 = vperm.xlu0 %1796, %v1295_v43  }
 0x2d8   :  { %1349 = vmatpush.msra.mxu0 %v1136_v25  ;;  %1369 = vmatpush.msra.mxu1 %v1137_v50 }
 0x2d9   :  { %v2270_v30 = vpop.permute.xlu2 %1712  ;;  %v2277_v57 = vpop.permute.xlu1 %1737 }
 0x2da   :  { %v1714_v40 = vunpack.i.l.bf16 %v2270_v30  ;;  %v2273_v51 = vpop.permute.xlu0 %1742  ;;  %v1739_v8 = vunpack.i.l.bf16 %v2277_v57  ;;  %v1715_v28 = vunpack.i.h.bf16 %v2270_v30 }
 0x2db   :  { %v1745_v56 = vunpack.i.h.bf16 %v2273_v51  ;;  %v1744_v21 = vunpack.i.l.bf16 %v2273_v51 }
 0x2dc   :  { %v1043_v61 = vsel %vm321_vm3, %v1705_v1, %v1714_v40  ;;  %v1719_v1 = vunpack.i.l.bf16 %v2259_v37  ;;  %v1138_v37 = vsel %vm415_vm1, %v1700_v44, %v1729_v17 }
 0x2dd   :  { %1331 = vmatpush.msrb.mxu3 %v1043_v61  ;;  %v1090_v62 = vsel %vm368_vm2, %v1709_v34, %v1745_v56  ;;  %v1091_v63 = vsel %vm368_vm2, %v1745_v56, %v1710_v52 }
 0x2de   :  { %1350 = vmatpush.msra.mxu0 %v1090_v62  ;;  %1370 = vmatpush.msra.mxu1 %v1091_v63  ;;  %v1184_v27 = vsel %vm462_vm0, %v1690_v38, %v1719_v1  ;;  %v1092_v38 = vsel %vm368_vm2, %v1710_v52, %v1744_v21  ;;  %v1139_v52 = vsel %vm415_vm1, %v1729_v17, %v2168_v18 }
 0x2df   :  { %1332 = vmatpush.msrb.mxu3 %v2177_v58 }
 0x2e1   :  { %v1723_v0 = vpop.permute.xlu2 %1722  ;;  %v1748_v45 = vpop.permute.xlu1 %1747 }
 0x2e2   :  { %v1725_v9 = vunpack.i.h.bf16 %v1723_v0  ;;  %v1724_v39 = vunpack.i.l.bf16 %v1723_v0  ;;  %v2284_v10 = vpop.permute.xlu0 %1752  ;;  %v1750_v46 = vunpack.i.h.bf16 %v1748_v45  ;;  %v1749_v14 = vunpack.i.l.bf16 %v1748_v45 }
 0x2e3   :  { %v1754_v58 = vunpack.i.l.bf16 %v2284_v10  ;;  %v1093_v0 = vsel %vm368_vm2, %v1744_v21, %v2234_v12 }
 0x2e4   :  { %v984_v36 = vsel %vm262_vm4, %v1724_v39, %v1725_v9  ;;  %v985_v11 = vsel %vm262_vm4, %v1725_v9, %v1739_v8  ;;  %v892_v2 = vsel %vm168_vm6, %v1749_v14, %v1750_v46  ;;  %v1755_v9 = vunpack.i.h.bf16 %v2284_v10 }
 0x2e5   :  { %1313 = vmatpush.msrb.mxu2 %v984_v36  ;;  %1333 = vmatpush.msrb.mxu3 %v985_v11 }
 0x2e9   :  { %v1733_v13 = vpop.permute.xlu2 %1732 }
 0x2ea   :  { %v1735_v53 = vunpack.i.h.bf16 %v1733_v13  ;;  %v1734_v55 = vunpack.i.l.bf16 %v1733_v13  ;;  %v1763_v54 = vpop.permute.xlu0 %1762 }
 0x2eb   :  { %v1765_v16 = vunpack.i.h.bf16 %v1763_v54  ;;  %v1764_v4 = vunpack.i.l.bf16 %v1763_v54 }
 0x2ec   :  { %v938_v6 = vsel %vm215_vm5, %v1734_v55, %v1735_v53  ;;  %v939_v7 = vsel %vm215_vm5, %v1735_v53, %v1754_v58 }
 0x2ed   :  { %1314 = vmatpush.msrb.mxu2 %v938_v6  ;;  %1334 = vmatpush.msrb.mxu3 %v939_v7  ;;  %v846_v19 = vsel %vm121_vm7, %v1764_v4, %v1765_v16 }
 0x2ef   :  { %1315 = vmatpush.msrb.mxu2 %v892_v2 }
 0x2f1   :  { %v1758_v22 = vpop.permute.xlu2 %1757  ;;  %1316 = vmatpush.msrb.mxu2 %v846_v19 }
 0x2f2   :  { %v1760_v32 = vunpack.i.h.bf16 %v1758_v22  ;;  %v1759_v34 = vunpack.i.l.bf16 %v1758_v22  ;;  %v2307_v29 = vpop.permute.xlu0 %1772  ;;  %1317 = vmatmul.f32.vlgmr.msrb.gmra.mxu2 %v2302_v20 }
 0x2f3   :  { %1388 = vmatpush.msra.mxu2 %v1184_v27  ;;  %v1774_v47 = vunpack.i.l.bf16 %v2307_v29  ;;  %v1775_v54 = vunpack.i.h.bf16 %v2307_v29 }
 0x2f4   :  { %v1044_v41 = vsel %vm321_vm3, %v1714_v40, %v1760_v32  ;;  %v1045_v42 = vsel %vm321_vm3, %v1760_v32, %v1715_v28  ;;  %v1046_v44 = vsel %vm321_vm3, %v1715_v28, %v1759_v34  ;;  %v1783_v40 = vpop.permute.xlu1 %1782  ;;  %v1047_v36 = vsel %vm321_vm3, %v1759_v34, %v2239_v15 }
 0x2f5   :  { %1389 = vmatpush.msra.mxu2 %v1138_v37  ;;  %1351 = vmatpush.msra.mxu0 %v1044_v41  ;;  %v847_v51 = vsel %vm121_vm7, %v1765_v16, %v1774_v47  ;;  %v1785_v56 = vunpack.i.h.bf16 %v1783_v40  ;;  %v1784_v63 = vunpack.i.l.bf16 %v1783_v40 }
 0x2f6   :  { %1371 = vmatpush.msra.mxu1 %v1045_v42 }
 0x2f7   :  { %1390 = vmatpush.msra.mxu2 %v1092_v38  ;;  %1352 = vmatpush.msra.mxu0 %v2180_v59  ;;  %v1185_v59 = vsel %vm462_vm0, %v1719_v1, %v2241_v35  ;;  %v940_v12 = vsel %vm215_vm5, %v1754_v58, %v1785_v56  ;;  %v941_v11 = vsel %vm215_vm5, %v1785_v56, %v1755_v9 }
 0x2f8   :  { %1372 = vmatpush.msra.mxu1 %v2193_v3 }
 0x2f9   :  { %1391 = vmatpush.msra.mxu2 %v1046_v44  ;;  %v1768_v23 = vpop.permute.xlu2 %1767 }
 0x2fa   :  { %v1769_v25 = vunpack.i.l.bf16 %v1768_v23  ;;  %v983_v30 = vpop.permute.xlu0 %982  ;;  %v1770_v13 = vunpack.i.h.bf16 %v1768_v23 }
 0x2fb   :  { %1392 = vmatpush.msra.mxu2 %v2183_v60  ;;  %v1740_v60 = vunpack.i.h.bf16 %v2277_v57 }
 0x2fc   :  { %v893_v50 = vsel %vm168_vm6, %v1750_v46, %v1769_v25  ;;  %v937_v45 = vpop.permute.xlu1 %936 }
 0x2fd   :  { %1335 = vmatpush.msrb.mxu3 %v893_v50  ;;  %v943_v55 = vsel %vm215_vm5, %v1784_v63, %v937_v45 }
 0x2ff   :  { %1336 = vmatpush.msrb.mxu3 %v847_v51 }
 0x300   :  { %1337 = vmatmul.f32.vlgmr.msrb.gmra.mxu3 %v2302_v20 }
 0x301   :  { %1408 = vmatpush.msra.mxu3 %v1185_v59  ;;  %v1778_v3 = vpop.permute.xlu2 %1777 }
 0x302   :  { %v1780_v61 = vunpack.i.h.bf16 %v1778_v3  ;;  %v1779_v62 = vunpack.i.l.bf16 %v1778_v3  ;;  %v1793_v57 = vpop.permute.xlu0 %1792 }
 0x303   :  { %1409 = vmatpush.msra.mxu3 %v1139_v52  ;;  %v1795_v14 = vunpack.i.h.bf16 %v1793_v57  ;;  %v1794_v58 = vunpack.i.l.bf16 %v1793_v57 }
 0x304   :  { %v986_v35 = vsel %vm262_vm4, %v1739_v8, %v1780_v61  ;;  %v987_v18 = vsel %vm262_vm4, %v1780_v61, %v1740_v60  ;;  %v988_v39 = vsel %vm262_vm4, %v1740_v60, %v1779_v62  ;;  %v942_v8 = vsel %vm215_vm5, %v1755_v9, %v1784_v63  ;;  %v845_v19 = vpop.permute.xlu1 %844 }
 0x305   :  { %1410 = vmatpush.msra.mxu3 %v1093_v0  ;;  %1353 = vmatpush.msra.mxu0 %v986_v35  ;;  %v989_v15 = vsel %vm262_vm4, %v1779_v62, %v983_v30  ;;  %v848_v6 = vsel %vm121_vm7, %v1774_v47, %v1795_v14  ;;  %v849_v7 = vsel %vm121_vm7, %v1795_v14, %v1775_v54  ;;  %v1452_v14 = vld [vmem:[%s2384_s8] sm:$0xff]  ;;  %s1864_s8 = smov [#allocation7]  }
 0x306   :  { %1373 = vmatpush.msra.mxu1 %v987_v18  ;;  %1393 = vmatpush.msra.mxu2 %v988_v39  ;;  %v850_v1 = vsel %vm121_vm7, %v1775_v54, %v1794_v58  ;;  %v851_v21 = vsel %vm121_vm7, %v1794_v58, %v845_v19  ;;  %v1465_v54 = vld [vmem:[%s2385_s9] sm:$0xff]  ;;  %s1531_s9 = sshll.u32 %s1864_s8, 4  ;;  %s1532_s9 = int_to_ptr.vmem [resolvable:$true] %s1531_s9 }
 0x307   :  { %1411 = vmatpush.msra.mxu3 %v1047_v36  ;;  %1354 = vmatpush.msra.mxu0 %v940_v12 }
 0x308   :  { %1374 = vmatpush.msra.mxu1 %v941_v11  ;;  %1394 = vmatpush.msra.mxu2 %v942_v8 }
 0x309   :  { %1412 = vmatpush.msra.mxu3 %v2196_v5  ;;  %v1788_v46 = vpop.permute.xlu2 %1787 }
 0x30a   :  { %v1790_v53 = vunpack.i.h.bf16 %v1788_v46  ;;  %v1789_v10 = vunpack.i.l.bf16 %v1788_v46 }
 0x30b   :  { %1413 = vmatpush.msra.mxu3 %v989_v15 }
 0x30c   :  { %v894_v16 = vsel %vm168_vm6, %v1769_v25, %v1790_v53  ;;  %v895_v4 = vsel %vm168_vm6, %v1790_v53, %v1770_v13  ;;  %v896_v5 = vsel %vm168_vm6, %v1770_v13, %v1789_v10 }
 0x30d   :  { %1414 = vmatpush.msra.mxu3 %v943_v55  ;;  %1355 = vmatpush.msra.mxu0 %v894_v16 }
 0x30e   :  { %1375 = vmatpush.msra.mxu1 %v895_v4  ;;  %1395 = vmatpush.msra.mxu2 %v896_v5 }
 0x30f   :  { %1356 = vmatpush.msra.mxu0 %v848_v6 }
 0x310   :  { %1376 = vmatpush.msra.mxu1 %v849_v7  ;;  %1396 = vmatpush.msra.mxu2 %v850_v1 }
 0x311   :  { %1357 = vmatmul.f32.vlgmr.msra.gmra.mxu0 %v2302_v20  ;;  %1397 = vmatmul.f32.vlgmr.msra.gmra.mxu2 %v2302_v20  ;;  %v891_v2 = vpop.permute.xlu2 %890 }
 0x312   :  { %1377 = vmatmul.f32.vlgmr.msra.gmra.mxu1 %v2302_v20  ;;  %v897_v17 = vsel %vm168_vm6, %v1789_v10, %v891_v2 }
 0x313   :  { %1415 = vmatpush.msra.mxu3 %v897_v17 }
 0x315   :  { %1416 = vmatpush.msra.mxu3 %v851_v21 }
 0x316   :  { %1417 = vmatmul.f32.vlgmr.msra.gmra.mxu3 %v2302_v20 }
 0x349   :  { %v1299_v22 = vpop.permute.xlu0 %1298 }
 0x375   :  { %v1318_v27 = vpop.f32.mrf.mxu2 }
 0x376   :  { %v1319_v32 = vadd.f32 %v1318_v27, %v1299_v22 }
 0x378   :  { %v1421_v29 = vmul.f32 %v1319_v32, %v2126_v24 }
 0x37a   :  { %v1434_v43 = vmul.f32 %v1421_v29, %v1319_v32 }
 0x383   :  { %v1338_v28 = vpop.f32.mrf.mxu3 }
 0x384   :  { %v1339_v34 = vadd.f32 %v1338_v28, %v1299_v22 }
 0x386   :  { %v1422_v37 = vmul.f32 %v1339_v34, %v2130_v26 }
 0x388   :  { %v1427_v44 = vadd.f32 %v1422_v37, %v1421_v29  ;;  %v1435_v23 = vmul.f32 %v1422_v37, %v1339_v34  ;;  %v1508_v29 = vld [vmem:[#allocation4 + $0x8] sm:$0xff] }
 0x38a   :  { %v1440_v50 = vadd.f32 %v1435_v23, %v1434_v43  ;;  %v1510_v43 = vld [vmem:[#allocation4 + $0x18] sm:$0xff] }
 0x38e   :  { %v1358_v41 = vpop.f32.mrf.mxu0 }
 0x38f   :  { %v1359_v42 = vadd.f32 %v1358_v41, %v1299_v22  ;;  %v1378_v38 = vpop.f32.mrf.mxu1 }
 0x390   :  { %v1379_v25 = vadd.f32 %v1378_v38, %v1299_v22  ;;  %v1509_v38 = vld [vmem:[#allocation4 + $0x10] sm:$0xff] }
 0x391   :  { %v1423_v47 = vmul.f32 %v1359_v42, %v2138_v31 }
 0x392   :  { %v1424_v40 = vmul.f32 %v1379_v25, %v2140_v33 }
 0x393   :  { %v1428_v20 = vadd.f32 %v1427_v44, %v1423_v47  ;;  %v1436_v30 = vmul.f32 %v1423_v47, %v1359_v42  ;;  %v1511_v44 = vld [vmem:[#allocation4 + $0x20] sm:$0xff] }
 0x394   :  { %v1398_v51 = vpop.f32.mrf.mxu2  ;;  %v1437_v26 = vmul.f32 %v1424_v40, %v1379_v25 }
 0x395   :  { %v1399_v59 = vadd.f32 %v1398_v51, %v1299_v22  ;;  %v1441_v3 = vadd.f32 %v1440_v50, %v1436_v30  ;;  %v1429_v52 = vadd.f32 %v1428_v20, %v1424_v40  ;;  %v1513_v40 = vld [vmem:[#allocation4 + $0x30] sm:$0xff] }
 0x397   :  { %v1425_v24 = vmul.f32 %v1399_v59, %v2148_v48  ;;  %v1442_v31 = vadd.f32 %v1441_v3, %v1437_v26 }
 0x399   :  { %v1418_v60 = vpop.f32.mrf.mxu3  ;;  %v1438_v56 = vmul.f32 %v1425_v24, %v1399_v59  ;;  %v1430_v63 = vadd.f32 %v1429_v52, %v1425_v24 }
 0x39a   :  { %v1419_v61 = vadd.f32 %v1418_v60, %v1299_v22 }
 0x39b   :  { %v1443_v35 = vadd.f32 %v1442_v31, %v1438_v56 }
 0x39c   :  { %v1426_v62 = vmul.f32 %v1419_v61, %v2150_v49 }
 0x39e   :  { %v1431_v0 = vadd.f32 %v1430_v63, %v1426_v62  ;;  %v1439_v9 = vmul.f32 %v1426_v62, %v1419_v61 }
 0x3a0   :  { %1432 = vadd.xlane.f32.xlu2 %v1431_v0  ;;  %v1444_v18 = vadd.f32 %v1443_v35, %v1439_v9 }
 0x3a2   :  { %1445 = vadd.xlane.f32.xlu1 %v1444_v18 }
 0x413   :  { %v1433_v33 = vpop.xlane.xlu2 %1432 }
 0x414   :  { %v1447_v39 = vmul.f32 0.001953125, %v1433_v33 }
 0x415   :  { %v1446_v36 = vpop.xlane.xlu1 %1445 }
 0x416   :  { %v1449_v48 = vmul.f32 %v1447_v39, %v1447_v39  ;;  %v1448_v12 = vmul.f32 0.001953125, %v1446_v36 }
 0x418   :  { %v1450_v11 = vsub.f32 %v1448_v12, %v1449_v48 }
 0x41a   :  { %v1451_v57 = vmax.f32 %v1450_v11, 0.0 }
 0x41c   :  { %v1453_v8 = vadd.f32 1e-05, %v1451_v57 }
 0x41e   :  { %1799 = vrsqrt.f32 %v1453_v8  ;;  %vm1460_vm1 = vweird.f32 %v1453_v8 }
 0x424   :  { %v1800_v45 = vpop.eup %1799 }
 0x425   :  { %v1455_v46 = vmul.f32 %v1800_v45, %v1453_v8  ;;  %vm1461_vm0 = vweird.f32 %v1800_v45 }
 0x426   :  { %vm1462_vm2 = vmor %vm1460_vm1, %vm1461_vm0 }
 0x427   :  { %v1456_v49 = vmul.f32 %v1800_v45, %v1455_v46 }
 0x429   :  { %v1457_v15 = vmul.f32 0.5, %v1456_v49 }
 0x42b   :  { %v1458_v13 = vsub.f32 1.5, %v1457_v15 }
 0x42d   :  { %v1459_v53 = vmul.f32 %v1800_v45, %v1458_v13 }
 0x42f   :  { %v1463_v10 = vsel %vm1462_vm2, %v1800_v45, %v1459_v53 }
 0x430   :  { %v1464_v58 = vmul.f32 %v1463_v10, %v1452_v14 }
 0x432   :  { %1470 = vperm.xlu0 %1796, %v1464_v58   ;;  %v1466_v55 = vmul.f32 %v1464_v58, %v1447_v39 }
 0x434   :  { %v1467_v16 = vsub.f32 %v1465_v54, %v1466_v55 }
 0x43a   :  { %1481 = vperm.xlu0 %1796, %v1467_v16  }
 0x4a4   :  { %v1471_v4 = vpop.permute.xlu0 %1470 }
 0x4a5   :  { %v1473_v5 = vmul.f32 %v1471_v4, %v1319_v32  ;;  %v1474_v6 = vmul.f32 %v1471_v4, %v1339_v34  ;;  %v1475_v7 = vmul.f32 %v1471_v4, %v1359_v42  ;;  %v1476_v1 = vmul.f32 %v1471_v4, %v1379_v25  ;;  %v1512_v25 = vld [vmem:[#allocation4 + $0x28] sm:$0xff] }
 0x4a6   :  { %v1477_v2 = vmul.f32 %v1471_v4, %v1399_v59  ;;  %v1478_v17 = vmul.f32 %v1471_v4, %v1419_v61 }
 0x4ac   :  { %v1482_v19 = vpop.permute.xlu0 %1481 }
 0x4ad   :  { %v1484_v21 = vadd.f32 %v1482_v19, %v1473_v5  ;;  %v1485_v22 = vadd.f32 %v1482_v19, %v1474_v6  ;;  %v1486_v27 = vadd.f32 %v1482_v19, %v1475_v7  ;;  %v1487_v28 = vadd.f32 %v1482_v19, %v1476_v1 }
 0x4ae   :  { %v1488_v37 = vadd.f32 %v1482_v19, %v1477_v2  ;;  %v1489_v41 = vadd.f32 %v1482_v19, %v1478_v17 }
 0x4af   :  { %vm1490_vm3 = vcmp.gt.f32.partialorder %v1484_v21, 0.0  ;;  %vm1491_vm4 = vcmp.gt.f32.partialorder %v1485_v22, 0.0  ;;  %vm1492_vm5 = vcmp.gt.f32.partialorder %v1486_v27, 0.0  ;;  %vm1493_vm6 = vcmp.gt.f32.partialorder %v1487_v28, 0.0 }
 0x4b0   :  { %vm1494_vm7 = vcmp.gt.f32.partialorder %v1488_v37, 0.0  ;;  %vm1495_vm9 = vcmp.gt.f32.partialorder %v1489_v41, 0.0  ;;  %v1496_v32 = vmul.f32 0.01, %v1484_v21  ;;  %v1497_v34 = vmul.f32 0.01, %v1485_v22 }
 0x4b1   :  { %v1498_v42 = vmul.f32 0.01, %v1486_v27  ;;  %v1499_v23 = vmul.f32 0.01, %v1487_v28  ;;  %v1500_v47 = vmul.f32 0.01, %v1488_v37 }
 0x4b2   :  { %v1501_v50 = vmul.f32 0.01, %v1489_v41  ;;  %v1502_v20 = vsel %vm1490_vm3, %v1484_v21, %v1496_v32  ;;  %v1503_v30 = vsel %vm1491_vm4, %v1485_v22, %v1497_v34 }
 0x4b3   :  { %v1504_v51 = vsel %vm1492_vm5, %v1486_v27, %v1498_v42  ;;  %v1505_v59 = vsel %vm1493_vm6, %v1487_v28, %v1499_v23  ;;  %v1506_v24 = vsel %vm1494_vm7, %v1488_v37, %v1500_v47  ;;  %v1514_v3 = vadd.f32 %v1508_v29, %v1502_v20 }
 0x4b4   :  { %v1507_v26 = vsel %vm1495_vm9, %v1489_v41, %v1501_v50  ;;  %v1515_v52 = vadd.f32 %v1509_v38, %v1503_v30  ;;  %v1516_v60 = vadd.f32 %v1510_v43, %v1504_v51  ;;  %v1517_v56 = vadd.f32 %v1511_v44, %v1505_v59 }
 0x4b5   :  { %v1518_v61 = vadd.f32 %v1512_v25, %v1506_v24  ;;  %1520 = vst [vmem:[#allocation7] sm:$0xff] %v1514_v3  ;;  %v1519_v62 = vadd.f32 %v1513_v40, %v1507_v26 }
 0x4b6   :  { %1521 = vst [vmem:[#allocation7 + $0x8] sm:$0xff] %v1515_v52 }
 0x4b7   :  { %1522 = vst [vmem:[#allocation7 + $0x10] sm:$0xff] %v1516_v60 }
 0x4b8   :  { %1523 = vst [vmem:[#allocation7 + $0x18] sm:$0xff] %v1517_v56 }
 0x4b9   :  { %1524 = vst [vmem:[#allocation7 + $0x20] sm:$0xff] %v1518_v61 }
 0x4ba   :  { %1525 = vst [vmem:[#allocation7 + $0x28] sm:$0xff] %v1519_v62 }
 0x4bb   :  { %1536 = dma.vmem_to_hbm [thread:$0]  %s1532_s9, 768, %s1534_s0, [#allocation6]  }
 0x4bc   :  { %1851 = dma.done.wait [#allocation6], 768  }
 0x4bd   :  { %1852 = vsyncadd [#allocation6], 4294966528 }
 0x4be   :  { %1541 = vsyncpa [#allocation5], 1 }
 0x4bf   :  { %1542 = vsyncpa [#allocation6], 1 }

</bundles_post_ra>
